<compile_context>
chip_gen: v5e
topology: v5e:2x2
jax: 0.10.0
libtpu: 0.0.40
codegen_flags: <defaults>
</compile_context>

<pallas_src>
import functools

import jax
import jax.numpy as jnp
from jax.experimental import pallas as pl
from jax.experimental.pallas import tpu as pltpu

BN_EPS = 1e-5          # nn.BatchNorm1d default eps
LRELU_SLOPE = 0.2      # nn.LeakyReLU(0.2)
LANE = 128             # TPU lane width (last-dim alignment target)
SUBLANE = 8


# ------------------------------- small helpers ------------------------------ #

def _round_up(x, m):
    return ((x + m - 1) // m) * m


def _pad_axis(a, size, axis):
    pad = size - a.shape[axis]
    if pad == 0:
        return a
    widths = [(0, 0)] * a.ndim
    widths[axis] = (0, pad)
    return jnp.pad(a, widths)


def _tiling(v, v_tile):
    # Balanced vertex tiling: tile is a multiple of 8 sublanes, total padding
    # stays below one tile.
    n_tiles = max(1, -(-v // v_tile))
    tile = _round_up(-(-v // n_tiles), SUBLANE)
    return tile, tile * n_tiles, n_tiles


def _compiler_params(semantics, est_bytes):
    # Explicit VMEM budget with headroom (v7x: 64 MiB physical / 32 MiB scoped
    # default, so never rely on the implicit limit).
    vmem = max(2 * int(est_bytes) + (1 << 20), 8 << 20)
    return pltpu.CompilerParams(dimension_semantics=semantics,
                                vmem_limit_bytes=int(vmem))


# ------------------------------- Pallas kernels ------------------------------ #

def _linear_kernel(x_ref, w_ref, b_ref, o_ref):
    # o = x @ w + b. MXU matmul with f32 accumulation; N is 128-aligned so the
    # store is lane-dense (unmasked vst). Output stored in o_ref.dtype.
    acc = jnp.dot(x_ref[...], w_ref[...], preferred_element_type=jnp.float32)
    o_ref[...] = (acc + b_ref[...]).astype(o_ref.dtype)


def _matmul_stats_kernel(mat_ref, w_ref, z_ref, sum_ref, sq_ref):
    # Pass A of conv+BN: z = mat @ w (the Linear bias is folded out — it
    # cancels exactly under batch-statistics BatchNorm). Each grid step writes
    # PER-TILE partial column sums / sums-of-squares into its own (8, N)
    # output block (row 0 holds the values), so the grid axis stays fully
    # "parallel"; the tiny cross-tile reduction happens in XLA afterwards.
    z = jnp.dot(mat_ref[...], w_ref[...], preferred_element_type=jnp.float32)
    z_ref[...] = z.astype(z_ref.dtype)
    colsum = jnp.sum(z, axis=0, keepdims=True)          # (1, N) f32
    colsq = jnp.sum(z * z, axis=0, keepdims=True)       # (1, N) f32
    row = jax.lax.broadcasted_iota(jnp.int32, sum_ref.shape, 0)
    sum_ref[...] = jnp.where(row == 0, colsum, 0.0)
    sq_ref[...] = jnp.where(row == 0, colsq, 0.0)


def _affine_lrelu_kernel(z_ref, scale_ref, shift_ref, o_ref):
    # Pass B of conv+BN: y = z * scale + shift ; LeakyReLU(0.2).
    # scale/shift already fold mean/var/gamma/beta (hoisted outside the
    # kernel); math in f32, storage in o_ref.dtype.
    y = z_ref[...].astype(jnp.float32) * scale_ref[...] + shift_ref[...]
    o_ref[...] = jnp.where(y >= 0.0, y, LRELU_SLOPE * y).astype(o_ref.dtype)


# --------------------------------- wrappers ---------------------------------- #

def linear_pallas(x, w, b, *, v_tile=512, compute_dtype=jnp.float32,
                  out_dtype=None):
    """Lane-dense, V-tiled `x @ w + b`.

    Returns the PADDED (v_pad, n_pad) result in `out_dtype`; callers account
    for the 128-lane channel padding in their index math instead of slicing
    it off (keeps every store an unmasked 128-lane vst and avoids a relayout
    copy)."""
    out_dtype = compute_dtype if out_dtype is None else out_dtype
    v, k = x.shape
    k2, n = w.shape
    assert k == k2
    n_pad = _round_up(n, LANE)
    tile, v_pad, n_tiles = _tiling(v, v_tile)

    x_p = _pad_axis(x.astype(compute_dtype), v_pad, 0)
    w_p = _pad_axis(w.astype(compute_dtype), n_pad, 1)
    b_p = _pad_axis(b.astype(jnp.float32), n_pad, 1)

    isz = jnp.dtype(compute_dtype).itemsize
    osz = jnp.dtype(out_dtype).itemsize
    est = tile * k * isz + k * n_pad * isz + tile * n_pad * osz + n_pad * 4

    return pl.pallas_call(
        _linear_kernel,
        out_shape=jax.ShapeDtypeStruct((v_pad, n_pad), out_dtype),
        grid=(n_tiles,),
        in_specs=[
            pl.BlockSpec((tile, k), lambda i: (i, 0)),
            pl.BlockSpec((k, n_pad), lambda i: (0, 0)),
            pl.BlockSpec((1, n_pad), lambda i: (0, 0)),
        ],
        out_specs=pl.BlockSpec((tile, n_pad), lambda i: (i, 0)),
        compiler_params=_compiler_params(("parallel",), est),
    )(x_p, w_p, b_p)


def conv_bn_lrelu_pallas(mat, w, gamma, beta, *, v_tile=512,
                         compute_dtype=jnp.float32, out_dtype=None):
    """Fused conv_layer Linear + BatchNorm1d (batch stats, biased var, affine)
    + LeakyReLU(0.2), tiled over the vertex axis.

    The Linear bias is intentionally omitted: with batch-statistics BatchNorm
    it cancels exactly ((z + b) - mean(z + b) == z - mean(z)), and dropping it
    makes zero-padded vertex rows contribute exactly zero to the statistics.

    Returns (v_pad, n_pad) in `out_dtype` with channels zero-padded to a
    multiple of 128 (lane-dense stores); the caller slices real rows/channels.
    """
    out_dtype = compute_dtype if out_dtype is None else out_dtype
    v, k = mat.shape
    k2, n = w.shape
    assert k == k2
    n_pad = _round_up(n, LANE)
    tile, v_pad, n_tiles = _tiling(v, v_tile)

    mat_p = _pad_axis(mat.astype(compute_dtype), v_pad, 0)
    w_p = _pad_axis(w.astype(compute_dtype), n_pad, 1)
    gamma_p = _pad_axis(gamma.astype(jnp.float32), n_pad, 1)
    beta_p = _pad_axis(beta.astype(jnp.float32), n_pad, 1)

    isz = jnp.dtype(compute_dtype).itemsize
    est_a = (tile * k * isz + k * n_pad * isz + tile * n_pad * isz
             + 2 * SUBLANE * n_pad * 4)

    # ---- Pass A: z = mat @ w, per-tile partial sum / sumsq outputs (fully
    # "parallel" grid; on v7x the two TensorCores split the tiles).
    z, zsum, zsq = pl.pallas_call(
        _matmul_stats_kernel,
        out_shape=(
            jax.ShapeDtypeStruct((v_pad, n_pad), compute_dtype),
            jax.ShapeDtypeStruct((n_tiles * SUBLANE, n_pad), jnp.float32),
            jax.ShapeDtypeStruct((n_tiles * SUBLANE, n_pad), jnp.float32),
        ),
        grid=(n_tiles,),
        in_specs=[
            pl.BlockSpec((tile, k), lambda i: (i, 0)),
            pl.BlockSpec((k, n_pad), lambda i: (0, 0)),
        ],
        out_specs=(
            pl.BlockSpec((tile, n_pad), lambda i: (i, 0)),
            pl.BlockSpec((SUBLANE, n_pad), lambda i: (i, 0)),
            pl.BlockSpec((SUBLANE, n_pad), lambda i: (i, 0)),
        ),
        compiler_params=_compiler_params(("parallel",), est_a),
    )(mat_p, w_p)

    # ---- Finalize BN statistics in f32 (tiny (*, n_pad) math, stays in XLA).
    # Padded mat rows are exact zero rows -> they contribute exactly zero to
    # both partial sums, so the statistics cover the true V vertices only.
    count = jnp.float32(v)
    s = jnp.sum(zsum, axis=0, keepdims=True)
    ss = jnp.sum(zsq, axis=0, keepdims=True)
    mean = s / count
    # TODO(synk): switch to centered two-pass accumulation if E[x^2]-E[x]^2
    # cancellation becomes visible vs the PyTorch reference at production scale.
    var = jnp.maximum(ss / count - mean * mean, 0.0)     # biased var, as BN uses
    scale = gamma_p * jax.lax.rsqrt(var + BN_EPS)
    shift = beta_p - mean * scale

    osz = jnp.dtype(out_dtype).itemsize
    est_b = tile * n_pad * (isz + osz) + 2 * n_pad * 4

    # ---- Pass B: tiled, fully parallel normalize + affine + LeakyReLU (f32
    # epilogue math on every chip generation, incl. v5e).
    out = pl.pallas_call(
        _affine_lrelu_kernel,
        out_shape=jax.ShapeDtypeStruct((v_pad, n_pad), out_dtype),
        grid=(n_tiles,),
        in_specs=[
            pl.BlockSpec((tile, n_pad), lambda i: (i, 0)),
            pl.BlockSpec((1, n_pad), lambda i: (0, 0)),
            pl.BlockSpec((1, n_pad), lambda i: (0, 0)),
        ],
        out_specs=pl.BlockSpec((tile, n_pad), lambda i: (i, 0)),
        compiler_params=_compiler_params(("parallel",), est_b),
    )(z, scale, shift)
    return out


# -------------------------------- forward pass -------------------------------- #

def up_block_forward(params, x1, x2, neigh_orders, up_top_idx, up_down_idx,
                     out_ch, *, v_tile=512, compute_dtype=jnp.float32):
    # ---- upconv_layer(in_ch, out_ch, top_idx, down_idx) ----
    y_pad = linear_pallas(x1, params["w_up"], params["b_up"],
                          v_tile=v_tile, compute_dtype=compute_dtype)
    n_up = params["w_up"].shape[1]          # 7 * out_ch
    n_up_pad = y_pad.shape[1]               # 128-aligned
    if n_up_pad % out_ch == 0:
        # Lane-dense path: never slice off the channel padding; skip the
        # phantom padding groups purely in the row-index math.
        groups_pad = n_up_pad // out_ch
        y_rows = y_pad.reshape(-1, out_ch)                          # (raw_pad*g, out_ch)
        top_idx = (up_top_idx // 7) * groups_pad + (up_top_idx % 7)
        down_idx = (up_down_idx // 7) * groups_pad + (up_down_idx % 7)
    else:
        y_rows = y_pad[:, :n_up].reshape(-1, out_ch)                # fallback slice
        top_idx, down_idx = up_top_idx, up_down_idx
    x1_top = y_rows[top_idx]
    # matches torch: x[down].view(-1, out_ch, 2).mean(2)  (row-major reshape)
    x1_down = y_rows[down_idx].reshape(-1, out_ch, 2).mean(axis=2)
    x1_up = jnp.concatenate([x1_top, x1_down], axis=0)              # (new, out_ch)

    # ---- torch.cat((x1, x2), dim=1) ----
    x = jnp.concatenate([x1_up, x2.astype(compute_dtype)], axis=1)  # (new, in_ch)

    # ---- double_conv: (conv => BN => LeakyReLU) * 2 ----
    # Note: the conv biases b1/b2 cancel exactly under batch-statistics BN,
    # so the fused kernels never read them.
    n_vert = x.shape[0]
    # TODO(synk): fuse this 7-ring gather (and the one below) into the conv
    # kernel via scalar-prefetched neigh_orders + manual DMA gather so the
    # 7x-amplified matrix never hits HBM (stream the source on v7x's 64 MiB VMEM).
    mat1 = x[neigh_orders].reshape(n_vert, -1)                      # (new, 7*in_ch)
    h_pad = conv_bn_lrelu_pallas(mat1, params["w1"],
                                 params["gamma1"], params["beta1"],
                                 v_tile=v_tile, compute_dtype=compute_dtype,
                                 out_dtype=compute_dtype)
    # Slice the real out_ch channels BEFORE the second gather so conv2 sees
    # K = 7*out_ch (not 7*n_pad): ~4x less HBM traffic and MXU work.
    h = h_pad[:, :out_ch]                                           # (v_pad, out_ch)
    mat2 = h[neigh_orders].reshape(n_vert, -1)                      # (new, 7*out_ch)
    out_pad = conv_bn_lrelu_pallas(mat2, params["w2"],
                                   params["gamma2"], params["beta2"],
                                   v_tile=v_tile, compute_dtype=compute_dtype,
                                   out_dtype=jnp.float32)
    # Single de-padding slice at the very end.
    return out_pad[:n_vert, :out_ch]


# Pure-JAX reference (mirrors the PyTorch forward) for verification.  Matmul
# operands and stored activations use compute_dtype (as the Pallas path does);
# BN statistics / epilogue math stay f32.  Includes the conv biases, which
# demonstrates that they cancel under batch-stat BN.
def up_block_reference(params, x1, x2, neigh_orders, up_top_idx, up_down_idx,
                       out_ch, compute_dtype=jnp.float32):
    def dot(a, b):
        return jnp.dot(a.astype(compute_dtype), b.astype(compute_dtype),
                       preferred_element_type=jnp.float32)

    def conv_bn_lrelu(x, w, b, g, be):
        z = dot(x, w) + b
        mean = jnp.mean(z, axis=0, keepdims=True)
        var = jnp.mean((z - mean) ** 2, axis=0, keepdims=True)
        y = (z - mean) / jnp.sqrt(var + BN_EPS) * g + be
        return jnp.where(y >= 0.0, y, LRELU_SLOPE * y)

    y = (dot(x1, params["w_up"]) + params["b_up"]).astype(compute_dtype)
    y = y.reshape(-1, out_ch)
    x1_top = y[up_top_idx]
    x1_down = y[up_down_idx].reshape(-1, out_ch, 2).mean(axis=2)
    x = jnp.concatenate([jnp.concatenate([x1_top, x1_down], axis=0),
                         x2.astype(compute_dtype)], axis=1)
    n_vert = x.shape[0]
    h = conv_bn_lrelu(x[neigh_orders].reshape(n_vert, -1),
                      params["w1"], params["b1"], params["gamma1"], params["beta1"])
    h = h.astype(compute_dtype)
    return conv_bn_lrelu(h[neigh_orders].reshape(n_vert, -1),
                         params["w2"], params["b2"], params["gamma2"], params["beta2"])


# ------------------------------------ main ------------------------------------ #

if __name__ == "__main__":
    # Icosahedral level: raw_nodes=162 -> new_nodes = 162*4 - 6 = 642.
    raw_nodes = 162
    new_nodes = raw_nodes * 4 - 6            # 642
    in_ch, out_ch = 64, 32                   # skip connection x2 has in_ch - out_ch channels

    key = jax.random.PRNGKey(0)
    ks = jax.random.split(key, 12)

    # Inputs.
    x1 = jax.random.normal(ks[0], (raw_nodes, in_ch), jnp.float32)
    x2 = jax.random.normal(ks[1], (new_nodes, in_ch - out_ch), jnp.float32)

    # Synthetic (valid-range, deterministic) index tensors.
    up_top_idx = jnp.arange(raw_nodes, dtype=jnp.int32) * 7                        # (162,)
    up_down_idx = jax.random.randint(ks[2], (2 * (new_nodes - raw_nodes),), 0,
                                     raw_nodes * 7, dtype=jnp.int32)               # (960,)
    neigh_orders = jax.random.randint(ks[3], (7 * new_nodes,), 0,
                                      new_nodes, dtype=jnp.int32)                  # (4494,)

    # Parameters (Linear weights stored transposed: (in, out)).
    params = {
        "w_up": jax.random.normal(ks[4], (in_ch, 7 * out_ch), jnp.float32) * 0.1,
        "b_up": jax.random.normal(ks[5], (1, 7 * out_ch), jnp.float32) * 0.01,
        "w1": jax.random.normal(ks[6], (7 * in_ch, out_ch), jnp.float32) * 0.05,
        "b1": jax.random.normal(ks[7], (1, out_ch), jnp.float32) * 0.01,
        "gamma1": 1.0 + 0.1 * jax.random.normal(ks[8], (1, out_ch), jnp.float32),
        "beta1": 0.1 * jax.random.normal(ks[9], (1, out_ch), jnp.float32),
        "w2": jax.random.normal(ks[10], (7 * out_ch, out_ch), jnp.float32) * 0.1,
        "b2": jax.random.normal(ks[11], (1, out_ch), jnp.float32) * 0.01,
        "gamma2": jnp.ones((1, out_ch), jnp.float32),
        "beta2": jnp.zeros((1, out_ch), jnp.float32),
    }

    fwd_f32 = jax.jit(functools.partial(up_block_forward, out_ch=out_ch,
                                        v_tile=512, compute_dtype=jnp.float32))
    fwd_bf16 = jax.jit(functools.partial(up_block_forward, out_ch=out_ch,
                                         v_tile=512, compute_dtype=jnp.bfloat16))

    # f32 path.
    out = jax.block_until_ready(
        fwd_f32(params, x1, x2, neigh_orders, up_top_idx, up_down_idx))
    ref = up_block_reference(params, x1, x2, neigh_orders, up_top_idx,
                             up_down_idx, out_ch)
    assert out.shape == (new_nodes, out_ch)
    assert jnp.allclose(out, ref, rtol=1e-3, atol=1e-3), \
        "f32 Pallas output mismatch vs reference"

    # bf16 operands + bf16 intermediates (recommended on v5e/v6e/v7x: halves
    # HBM traffic, full-rate MXU); BN statistics and the epilogue stay f32.
    out_bf16 = jax.block_until_ready(
        fwd_bf16(params, x1, x2, neigh_orders, up_top_idx, up_down_idx))
    ref_bf16 = up_block_reference(params, x1, x2, neigh_orders, up_top_idx,
                                  up_down_idx, out_ch, compute_dtype=jnp.bfloat16)
    assert out_bf16.shape == (new_nodes, out_ch)
    assert jnp.allclose(out_bf16, ref_bf16, rtol=3e-2, atol=3e-2), \
        "bf16 Pallas output mismatch vs bf16 reference"

    print("KERNEL_OK")
</pallas_src>

<mosaic_0001>
module attributes {stable_mosaic.version = 11 : i64} {
  func.func @_linear_kernel(%arg0: i32, %arg1: memref<168x64xf32, #tpu.memory_space<vmem>>, %arg2: memref<64x256xf32, #tpu.memory_space<vmem>>, %arg3: memref<1x256xf32, #tpu.memory_space<vmem>>, %arg4: memref<168x256xf32, #tpu.memory_space<vmem>>) attributes {dimension_semantics = [#tpu.dimension_semantics<parallel>], iteration_bounds = array<i64: 1>, scalar_prefetch = 0 : i64, scratch_operands = 0 : i64, tpu.core_type = #tpu.core_type<tc>, window_params = [{transform_indices = @transform_0, window_bounds = array<i64: 168, 64>}, {pipeline_mode = #tpu.pipeline_mode<synchronous>, transform_indices = @transform_1, window_bounds = array<i64: 64, 256>}, {pipeline_mode = #tpu.pipeline_mode<synchronous>, transform_indices = @transform_2, window_bounds = array<i64: 1, 256>}, {transform_indices = @transform_3, window_bounds = array<i64: 168, 256>}]} {
    %c0 = arith.constant 0 : index
    %c0_0 = arith.constant 0 : index
    %0 = vector.load %arg1[%c0, %c0_0] : memref<168x64xf32, #tpu.memory_space<vmem>>, vector<168x64xf32>
    %c0_1 = arith.constant 0 : index
    %c0_2 = arith.constant 0 : index
    %1 = vector.load %arg2[%c0_1, %c0_2] : memref<64x256xf32, #tpu.memory_space<vmem>>, vector<64x256xf32>
    %cst = arith.constant dense<0.000000e+00> : vector<168x256xf32>
    %2 = tpu.matmul %0, %1, %cst {dimension_numbers = #tpu.dot_dimension_numbers<[1], [0], [0], [1], [0, 0, 1, 1], [], []>} : vector<168x64xf32>, vector<64x256xf32>, vector<168x256xf32> -> vector<168x256xf32>
    %c0_3 = arith.constant 0 : index
    %c0_4 = arith.constant 0 : index
    %3 = vector.load %arg3[%c0_3, %c0_4] : memref<1x256xf32, #tpu.memory_space<vmem>>, vector<1x256xf32>
    %4 = vector.broadcast %3 : vector<1x256xf32> to vector<168x256xf32>
    %5 = arith.addf %2, %4 : vector<168x256xf32>
    %c0_5 = arith.constant 0 : index
    %c0_6 = arith.constant 0 : index
    %6 = vector.load %arg4[%c0_5, %c0_6] : memref<168x256xf32, #tpu.memory_space<vmem>>, vector<168x256xf32>
    tpu.vector_store %arg4[%c0_5, %c0_6], %5 {strides = array<i32>} : memref<168x256xf32, #tpu.memory_space<vmem>>, vector<168x256xf32>,
    return
  }
  func.func @transform_0(%arg0: i32) -> (i32, i32) {
    %c0_i32 = arith.constant 0 : i32
    %c0_i32_0 = arith.constant 0 : i32
    return %arg0, %c0_i32 : i32, i32
  }
  func.func @transform_1(%arg0: i32) -> (i32, i32) {
    %c0_i32 = arith.constant 0 : i32
    %c0_i32_0 = arith.constant 0 : i32
    %c0_i32_1 = arith.constant 0 : i32
    return %c0_i32, %c0_i32_0 : i32, i32
  }
  func.func @transform_2(%arg0: i32) -> (i32, i32) {
    %c0_i32 = arith.constant 0 : i32
    %c0_i32_0 = arith.constant 0 : i32
    %c0_i32_1 = arith.constant 0 : i32
    return %c0_i32, %c0_i32_0 : i32, i32
  }
  func.func @transform_3(%arg0: i32) -> (i32, i32) {
    %c0_i32 = arith.constant 0 : i32
    %c0_i32_0 = arith.constant 0 : i32
    return %arg0, %c0_i32 : i32, i32
  }
}

module attributes {stable_mosaic.version = 11 : i64} {
  func.func @_matmul_stats_kernel(%arg0: i32, %arg1: memref<328x448xf32, #tpu.memory_space<vmem>>, %arg2: memref<448x128xf32, #tpu.memory_space<vmem>>, %arg3: memref<328x128xf32, #tpu.memory_space<vmem>>, %arg4: memref<8x128xf32, #tpu.memory_space<vmem>>, %arg5: memref<8x128xf32, #tpu.memory_space<vmem>>) attributes {dimension_semantics = [#tpu.dimension_semantics<parallel>], iteration_bounds = array<i64: 2>, scalar_prefetch = 0 : i64, scratch_operands = 0 : i64, tpu.core_type = #tpu.core_type<tc>, window_params = [{transform_indices = @transform_0, window_bounds = array<i64: 328, 448>}, {pipeline_mode = #tpu.pipeline_mode<synchronous>, transform_indices = @transform_1, window_bounds = array<i64: 448, 128>}, {transform_indices = @transform_2, window_bounds = array<i64: 328, 128>}, {transform_indices = @transform_3, window_bounds = array<i64: 8, 128>}, {transform_indices = @transform_4, window_bounds = array<i64: 8, 128>}]} {
    %c0 = arith.constant 0 : index
    %c0_0 = arith.constant 0 : index
    %0 = vector.load %arg1[%c0, %c0_0] : memref<328x448xf32, #tpu.memory_space<vmem>>, vector<328x448xf32>
    %c0_1 = arith.constant 0 : index
    %c0_2 = arith.constant 0 : index
    %1 = vector.load %arg2[%c0_1, %c0_2] : memref<448x128xf32, #tpu.memory_space<vmem>>, vector<448x128xf32>
    %cst = arith.constant dense<0.000000e+00> : vector<328x128xf32>
    %2 = tpu.matmul %0, %1, %cst {dimension_numbers = #tpu.dot_dimension_numbers<[1], [0], [0], [1], [0, 0, 1, 1], [], []>} : vector<328x448xf32>, vector<448x128xf32>, vector<328x128xf32> -> vector<328x128xf32>
    %c0_3 = arith.constant 0 : index
    %c0_4 = arith.constant 0 : index
    %3 = vector.load %arg3[%c0_3, %c0_4] : memref<328x128xf32, #tpu.memory_space<vmem>>, vector<328x128xf32>
    tpu.vector_store %arg3[%c0_3, %c0_4], %2 {strides = array<i32>} : memref<328x128xf32, #tpu.memory_space<vmem>>, vector<328x128xf32>,
    %cst_5 = arith.constant dense<0.000000e+00> : vector<128xf32>
    %4 = vector.multi_reduction <add>, %2, %cst_5 [0] : vector<328x128xf32> to vector<128xf32>
    %5 = vector.shape_cast %4 : vector<128xf32> to vector<1x128xf32>
    %6 = arith.mulf %2, %2 : vector<328x128xf32>
    %cst_6 = arith.constant dense<0.000000e+00> : vector<128xf32>
    %7 = vector.multi_reduction <add>, %6, %cst_6 [0] : vector<328x128xf32> to vector<128xf32>
    %8 = vector.shape_cast %7 : vector<128xf32> to vector<1x128xf32>
    %9 = tpu.iota {dimensions = array<i32: 0>} : vector<8x128xi32>
    %c0_i32 = arith.constant 0 : i32
    %10 = vector.broadcast %c0_i32 : i32 to vector<8x128xi32>
    %11 = arith.cmpi eq, %9, %10 : vector<8x128xi32>
    %cst_7 = arith.constant 0.000000e+00 : f32
    %12 = vector.shape_cast %5 : vector<1x128xf32> to vector<1x128xf32>
    %13 = vector.broadcast %12 : vector<1x128xf32> to vector<8x128xf32>
    %14 = vector.broadcast %cst_7 : f32 to vector<8x128xf32>
    %15 = arith.select %11, %13, %14 : vector<8x128xi1>, vector<8x128xf32>
    %c0_8 = arith.constant 0 : index
    %c0_9 = arith.constant 0 : index
    %16 = vector.load %arg4[%c0_8, %c0_9] : memref<8x128xf32, #tpu.memory_space<vmem>>, vector<8x128xf32>
    tpu.vector_store %arg4[%c0_8, %c0_9], %15 {strides = array<i32>} : memref<8x128xf32, #tpu.memory_space<vmem>>, vector<8x128xf32>,
    %c0_i32_10 = arith.constant 0 : i32
    %17 = vector.broadcast %c0_i32_10 : i32 to vector<8x128xi32>
    %18 = arith.cmpi eq, %9, %17 : vector<8x128xi32>
    %cst_11 = arith.constant 0.000000e+00 : f32
    %19 = vector.shape_cast %8 : vector<1x128xf32> to vector<1x128xf32>
    %20 = vector.broadcast %19 : vector<1x128xf32> to vector<8x128xf32>
    %21 = vector.broadcast %cst_11 : f32 to vector<8x128xf32>
    %22 = arith.select %18, %20, %21 : vector<8x128xi1>, vector<8x128xf32>
    %c0_12 = arith.constant 0 : index
    %c0_13 = arith.constant 0 : index
    %23 = vector.load %arg5[%c0_12, %c0_13] : memref<8x128xf32, #tpu.memory_space<vmem>>, vector<8x128xf32>
    tpu.vector_store %arg5[%c0_12, %c0_13], %22 {strides = array<i32>} : memref<8x128xf32, #tpu.memory_space<vmem>>, vector<8x128xf32>,
    return
  }
  func.func @transform_0(%arg0: i32) -> (i32, i32) {
    %c0_i32 = arith.constant 0 : i32
    %c0_i32_0 = arith.constant 0 : i32
    return %arg0, %c0_i32 : i32, i32
  }
  func.func @transform_1(%arg0: i32) -> (i32, i32) {
    %c0_i32 = arith.constant 0 : i32
    %c0_i32_0 = arith.constant 0 : i32
    %c0_i32_1 = arith.constant 0 : i32
    return %c0_i32, %c0_i32_0 : i32, i32
  }
  func.func @transform_2(%arg0: i32) -> (i32, i32) {
    %c0_i32 = arith.constant 0 : i32
    %c0_i32_0 = arith.constant 0 : i32
    return %arg0, %c0_i32 : i32, i32
  }
  func.func @transform_3(%arg0: i32) -> (i32, i32) {
    %c0_i32 = arith.constant 0 : i32
    %c0_i32_0 = arith.constant 0 : i32
    return %arg0, %c0_i32 : i32, i32
  }
  func.func @transform_4(%arg0: i32) -> (i32, i32) {
    %c0_i32 = arith.constant 0 : i32
    %c0_i32_0 = arith.constant 0 : i32
    return %arg0, %c0_i32 : i32, i32
  }
}

module attributes {stable_mosaic.version = 11 : i64} {
  func.func @_affine_lrelu_kernel(%arg0: i32, %arg1: memref<328x128xf32, #tpu.memory_space<vmem>>, %arg2: memref<1x128xf32, #tpu.memory_space<vmem>>, %arg3: memref<1x128xf32, #tpu.memory_space<vmem>>, %arg4: memref<328x128xf32, #tpu.memory_space<vmem>>) attributes {dimension_semantics = [#tpu.dimension_semantics<parallel>], iteration_bounds = array<i64: 2>, scalar_prefetch = 0 : i64, scratch_operands = 0 : i64, tpu.core_type = #tpu.core_type<tc>, window_params = [{transform_indices = @transform_0, window_bounds = array<i64: 328, 128>}, {pipeline_mode = #tpu.pipeline_mode<synchronous>, transform_indices = @transform_1, window_bounds = array<i64: 1, 128>}, {pipeline_mode = #tpu.pipeline_mode<synchronous>, transform_indices = @transform_2, window_bounds = array<i64: 1, 128>}, {transform_indices = @transform_3, window_bounds = array<i64: 328, 128>}]} {
    %c0 = arith.constant 0 : index
    %c0_0 = arith.constant 0 : index
    %0 = vector.load %arg1[%c0, %c0_0] : memref<328x128xf32, #tpu.memory_space<vmem>>, vector<328x128xf32>
    %c0_1 = arith.constant 0 : index
    %c0_2 = arith.constant 0 : index
    %1 = vector.load %arg2[%c0_1, %c0_2] : memref<1x128xf32, #tpu.memory_space<vmem>>, vector<1x128xf32>
    %2 = vector.broadcast %1 : vector<1x128xf32> to vector<328x128xf32>
    %3 = arith.mulf %0, %2 : vector<328x128xf32>
    %c0_3 = arith.constant 0 : index
    %c0_4 = arith.constant 0 : index
    %4 = vector.load %arg3[%c0_3, %c0_4] : memref<1x128xf32, #tpu.memory_space<vmem>>, vector<1x128xf32>
    %5 = vector.broadcast %4 : vector<1x128xf32> to vector<328x128xf32>
    %6 = arith.addf %3, %5 : vector<328x128xf32>
    %cst = arith.constant 0.000000e+00 : f32
    %7 = vector.broadcast %cst : f32 to vector<328x128xf32>
    %8 = arith.cmpf oge, %6, %7 : vector<328x128xf32>
    %cst_5 = arith.constant 2.000000e-01 : f32
    %9 = vector.broadcast %cst_5 : f32 to vector<328x128xf32>
    %10 = arith.mulf %9, %6 : vector<328x128xf32>
    %11 = arith.select %8, %6, %10 : vector<328x128xi1>, vector<328x128xf32>
    %c0_6 = arith.constant 0 : index
    %c0_7 = arith.constant 0 : index
    %12 = vector.load %arg4[%c0_6, %c0_7] : memref<328x128xf32, #tpu.memory_space<vmem>>, vector<328x128xf32>
    tpu.vector_store %arg4[%c0_6, %c0_7], %11 {strides = array<i32>} : memref<328x128xf32, #tpu.memory_space<vmem>>, vector<328x128xf32>,
    return
  }
  func.func @transform_0(%arg0: i32) -> (i32, i32) {
    %c0_i32 = arith.constant 0 : i32
    %c0_i32_0 = arith.constant 0 : i32
    return %arg0, %c0_i32 : i32, i32
  }
  func.func @transform_1(%arg0: i32) -> (i32, i32) {
    %c0_i32 = arith.constant 0 : i32
    %c0_i32_0 = arith.constant 0 : i32
    %c0_i32_1 = arith.constant 0 : i32
    return %c0_i32, %c0_i32_0 : i32, i32
  }
  func.func @transform_2(%arg0: i32) -> (i32, i32) {
    %c0_i32 = arith.constant 0 : i32
    %c0_i32_0 = arith.constant 0 : i32
    %c0_i32_1 = arith.constant 0 : i32
    return %c0_i32, %c0_i32_0 : i32, i32
  }
  func.func @transform_3(%arg0: i32) -> (i32, i32) {
    %c0_i32 = arith.constant 0 : i32
    %c0_i32_0 = arith.constant 0 : i32
    return %arg0, %c0_i32 : i32, i32
  }
}

module attributes {stable_mosaic.version = 11 : i64} {
  func.func @_matmul_stats_kernel(%arg0: i32, %arg1: memref<328x224xf32, #tpu.memory_space<vmem>>, %arg2: memref<224x128xf32, #tpu.memory_space<vmem>>, %arg3: memref<328x128xf32, #tpu.memory_space<vmem>>, %arg4: memref<8x128xf32, #tpu.memory_space<vmem>>, %arg5: memref<8x128xf32, #tpu.memory_space<vmem>>) attributes {dimension_semantics = [#tpu.dimension_semantics<parallel>], iteration_bounds = array<i64: 2>, scalar_prefetch = 0 : i64, scratch_operands = 0 : i64, tpu.core_type = #tpu.core_type<tc>, window_params = [{transform_indices = @transform_0, window_bounds = array<i64: 328, 224>}, {pipeline_mode = #tpu.pipeline_mode<synchronous>, transform_indices = @transform_1, window_bounds = array<i64: 224, 128>}, {transform_indices = @transform_2, window_bounds = array<i64: 328, 128>}, {transform_indices = @transform_3, window_bounds = array<i64: 8, 128>}, {transform_indices = @transform_4, window_bounds = array<i64: 8, 128>}]} {
    %c0 = arith.constant 0 : index
    %c0_0 = arith.constant 0 : index
    %0 = vector.load %arg1[%c0, %c0_0] : memref<328x224xf32, #tpu.memory_space<vmem>>, vector<328x224xf32>
    %c0_1 = arith.constant 0 : index
    %c0_2 = arith.constant 0 : index
    %1 = vector.load %arg2[%c0_1, %c0_2] : memref<224x128xf32, #tpu.memory_space<vmem>>, vector<224x128xf32>
    %cst = arith.constant dense<0.000000e+00> : vector<328x128xf32>
    %2 = tpu.matmul %0, %1, %cst {dimension_numbers = #tpu.dot_dimension_numbers<[1], [0], [0], [1], [0, 0, 1, 1], [], []>} : vector<328x224xf32>, vector<224x128xf32>, vector<328x128xf32> -> vector<328x128xf32>
    %c0_3 = arith.constant 0 : index
    %c0_4 = arith.constant 0 : index
    %3 = vector.load %arg3[%c0_3, %c0_4] : memref<328x128xf32, #tpu.memory_space<vmem>>, vector<328x128xf32>
    tpu.vector_store %arg3[%c0_3, %c0_4], %2 {strides = array<i32>} : memref<328x128xf32, #tpu.memory_space<vmem>>, vector<328x128xf32>,
    %cst_5 = arith.constant dense<0.000000e+00> : vector<128xf32>
    %4 = vector.multi_reduction <add>, %2, %cst_5 [0] : vector<328x128xf32> to vector<128xf32>
    %5 = vector.shape_cast %4 : vector<128xf32> to vector<1x128xf32>
    %6 = arith.mulf %2, %2 : vector<328x128xf32>
    %cst_6 = arith.constant dense<0.000000e+00> : vector<128xf32>
    %7 = vector.multi_reduction <add>, %6, %cst_6 [0] : vector<328x128xf32> to vector<128xf32>
    %8 = vector.shape_cast %7 : vector<128xf32> to vector<1x128xf32>
    %9 = tpu.iota {dimensions = array<i32: 0>} : vector<8x128xi32>
    %c0_i32 = arith.constant 0 : i32
    %10 = vector.broadcast %c0_i32 : i32 to vector<8x128xi32>
    %11 = arith.cmpi eq, %9, %10 : vector<8x128xi32>
    %cst_7 = arith.constant 0.000000e+00 : f32
    %12 = vector.shape_cast %5 : vector<1x128xf32> to vector<1x128xf32>
    %13 = vector.broadcast %12 : vector<1x128xf32> to vector<8x128xf32>
    %14 = vector.broadcast %cst_7 : f32 to vector<8x128xf32>
    %15 = arith.select %11, %13, %14 : vector<8x128xi1>, vector<8x128xf32>
    %c0_8 = arith.constant 0 : index
    %c0_9 = arith.constant 0 : index
    %16 = vector.load %arg4[%c0_8, %c0_9] : memref<8x128xf32, #tpu.memory_space<vmem>>, vector<8x128xf32>
    tpu.vector_store %arg4[%c0_8, %c0_9], %15 {strides = array<i32>} : memref<8x128xf32, #tpu.memory_space<vmem>>, vector<8x128xf32>,
    %c0_i32_10 = arith.constant 0 : i32
    %17 = vector.broadcast %c0_i32_10 : i32 to vector<8x128xi32>
    %18 = arith.cmpi eq, %9, %17 : vector<8x128xi32>
    %cst_11 = arith.constant 0.000000e+00 : f32
    %19 = vector.shape_cast %8 : vector<1x128xf32> to vector<1x128xf32>
    %20 = vector.broadcast %19 : vector<1x128xf32> to vector<8x128xf32>
    %21 = vector.broadcast %cst_11 : f32 to vector<8x128xf32>
    %22 = arith.select %18, %20, %21 : vector<8x128xi1>, vector<8x128xf32>
    %c0_12 = arith.constant 0 : index
    %c0_13 = arith.constant 0 : index
    %23 = vector.load %arg5[%c0_12, %c0_13] : memref<8x128xf32, #tpu.memory_space<vmem>>, vector<8x128xf32>
    tpu.vector_store %arg5[%c0_12, %c0_13], %22 {strides = array<i32>} : memref<8x128xf32, #tpu.memory_space<vmem>>, vector<8x128xf32>,
    return
  }
  func.func @transform_0(%arg0: i32) -> (i32, i32) {
    %c0_i32 = arith.constant 0 : i32
    %c0_i32_0 = arith.constant 0 : i32
    return %arg0, %c0_i32 : i32, i32
  }
  func.func @transform_1(%arg0: i32) -> (i32, i32) {
    %c0_i32 = arith.constant 0 : i32
    %c0_i32_0 = arith.constant 0 : i32
    %c0_i32_1 = arith.constant 0 : i32
    return %c0_i32, %c0_i32_0 : i32, i32
  }
  func.func @transform_2(%arg0: i32) -> (i32, i32) {
    %c0_i32 = arith.constant 0 : i32
    %c0_i32_0 = arith.constant 0 : i32
    return %arg0, %c0_i32 : i32, i32
  }
  func.func @transform_3(%arg0: i32) -> (i32, i32) {
    %c0_i32 = arith.constant 0 : i32
    %c0_i32_0 = arith.constant 0 : i32
    return %arg0, %c0_i32 : i32, i32
  }
  func.func @transform_4(%arg0: i32) -> (i32, i32) {
    %c0_i32 = arith.constant 0 : i32
    %c0_i32_0 = arith.constant 0 : i32
    return %arg0, %c0_i32 : i32, i32
  }
}

</mosaic_0001>

<bundles_post_ra>
// kernel: up_block_forward.5
= control target key start
LH: loop header
LB: loop body
LE: loop exit
PB: predicated region body
PF: predicated region fallthrough
CT: control target
= control target key end

     0   :  { %vm57_vm0 = vcmask 523264   ;;  %s737_s1 = inlined_call_operand.vmem [shape: f32[64,256], index: 1, kind: input, shape index: {}]   ;;  %s738_s0 = inlined_call_operand.vmem [shape: f32[168,64], index: 0, kind: input, shape index: {}]   ;;  %s739_s2 = inlined_call_operand.vmem [shape: f32[1,256], index: 2, kind: input, shape index: {}]   ;;  %s740_s3 = inlined_call_operand.vmem [shape: f32[168,256], index: 3, kind: output, shape index: {}]  }
   0x1   :  { %v49_v0 = vld [vmem:[%s737_s1 + $0x70] sm:$0xff]  ;;  %v47_v1 = vld [vmem:[%s737_s1 + $0x60] sm:$0xff]  ;;  %v50_v2 = vld [vmem:[%s737_s1 + $0x78] sm:$0xff] }
   0x2   :  { %369 = vmatpush.msra.mxu2 %v49_v0  ;;  %129 = vmatpush.msra.mxu0 %v49_v0  ;;  %v45_v3 = vld [vmem:[%s737_s1 + $0x50] sm:$0xff]  ;;  %v48_v4 = vld [vmem:[%s737_s1 + $0x68] sm:$0xff]  ;;  %v46_v5 = vld [vmem:[%s737_s1 + $0x58] sm:$0xff] }
   0x3   :  { %209 = vmatpush.msra.mxu1 %v50_v2  ;;  %377 = vmatpush.msra.mxu3 %v50_v2  ;;  %v43_v6 = vld [vmem:[%s737_s1 + $0x40] sm:$0xff]  ;;  %v44_v7 = vld [vmem:[%s737_s1 + $0x48] sm:$0xff]  ;;  %v41_v8 = vld [vmem:[%s737_s1 + $0x30] sm:$0xff] }
   0x4   :  { %370 = vmatpush.msra.mxu2 %v47_v1  ;;  %130 = vmatpush.msra.mxu0 %v47_v1  ;;  %v42_v9 = vld [vmem:[%s737_s1 + $0x38] sm:$0xff]  ;;  %v39_v10 = vld [vmem:[%s737_s1 + $0x20] sm:$0xff]  ;;  %v40_v11 = vld [vmem:[%s737_s1 + $0x28] sm:$0xff] }
   0x5   :  { %210 = vmatpush.msra.mxu1 %v48_v4  ;;  %378 = vmatpush.msra.mxu3 %v48_v4  ;;  %v37_v12 = vld [vmem:[%s737_s1 + $0x10] sm:$0xff]  ;;  %v38_v13 = vld [vmem:[%s737_s1 + $0x18] sm:$0xff]  ;;  %v35_v14 = vld [vmem:[%s737_s1] sm:$0xff] }
   0x6   :  { %371 = vmatpush.msra.mxu2 %v45_v3  ;;  %131 = vmatpush.msra.mxu0 %v45_v3  ;;  %v453_v15 = vld [vmem:[%s738_s0 + $0x50] sm:$0xff]  ;;  %v36_v16 = vld [vmem:[%s737_s1 + $0x8] sm:$0xff]  ;;  %v14_v17 = vld [vmem:[%s738_s0] sm:$0xff] }
   0x7   :  { %211 = vmatpush.msra.mxu1 %v46_v5  ;;  %379 = vmatpush.msra.mxu3 %v46_v5  ;;  %v25_v18 = vld [vmem:[%s738_s0 + $0x58] sm:$0xff]  ;;  %v15_v19 = vld [vmem:[%s738_s0 + $0x8] sm:$0xff]  ;;  %v26_v20 = vld [vmem:[%s738_s0 + $0x60] sm:$0xff] }
   0x8   :  { %372 = vmatpush.msra.mxu2 %v43_v6  ;;  %132 = vmatpush.msra.mxu0 %v43_v6  ;;  %v16_v21 = vld [vmem:[%s738_s0 + $0x10] sm:$0xff]  ;;  %v27_v22 = vld [vmem:[%s738_s0 + $0x68] sm:$0xff]  ;;  %v17_v23 = vld [vmem:[%s738_s0 + $0x18] sm:$0xff] }
   0x9   :  { %212 = vmatpush.msra.mxu1 %v44_v7  ;;  %380 = vmatpush.msra.mxu3 %v44_v7  ;;  %v28_v24 = vld [vmem:[%s738_s0 + $0x70] sm:$0xff]  ;;  %v18_v25 = vld [vmem:[%s738_s0 + $0x20] sm:$0xff]  ;;  %v29_v26 = vld [vmem:[%s738_s0 + $0x78] sm:$0xff] }
   0xa   :  { %373 = vmatpush.msra.mxu2 %v41_v8  ;;  %133 = vmatpush.msra.mxu0 %v41_v8  ;;  %v19_v27 = vld [vmem:[%s738_s0 + $0x28] sm:$0xff]  ;;  %v30_v28 = vld [vmem:[%s738_s0 + $0x80] sm:$0xff]  ;;  %v20_v29 = vld [vmem:[%s738_s0 + $0x30] sm:$0xff] }
   0xb   :  { %213 = vmatpush.msra.mxu1 %v42_v9  ;;  %381 = vmatpush.msra.mxu3 %v42_v9  ;;  %v31_v30 = vld [vmem:[%s738_s0 + $0x88] sm:$0xff]  ;;  %v21_v31 = vld [vmem:[%s738_s0 + $0x38] sm:$0xff]  ;;  %v32_v32 = vld [vmem:[%s738_s0 + $0x90] sm:$0xff] }
   0xc   :  { %374 = vmatpush.msra.mxu2 %v39_v10  ;;  %134 = vmatpush.msra.mxu0 %v39_v10  ;;  %v22_v33 = vld [vmem:[%s738_s0 + $0x40] sm:$0xff]  ;;  %v33_v34 = vld [vmem:[%s738_s0 + $0x98] sm:$0xff]  ;;  %v23_v35 = vld [vmem:[%s738_s0 + $0x48] sm:$0xff] }
   0xd   :  { %214 = vmatpush.msra.mxu1 %v40_v11  ;;  %382 = vmatpush.msra.mxu3 %v40_v11  ;;  %v34_v36 = vld [vmem:[%s738_s0 + $0xa0] sm:$0xff] }
   0xe   :  { %375 = vmatpush.msra.mxu2 %v37_v12  ;;  %135 = vmatpush.msra.mxu0 %v37_v12  ;;  %v51_v37 = vld [vmem:[%s739_s2] sm:$0x3] }
   0xf   :  { %215 = vmatpush.msra.mxu1 %v38_v13  ;;  %383 = vmatpush.msra.mxu3 %v38_v13  ;;  %v565_v38 = vperm.slane %v51_v37, 1  ;;  %v567_v39 = vperm.slane %v51_v37, 0 }
  0x10   :  { %376 = vmatpush.msra.mxu2 %v35_v14  ;;  %136 = vmatpush.msra.mxu0 %v35_v14 }
  0x11   :  { %337 = vmatmul.msk.f32.vlgmr.msra.gmra.mxu2 %vm57_vm0, %v453_v15  ;;  %216 = vmatpush.msra.mxu1 %v36_v16 }
  0x12   :  { %348 = vmatmul.msk.f32.vlgmr.msra.gmra.mxu1 %vm57_vm0, %v14_v17  ;;  %384 = vmatpush.msra.mxu3 %v36_v16 }
  0x13   :  { %359 = vmatmul.msk.f32.vlgmr.msra.gmra.mxu3 %vm57_vm0, %v25_v18  ;;  %327 = vmatmul.msk.f32.vlgmr.msra.gmra.mxu0 %vm57_vm0, %v14_v17 }
  0x19   :  { %338 = vmatmul.msk.f32.gmra.mxu2 %vm57_vm0, %v25_v18 }
  0x1a   :  { %349 = vmatmul.msk.f32.gmra.mxu1 %vm57_vm0, %v15_v19 }
  0x1b   :  { %360 = vmatmul.msk.f32.gmra.mxu3 %vm57_vm0, %v26_v20  ;;  %328 = vmatmul.msk.f32.gmra.mxu0 %vm57_vm0, %v15_v19 }
  0x21   :  { %339 = vmatmul.msk.f32.gmra.mxu2 %vm57_vm0, %v26_v20 }
  0x22   :  { %350 = vmatmul.msk.f32.gmra.mxu1 %vm57_vm0, %v16_v21 }
  0x23   :  { %361 = vmatmul.msk.f32.gmra.mxu3 %vm57_vm0, %v27_v22  ;;  %329 = vmatmul.msk.f32.gmra.mxu0 %vm57_vm0, %v16_v21 }
  0x29   :  { %340 = vmatmul.msk.f32.gmra.mxu2 %vm57_vm0, %v27_v22 }
  0x2a   :  { %351 = vmatmul.msk.f32.gmra.mxu1 %vm57_vm0, %v17_v23 }
  0x2b   :  { %362 = vmatmul.msk.f32.gmra.mxu3 %vm57_vm0, %v28_v24  ;;  %330 = vmatmul.msk.f32.gmra.mxu0 %vm57_vm0, %v17_v23 }
  0x31   :  { %341 = vmatmul.msk.f32.gmra.mxu2 %vm57_vm0, %v28_v24 }
  0x32   :  { %352 = vmatmul.msk.f32.gmra.mxu1 %vm57_vm0, %v18_v25 }
  0x33   :  { %363 = vmatmul.msk.f32.gmra.mxu3 %vm57_vm0, %v29_v26  ;;  %331 = vmatmul.msk.f32.gmra.mxu0 %vm57_vm0, %v18_v25 }
  0x39   :  { %342 = vmatmul.msk.f32.gmra.mxu2 %vm57_vm0, %v29_v26 }
  0x3a   :  { %353 = vmatmul.msk.f32.gmra.mxu1 %vm57_vm0, %v19_v27 }
  0x3b   :  { %364 = vmatmul.msk.f32.gmra.mxu3 %vm57_vm0, %v30_v28  ;;  %332 = vmatmul.msk.f32.gmra.mxu0 %vm57_vm0, %v19_v27 }
  0x41   :  { %343 = vmatmul.msk.f32.gmra.mxu2 %vm57_vm0, %v30_v28 }
  0x42   :  { %354 = vmatmul.msk.f32.gmra.mxu1 %vm57_vm0, %v20_v29 }
  0x43   :  { %365 = vmatmul.msk.f32.gmra.mxu3 %vm57_vm0, %v31_v30  ;;  %333 = vmatmul.msk.f32.gmra.mxu0 %vm57_vm0, %v20_v29 }
  0x49   :  { %344 = vmatmul.msk.f32.gmra.mxu2 %vm57_vm0, %v31_v30 }
  0x4a   :  { %355 = vmatmul.msk.f32.gmra.mxu1 %vm57_vm0, %v21_v31 }
  0x4b   :  { %366 = vmatmul.msk.f32.gmra.mxu3 %vm57_vm0, %v32_v32  ;;  %334 = vmatmul.msk.f32.gmra.mxu0 %vm57_vm0, %v21_v31 }
  0x51   :  { %345 = vmatmul.msk.f32.gmra.mxu2 %vm57_vm0, %v32_v32 }
  0x52   :  { %356 = vmatmul.msk.f32.gmra.mxu1 %vm57_vm0, %v22_v33 }
  0x53   :  { %367 = vmatmul.msk.f32.gmra.mxu3 %vm57_vm0, %v33_v34  ;;  %335 = vmatmul.msk.f32.gmra.mxu0 %vm57_vm0, %v22_v33 }
  0x59   :  { %346 = vmatmul.msk.f32.gmra.mxu2 %vm57_vm0, %v33_v34 }
  0x5a   :  { %357 = vmatmul.msk.f32.gmra.mxu1 %vm57_vm0, %v23_v35 }
  0x5b   :  { %368 = vmatmul.msk.f32.gmra.mxu3 %vm57_vm0, %v34_v36  ;;  %336 = vmatmul.msk.f32.gmra.mxu0 %vm57_vm0, %v23_v35 }
  0x61   :  { %347 = vmatmul.msk.f32.gmra.mxu2 %vm57_vm0, %v34_v36 }
  0x62   :  { %358 = vmatmul.msk.f32.gmra.mxu1 %vm57_vm0, %v453_v15 }
  0x8f   :  { %v218_v40 = vpop.f32.mrf.mxu1 }
  0x90   :  { %v219_v41 = vadd.f32 %v218_v40, %v565_v38  ;;  %v138_v42 = vpop.f32.mrf.mxu0 }
  0x91   :  { %v139_v43 = vadd.f32 %v138_v42, %v567_v39 }
  0x92   :  { %282 = vst [vmem:[%s740_s3 + $0x8] sm:$0xff] %v219_v41 }
  0x93   :  { %281 = vst [vmem:[%s740_s3] sm:$0xff] %v139_v43 }
  0x94   :  { %v168_v44 = vpop.f32.mrf.mxu2 }
  0x95   :  { %v169_v45 = vadd.f32 %v168_v44, %v567_v39 }
  0x96   :  { %v251_v46 = vpop.f32.mrf.mxu3 }
  0x97   :  { %301 = vst [vmem:[%s740_s3 + $0xa0] sm:$0xff] %v169_v45  ;;  %v221_v47 = vpop.f32.mrf.mxu1  ;;  %v252_v48 = vadd.f32 %v251_v46, %v565_v38 }
  0x98   :  { %v222_v49 = vadd.f32 %v221_v47, %v565_v38  ;;  %v141_v50 = vpop.f32.mrf.mxu0 }
  0x99   :  { %304 = vst [vmem:[%s740_s3 + $0xb8] sm:$0xff] %v252_v48  ;;  %v142_v51 = vadd.f32 %v141_v50, %v567_v39 }
  0x9a   :  { %284 = vst [vmem:[%s740_s3 + $0x18] sm:$0xff] %v222_v49 }
  0x9b   :  { %283 = vst [vmem:[%s740_s3 + $0x10] sm:$0xff] %v142_v51 }
  0x9c   :  { %v171_v52 = vpop.f32.mrf.mxu2 }
  0x9d   :  { %v172_v53 = vadd.f32 %v171_v52, %v567_v39 }
  0x9e   :  { %v254_v54 = vpop.f32.mrf.mxu3 }
  0x9f   :  { %303 = vst [vmem:[%s740_s3 + $0xb0] sm:$0xff] %v172_v53  ;;  %v224_v55 = vpop.f32.mrf.mxu1  ;;  %v255_v56 = vadd.f32 %v254_v54, %v565_v38 }
  0xa0   :  { %v225_v57 = vadd.f32 %v224_v55, %v565_v38  ;;  %v144_v58 = vpop.f32.mrf.mxu0 }
  0xa1   :  { %306 = vst [vmem:[%s740_s3 + $0xc8] sm:$0xff] %v255_v56  ;;  %v145_v59 = vadd.f32 %v144_v58, %v567_v39 }
  0xa2   :  { %286 = vst [vmem:[%s740_s3 + $0x28] sm:$0xff] %v225_v57 }
  0xa3   :  { %285 = vst [vmem:[%s740_s3 + $0x20] sm:$0xff] %v145_v59 }
  0xa4   :  { %v174_v60 = vpop.f32.mrf.mxu2 }
  0xa5   :  { %v175_v61 = vadd.f32 %v174_v60, %v567_v39 }
  0xa6   :  { %v257_v62 = vpop.f32.mrf.mxu3 }
  0xa7   :  { %305 = vst [vmem:[%s740_s3 + $0xc0] sm:$0xff] %v175_v61  ;;  %v227_v63 = vpop.f32.mrf.mxu1  ;;  %v258_v0 = vadd.f32 %v257_v62, %v565_v38 }
  0xa8   :  { %v228_v1 = vadd.f32 %v227_v63, %v565_v38  ;;  %v147_v2 = vpop.f32.mrf.mxu0 }
  0xa9   :  { %308 = vst [vmem:[%s740_s3 + $0xd8] sm:$0xff] %v258_v0  ;;  %v148_v3 = vadd.f32 %v147_v2, %v567_v39 }
  0xaa   :  { %288 = vst [vmem:[%s740_s3 + $0x38] sm:$0xff] %v228_v1 }
  0xab   :  { %287 = vst [vmem:[%s740_s3 + $0x30] sm:$0xff] %v148_v3 }
  0xac   :  { %v177_v4 = vpop.f32.mrf.mxu2 }
  0xad   :  { %v178_v5 = vadd.f32 %v177_v4, %v567_v39 }
  0xae   :  { %v260_v6 = vpop.f32.mrf.mxu3 }
  0xaf   :  { %307 = vst [vmem:[%s740_s3 + $0xd0] sm:$0xff] %v178_v5  ;;  %v230_v7 = vpop.f32.mrf.mxu1  ;;  %v261_v8 = vadd.f32 %v260_v6, %v565_v38 }
  0xb0   :  { %v231_v9 = vadd.f32 %v230_v7, %v565_v38  ;;  %v150_v10 = vpop.f32.mrf.mxu0 }
  0xb1   :  { %310 = vst [vmem:[%s740_s3 + $0xe8] sm:$0xff] %v261_v8  ;;  %v151_v11 = vadd.f32 %v150_v10, %v567_v39 }
  0xb2   :  { %290 = vst [vmem:[%s740_s3 + $0x48] sm:$0xff] %v231_v9 }
  0xb3   :  { %289 = vst [vmem:[%s740_s3 + $0x40] sm:$0xff] %v151_v11 }
  0xb4   :  { %v180_v12 = vpop.f32.mrf.mxu2 }
  0xb5   :  { %v181_v13 = vadd.f32 %v180_v12, %v567_v39 }
  0xb6   :  { %v263_v14 = vpop.f32.mrf.mxu3 }
  0xb7   :  { %309 = vst [vmem:[%s740_s3 + $0xe0] sm:$0xff] %v181_v13  ;;  %v233_v15 = vpop.f32.mrf.mxu1  ;;  %v264_v16 = vadd.f32 %v263_v14, %v565_v38 }
  0xb8   :  { %v234_v17 = vadd.f32 %v233_v15, %v565_v38  ;;  %v153_v18 = vpop.f32.mrf.mxu0 }
  0xb9   :  { %312 = vst [vmem:[%s740_s3 + $0xf8] sm:$0xff] %v264_v16  ;;  %v154_v19 = vadd.f32 %v153_v18, %v567_v39 }
  0xba   :  { %292 = vst [vmem:[%s740_s3 + $0x58] sm:$0xff] %v234_v17 }
  0xbb   :  { %291 = vst [vmem:[%s740_s3 + $0x50] sm:$0xff] %v154_v19 }
  0xbc   :  { %v183_v20 = vpop.f32.mrf.mxu2 }
  0xbd   :  { %v184_v21 = vadd.f32 %v183_v20, %v567_v39 }
  0xbe   :  { %v266_v22 = vpop.f32.mrf.mxu3 }
  0xbf   :  { %311 = vst [vmem:[%s740_s3 + $0xf0] sm:$0xff] %v184_v21  ;;  %v236_v23 = vpop.f32.mrf.mxu1  ;;  %v267_v24 = vadd.f32 %v266_v22, %v565_v38 }
  0xc0   :  { %v237_v25 = vadd.f32 %v236_v23, %v565_v38  ;;  %v156_v26 = vpop.f32.mrf.mxu0 }
  0xc1   :  { %314 = vst [vmem:[%s740_s3 + $0x108] sm:$0xff] %v267_v24  ;;  %v157_v27 = vadd.f32 %v156_v26, %v567_v39 }
  0xc2   :  { %294 = vst [vmem:[%s740_s3 + $0x68] sm:$0xff] %v237_v25 }
  0xc3   :  { %293 = vst [vmem:[%s740_s3 + $0x60] sm:$0xff] %v157_v27 }
  0xc4   :  { %v186_v28 = vpop.f32.mrf.mxu2 }
  0xc5   :  { %v187_v29 = vadd.f32 %v186_v28, %v567_v39 }
  0xc6   :  { %v269_v30 = vpop.f32.mrf.mxu3 }
  0xc7   :  { %313 = vst [vmem:[%s740_s3 + $0x100] sm:$0xff] %v187_v29  ;;  %v239_v31 = vpop.f32.mrf.mxu1  ;;  %v270_v32 = vadd.f32 %v269_v30, %v565_v38 }
  0xc8   :  { %v240_v33 = vadd.f32 %v239_v31, %v565_v38  ;;  %v159_v34 = vpop.f32.mrf.mxu0 }
  0xc9   :  { %316 = vst [vmem:[%s740_s3 + $0x118] sm:$0xff] %v270_v32  ;;  %v160_v35 = vadd.f32 %v159_v34, %v567_v39 }
  0xca   :  { %296 = vst [vmem:[%s740_s3 + $0x78] sm:$0xff] %v240_v33 }
  0xcb   :  { %295 = vst [vmem:[%s740_s3 + $0x70] sm:$0xff] %v160_v35 }
  0xcc   :  { %v189_v36 = vpop.f32.mrf.mxu2 }
  0xcd   :  { %v190_v37 = vadd.f32 %v189_v36, %v567_v39 }
  0xce   :  { %v272_v40 = vpop.f32.mrf.mxu3 }
  0xcf   :  { %315 = vst [vmem:[%s740_s3 + $0x110] sm:$0xff] %v190_v37  ;;  %v242_v41 = vpop.f32.mrf.mxu1  ;;  %v273_v42 = vadd.f32 %v272_v40, %v565_v38 }
  0xd0   :  { %v243_v43 = vadd.f32 %v242_v41, %v565_v38  ;;  %v162_v44 = vpop.f32.mrf.mxu0 }
  0xd1   :  { %318 = vst [vmem:[%s740_s3 + $0x128] sm:$0xff] %v273_v42  ;;  %v163_v45 = vadd.f32 %v162_v44, %v567_v39 }
  0xd2   :  { %298 = vst [vmem:[%s740_s3 + $0x88] sm:$0xff] %v243_v43 }
  0xd3   :  { %297 = vst [vmem:[%s740_s3 + $0x80] sm:$0xff] %v163_v45 }
  0xd4   :  { %v192_v46 = vpop.f32.mrf.mxu2 }
  0xd5   :  { %v193_v47 = vadd.f32 %v192_v46, %v567_v39 }
  0xd6   :  { %v275_v48 = vpop.f32.mrf.mxu3 }
  0xd7   :  { %317 = vst [vmem:[%s740_s3 + $0x120] sm:$0xff] %v193_v47  ;;  %v245_v49 = vpop.f32.mrf.mxu1  ;;  %v276_v50 = vadd.f32 %v275_v48, %v565_v38 }
  0xd8   :  { %v246_v51 = vadd.f32 %v245_v49, %v565_v38  ;;  %v165_v52 = vpop.f32.mrf.mxu0 }
  0xd9   :  { %320 = vst [vmem:[%s740_s3 + $0x138] sm:$0xff] %v276_v50  ;;  %v166_v53 = vadd.f32 %v165_v52, %v567_v39 }
  0xda   :  { %300 = vst [vmem:[%s740_s3 + $0x98] sm:$0xff] %v246_v51 }
  0xdb   :  { %299 = vst [vmem:[%s740_s3 + $0x90] sm:$0xff] %v166_v53 }
  0xdc   :  { %v195_v54 = vpop.f32.mrf.mxu2 }
  0xdd   :  { %v196_v55 = vadd.f32 %v195_v54, %v567_v39 }
  0xde   :  { %v278_v56 = vpop.f32.mrf.mxu3 }
  0xdf   :  { %319 = vst [vmem:[%s740_s3 + $0x130] sm:$0xff] %v196_v55  ;;  %v248_v57 = vpop.f32.mrf.mxu1  ;;  %v279_v58 = vadd.f32 %v278_v56, %v565_v38 }
  0xe0   :  { %v249_v59 = vadd.f32 %v248_v57, %v565_v38 }
  0xe1   :  { %322 = vst [vmem:[%s740_s3 + $0x148] sm:$0xff] %v279_v58 }
  0xe2   :  { %302 = vst [vmem:[%s740_s3 + $0xa8] sm:$0xff] %v249_v59 }
  0xe4   :  { %v198_v60 = vpop.f32.mrf.mxu2 }
  0xe5   :  { %v199_v61 = vadd.f32 %v198_v60, %v567_v39 }
  0xe7   :  { %321 = vst [vmem:[%s740_s3 + $0x140] sm:$0xff] %v199_v61 }

// kernel: up_block_forward.7
= control target key start
LH: loop header
LB: loop body
LE: loop exit
PB: predicated region body
PF: predicated region fallthrough
CT: control target
= control target key end

     0   :  { %s572_s12 = smov 0   ;;  %s771_s0 = inlined_call_operand.vmem [shape: f32[656,128], index: 0, kind: input, shape index: {}]   ;;  %s772_s1 = inlined_call_operand.vmem [shape: f32[1,128], index: 1, kind: input, shape index: {}]   ;;  %s773_s2 = inlined_call_operand.vmem [shape: f32[1,128], index: 2, kind: input, shape index: {}]   ;;  %s774_s3 = inlined_call_operand.vmem [shape: f32[656,128], index: 3, kind: output, shape index: {}]  }
   0x1 LB: > { %s525_s13 = sadd.s32 4294967295, %s550_s12   ;;  %p529_p0 = scmp.ge.s32.totalorder %s550_s12, 1  ;;  %s550_s12 = sphi %s572_s12, %s13_s12  }
   0x2   : > { %p138_p1 = scmp.lt.s32.totalorder %s550_s12, 3 }
   0x4   : > { %p139_p2 = pnand %p529_p0, %p138_p1 }
   0x5   : > { %s162_s14 = smul.u32 (!%p139_p2), 41, %s525_s13 }
   0x6   : > { %142 = sbr.rel (%p139_p2) target bundleno = 70 (0x46), region = 32 }
   0x7   : > { %p163_p3 = scmp.lt.s32.totalorder (!%p139_p2), %s162_s14, 81 }
   0xb   : > { %s776_s14 = smov (!%p163_p3, %s162_s14), 81  ;;  %v585_v0 = vld [vmem:[%s772_s1] ss:$0 sm:$0xff] }
   0xc   : > { %s530_s17 = sshll.u32 %s776_s14, 3  ;;  %v596_v1 = vld [vmem:[%s773_s2] ss:$0 sm:$0xff] }
   0xd   : > { %s591_s20 = scalar_lea.vmem %s771_s0, %s530_s17  ;;  %s624_s25 = scalar_lea.vmem %s774_s3, %s530_s17 }
   0xe   : > { %v174_v2 = vld [vmem:[%s591_s20] sm:$0xff]  ;;  %v175_v3 = vld [vmem:[%s591_s20 + $0x8] sm:$0xff]  ;;  %v176_v4 = vld [vmem:[%s591_s20 + $0x10] sm:$0xff] }
   0xf   : > { %v219_v5 = vmul.f32 %v585_v0, %v174_v2  ;;  %v220_v6 = vmul.f32 %v585_v0, %v175_v3  ;;  %v221_v7 = vmul.f32 %v585_v0, %v176_v4  ;;  %v177_v8 = vld [vmem:[%s591_s20 + $0x18] sm:$0xff]  ;;  %v178_v9 = vld [vmem:[%s591_s20 + $0x20] sm:$0xff]  ;;  %v179_v10 = vld [vmem:[%s591_s20 + $0x28] sm:$0xff] }
  0x10   : > { %v222_v11 = vmul.f32 %v585_v0, %v177_v8  ;;  %v223_v12 = vmul.f32 %v585_v0, %v178_v9  ;;  %v224_v13 = vmul.f32 %v585_v0, %v179_v10  ;;  %v180_v14 = vld [vmem:[%s591_s20 + $0x30] sm:$0xff]  ;;  %v181_v15 = vld [vmem:[%s591_s20 + $0x38] sm:$0xff]  ;;  %v182_v24 = vld [vmem:[%s591_s20 + $0x40] sm:$0xff] }
  0x11   : > { %v264_v16 = vadd.f32 %v596_v1, %v219_v5  ;;  %v265_v17 = vadd.f32 %v596_v1, %v220_v6  ;;  %v266_v18 = vadd.f32 %v596_v1, %v221_v7  ;;  %v225_v19 = vmul.f32 %v585_v0, %v180_v14  ;;  %v183_v32 = vld [vmem:[%s591_s20 + $0x48] sm:$0xff]  ;;  %v184_v33 = vld [vmem:[%s591_s20 + $0x50] sm:$0xff]  ;;  %v185_v34 = vld [vmem:[%s591_s20 + $0x58] sm:$0xff] }
  0x12   : > { %v267_v20 = vadd.f32 %v596_v1, %v222_v11  ;;  %v268_v21 = vadd.f32 %v596_v1, %v223_v12  ;;  %v269_v22 = vadd.f32 %v596_v1, %v224_v13  ;;  %v226_v23 = vmul.f32 %v585_v0, %v181_v15  ;;  %v186_v46 = vld [vmem:[%s591_s20 + $0x60] sm:$0xff]  ;;  %v187_v53 = vld [vmem:[%s591_s20 + $0x68] sm:$0xff]  ;;  %v188_v57 = vld [vmem:[%s591_s20 + $0x70] sm:$0xff] }
  0x13   : > { %vm305_vm0 = vcmp.ge.f32.partialorder %v264_v16, 0.0  ;;  %v346_v25 = vmul.f32 0.2, %v264_v16  ;;  %vm306_vm1 = vcmp.ge.f32.partialorder %v265_v17, 0.0  ;;  %v347_v26 = vmul.f32 0.2, %v265_v17 }
  0x14   : > { %vm307_vm2 = vcmp.ge.f32.partialorder %v266_v18, 0.0  ;;  %v348_v27 = vmul.f32 0.2, %v266_v18  ;;  %vm308_vm3 = vcmp.ge.f32.partialorder %v267_v20, 0.0  ;;  %v349_v28 = vmul.f32 0.2, %v267_v20 }
  0x15   : > { %v387_v29 = vsel %vm305_vm0, %v264_v16, %v346_v25  ;;  %v388_v30 = vsel %vm306_vm1, %v265_v17, %v347_v26  ;;  %vm309_vm4 = vcmp.ge.f32.partialorder %v268_v21, 0.0  ;;  %v350_v31 = vmul.f32 0.2, %v268_v21  ;;  %v189_v58 = vld [vmem:[%s591_s20 + $0x78] sm:$0xff]  ;;  %v190_v61 = vld [vmem:[%s591_s20 + $0x80] sm:$0xff]  ;;  %v191_v7 = vld [vmem:[%s591_s20 + $0x88] sm:$0xff] }
  0x16   : > { %428 = vst [vmem:[%s624_s25] sm:$0xff] %v387_v29  ;;  %v389_v35 = vsel %vm307_vm2, %v266_v18, %v348_v27  ;;  %v390_v36 = vsel %vm308_vm3, %v267_v20, %v349_v28  ;;  %vm310_vm5 = vcmp.ge.f32.partialorder %v269_v22, 0.0  ;;  %v351_v37 = vmul.f32 0.2, %v269_v22  ;;  %v192_v8 = vld [vmem:[%s591_s20 + $0x90] sm:$0xff]  ;;  %v194_v29 = vld [vmem:[%s591_s20 + $0xa0] sm:$0xff] }
  0x17   : > { %429 = vst [vmem:[%s624_s25 + $0x8] sm:$0xff] %v388_v30  ;;  %v391_v38 = vsel %vm309_vm4, %v268_v21, %v350_v31  ;;  %v270_v39 = vadd.f32 %v596_v1, %v225_v19  ;;  %v271_v40 = vadd.f32 %v596_v1, %v226_v23  ;;  %v227_v41 = vmul.f32 %v585_v0, %v182_v24  ;;  %v195_v30 = vld [vmem:[%s591_s20 + $0xa8] sm:$0xff]  ;;  %v196_v31 = vld [vmem:[%s591_s20 + $0xb0] sm:$0xff] }
  0x18   : > { %430 = vst [vmem:[%s624_s25 + $0x10] sm:$0xff] %v389_v35  ;;  %v392_v42 = vsel %vm310_vm5, %v269_v22, %v351_v37  ;;  %v228_v43 = vmul.f32 %v585_v0, %v183_v32  ;;  %v229_v44 = vmul.f32 %v585_v0, %v184_v33  ;;  %v230_v45 = vmul.f32 %v585_v0, %v185_v34  ;;  %v193_v22 = vld [vmem:[%s591_s20 + $0x98] sm:$0xff] }
  0x19   : > { %431 = vst [vmem:[%s624_s25 + $0x18] sm:$0xff] %v390_v36  ;;  %vm311_vm6 = vcmp.ge.f32.partialorder %v270_v39, 0.0  ;;  %v352_v47 = vmul.f32 0.2, %v270_v39  ;;  %vm312_vm7 = vcmp.ge.f32.partialorder %v271_v40, 0.0  ;;  %v272_v48 = vadd.f32 %v596_v1, %v227_v41  ;;  %v197_v35 = vld [vmem:[%s591_s20 + $0xb8] sm:$0xff] }
  0x1a   : > { %432 = vst [vmem:[%s624_s25 + $0x20] sm:$0xff] %v391_v38  ;;  %v353_v49 = vmul.f32 0.2, %v271_v40  ;;  %v273_v50 = vadd.f32 %v596_v1, %v228_v43  ;;  %v274_v51 = vadd.f32 %v596_v1, %v229_v44  ;;  %v275_v52 = vadd.f32 %v596_v1, %v230_v45  ;;  %v198_v36 = vld [vmem:[%s591_s20 + $0xc0] sm:$0xff] }
  0x1b   : > { %433 = vst [vmem:[%s624_s25 + $0x28] sm:$0xff] %v392_v42  ;;  %v393_v54 = vsel %vm311_vm6, %v270_v39, %v352_v47  ;;  %vm313_vm8 = vcmp.ge.f32.partialorder %v272_v48, 0.0  ;;  %v354_v55 = vmul.f32 0.2, %v272_v48  ;;  %v231_v56 = vmul.f32 %v585_v0, %v186_v46 }
  0x1c   : > { %434 = vst [vmem:[%s624_s25 + $0x30] sm:$0xff] %v393_v54  ;;  %v394_v59 = vsel %vm312_vm7, %v271_v40, %v353_v49  ;;  %vm314_vm9 = vcmp.ge.f32.partialorder %v273_v50, 0.0  ;;  %v355_v60 = vmul.f32 0.2, %v273_v50  ;;  %vm315_vm10 = vcmp.ge.f32.partialorder %v274_v51, 0.0  ;;  %v199_v40 = vld [vmem:[%s591_s20 + $0xc8] sm:$0xff] }
  0x1d   : > { %435 = vst [vmem:[%s624_s25 + $0x38] sm:$0xff] %v394_v59  ;;  %v395_v62 = vsel %vm313_vm8, %v272_v48, %v354_v55  ;;  %v356_v63 = vmul.f32 0.2, %v274_v51  ;;  %vm316_vm11 = vcmp.ge.f32.partialorder %v275_v52, 0.0  ;;  %v357_v2 = vmul.f32 0.2, %v275_v52 }
  0x1e   : > { %436 = vst [vmem:[%s624_s25 + $0x40] sm:$0xff] %v395_v62  ;;  %v396_v3 = vsel %vm314_vm9, %v273_v50, %v355_v60  ;;  %v276_v4 = vadd.f32 %v596_v1, %v231_v56  ;;  %v232_v5 = vmul.f32 %v585_v0, %v187_v53  ;;  %v233_v6 = vmul.f32 %v585_v0, %v188_v57  ;;  %v200_v56 = vld [vmem:[%s591_s20 + $0xd0] sm:$0xff]  ;;  %v201_v57 = vld [vmem:[%s591_s20 + $0xd8] sm:$0xff]  ;;  %v202_v62 = vld [vmem:[%s591_s20 + $0xe0] sm:$0xff] }
  0x1f   : > { %437 = vst [vmem:[%s624_s25 + $0x48] sm:$0xff] %v396_v3  ;;  %v397_v9 = vsel %vm315_vm10, %v274_v51, %v356_v63  ;;  %v398_v10 = vsel %vm316_vm11, %v275_v52, %v357_v2  ;;  %v234_v11 = vmul.f32 %v585_v0, %v189_v58  ;;  %v235_v12 = vmul.f32 %v585_v0, %v190_v61  ;;  %v203_v63 = vld [vmem:[%s591_s20 + $0xe8] sm:$0xff] }
  0x20   : > { %438 = vst [vmem:[%s624_s25 + $0x50] sm:$0xff] %v397_v9  ;;  %vm317_vm12 = vcmp.ge.f32.partialorder %v276_v4, 0.0  ;;  %v358_v13 = vmul.f32 0.2, %v276_v4  ;;  %v277_v14 = vadd.f32 %v596_v1, %v232_v5  ;;  %v278_v15 = vadd.f32 %v596_v1, %v233_v6  ;;  %v204_v9 = vld [vmem:[%s591_s20 + $0xf0] sm:$0xff] }
  0x21   : > { %439 = vst [vmem:[%s624_s25 + $0x58] sm:$0xff] %v398_v10  ;;  %v279_v16 = vadd.f32 %v596_v1, %v234_v11  ;;  %v280_v17 = vadd.f32 %v596_v1, %v235_v12  ;;  %v236_v18 = vmul.f32 %v585_v0, %v191_v7  ;;  %v237_v19 = vmul.f32 %v585_v0, %v192_v8 }
  0x22   : > { %v399_v20 = vsel %vm317_vm12, %v276_v4, %v358_v13  ;;  %vm318_vm13 = vcmp.ge.f32.partialorder %v277_v14, 0.0  ;;  %v359_v21 = vmul.f32 0.2, %v277_v14  ;;  %vm319_vm14 = vcmp.ge.f32.partialorder %v278_v15, 0.0 }
  0x23   : > { %440 = vst [vmem:[%s624_s25 + $0x60] sm:$0xff] %v399_v20  ;;  %v360_v23 = vmul.f32 0.2, %v278_v15  ;;  %vm320_vm15 = vcmp.ge.f32.partialorder %v279_v16, 0.0  ;;  %v361_v24 = vmul.f32 0.2, %v279_v16  ;;  %v281_v25 = vadd.f32 %v596_v1, %v236_v18 }
  0x24   : > { %v400_v26 = vsel %vm318_vm13, %v277_v14, %v359_v21  ;;  %vm321_vm0 = vcmp.ge.f32.partialorder %v280_v17, 0.0  ;;  %v362_v27 = vmul.f32 0.2, %v280_v17  ;;  %v282_v28 = vadd.f32 %v596_v1, %v237_v19  ;;  %v205_v14 = vld [vmem:[%s591_s20 + $0xf8] sm:$0xff] }
  0x25   : > { %441 = vst [vmem:[%s624_s25 + $0x68] sm:$0xff] %v400_v26  ;;  %v401_v32 = vsel %vm319_vm14, %v278_v15, %v360_v23  ;;  %v402_v33 = vsel %vm320_vm15, %v279_v16, %v361_v24  ;;  %vm322_vm1 = vcmp.ge.f32.partialorder %v281_v25, 0.0  ;;  %v363_v34 = vmul.f32 0.2, %v281_v25  ;;  %v207_v26 = vld [vmem:[%s591_s20 + $0x108] sm:$0xff] }
  0x26   : > { %442 = vst [vmem:[%s624_s25 + $0x70] sm:$0xff] %v401_v32  ;;  %v403_v37 = vsel %vm321_vm0, %v280_v17, %v362_v27  ;;  %vm323_vm2 = vcmp.ge.f32.partialorder %v282_v28, 0.0  ;;  %v364_v38 = vmul.f32 0.2, %v282_v28  ;;  %v238_v39 = vmul.f32 %v585_v0, %v193_v22 }
  0x27   : > { %443 = vst [vmem:[%s624_s25 + $0x78] sm:$0xff] %v402_v33  ;;  %v404_v41 = vsel %vm322_vm1, %v281_v25, %v363_v34  ;;  %v239_v42 = vmul.f32 %v585_v0, %v194_v29  ;;  %v240_v43 = vmul.f32 %v585_v0, %v195_v30  ;;  %v241_v44 = vmul.f32 %v585_v0, %v196_v31  ;;  %v206_v25 = vld [vmem:[%s591_s20 + $0x100] sm:$0xff] }
  0x28   : > { %444 = vst [vmem:[%s624_s25 + $0x80] sm:$0xff] %v403_v37  ;;  %v405_v45 = vsel %vm323_vm2, %v282_v28, %v364_v38  ;;  %v283_v46 = vadd.f32 %v596_v1, %v238_v39  ;;  %v242_v47 = vmul.f32 %v585_v0, %v197_v35  ;;  %v243_v48 = vmul.f32 %v585_v0, %v198_v36  ;;  %v208_v36 = vld [vmem:[%s591_s20 + $0x110] sm:$0xff]  ;;  %v209_v37 = vld [vmem:[%s591_s20 + $0x118] sm:$0xff]  ;;  %v210_v38 = vld [vmem:[%s591_s20 + $0x120] sm:$0xff] }
  0x29   : > { %445 = vst [vmem:[%s624_s25 + $0x88] sm:$0xff] %v404_v41  ;;  %v284_v49 = vadd.f32 %v596_v1, %v239_v42  ;;  %v285_v50 = vadd.f32 %v596_v1, %v240_v43  ;;  %v286_v51 = vadd.f32 %v596_v1, %v241_v44  ;;  %v244_v52 = vmul.f32 %v585_v0, %v199_v40 }
  0x2a   : > { %446 = vst [vmem:[%s624_s25 + $0x90] sm:$0xff] %v405_v45  ;;  %vm324_vm3 = vcmp.ge.f32.partialorder %v283_v46, 0.0  ;;  %v365_v53 = vmul.f32 0.2, %v283_v46  ;;  %v287_v54 = vadd.f32 %v596_v1, %v242_v47  ;;  %v288_v55 = vadd.f32 %v596_v1, %v243_v48 }
  0x2b   : > { %vm325_vm4 = vcmp.ge.f32.partialorder %v284_v49, 0.0  ;;  %v366_v58 = vmul.f32 0.2, %v284_v49  ;;  %vm326_vm5 = vcmp.ge.f32.partialorder %v285_v50, 0.0  ;;  %v367_v59 = vmul.f32 0.2, %v285_v50 }
  0x2c   : > { %v406_v60 = vsel %vm324_vm3, %v283_v46, %v365_v53  ;;  %vm327_vm6 = vcmp.ge.f32.partialorder %v286_v51, 0.0  ;;  %v368_v61 = vmul.f32 0.2, %v286_v51  ;;  %vm328_vm7 = vcmp.ge.f32.partialorder %v287_v54, 0.0 }
  0x2d   : > { %447 = vst [vmem:[%s624_s25 + $0x98] sm:$0xff] %v406_v60  ;;  %v407_v2 = vsel %vm325_vm4, %v284_v49, %v366_v58  ;;  %v408_v3 = vsel %vm326_vm5, %v285_v50, %v367_v59  ;;  %v369_v4 = vmul.f32 0.2, %v287_v54  ;;  %vm329_vm8 = vcmp.ge.f32.partialorder %v288_v55, 0.0  ;;  %v211_v49 = vld [vmem:[%s591_s20 + $0x128] sm:$0xff]  ;;  %v212_v50 = vld [vmem:[%s591_s20 + $0x130] sm:$0xff] }
  0x2e   : > { %448 = vst [vmem:[%s624_s25 + $0xa0] sm:$0xff] %v407_v2  ;;  %v409_v5 = vsel %vm327_vm6, %v286_v51, %v368_v61  ;;  %v370_v6 = vmul.f32 0.2, %v288_v55  ;;  %v289_v7 = vadd.f32 %v596_v1, %v244_v52  ;;  %v245_v8 = vmul.f32 %v585_v0, %v200_v56  ;;  %v213_v51 = vld [vmem:[%s591_s20 + $0x138] sm:$0xff] }
  0x2f   : > { %449 = vst [vmem:[%s624_s25 + $0xa8] sm:$0xff] %v408_v3  ;;  %v410_v10 = vsel %vm328_vm7, %v287_v54, %v369_v4  ;;  %v246_v11 = vmul.f32 %v585_v0, %v201_v57  ;;  %v247_v12 = vmul.f32 %v585_v0, %v202_v62  ;;  %v248_v13 = vmul.f32 %v585_v0, %v203_v63  ;;  %v214_v62 = vld [vmem:[%s591_s20 + $0x140] sm:$0xff] }
  0x30   : > { %450 = vst [vmem:[%s624_s25 + $0xb0] sm:$0xff] %v409_v5  ;;  %v411_v15 = vsel %vm329_vm8, %v288_v55, %v370_v6  ;;  %vm330_vm9 = vcmp.ge.f32.partialorder %v289_v7, 0.0  ;;  %v371_v16 = vmul.f32 0.2, %v289_v7  ;;  %v290_v17 = vadd.f32 %v596_v1, %v245_v8 }
  0x31   : > { %451 = vst [vmem:[%s624_s25 + $0xb8] sm:$0xff] %v410_v10  ;;  %v291_v18 = vadd.f32 %v596_v1, %v246_v11  ;;  %v292_v19 = vadd.f32 %v596_v1, %v247_v12  ;;  %v293_v20 = vadd.f32 %v596_v1, %v248_v13  ;;  %v249_v21 = vmul.f32 %v585_v0, %v204_v9 }
  0x32   : > { %452 = vst [vmem:[%s624_s25 + $0xc0] sm:$0xff] %v411_v15  ;;  %v412_v22 = vsel %vm330_vm9, %v289_v7, %v371_v16  ;;  %vm331_vm10 = vcmp.ge.f32.partialorder %v290_v17, 0.0  ;;  %v372_v23 = vmul.f32 0.2, %v290_v17  ;;  %v250_v24 = vmul.f32 %v585_v0, %v205_v14 }
  0x33   : > { %453 = vst [vmem:[%s624_s25 + $0xc8] sm:$0xff] %v412_v22  ;;  %vm332_vm11 = vcmp.ge.f32.partialorder %v291_v18, 0.0  ;;  %v373_v27 = vmul.f32 0.2, %v291_v18  ;;  %vm333_vm12 = vcmp.ge.f32.partialorder %v292_v19, 0.0  ;;  %vm334_vm13 = vcmp.ge.f32.partialorder %v293_v20, 0.0 }
  0x34   : > { %v413_v28 = vsel %vm331_vm10, %v290_v17, %v372_v23  ;;  %v374_v29 = vmul.f32 0.2, %v292_v19  ;;  %v375_v30 = vmul.f32 0.2, %v293_v20  ;;  %v294_v31 = vadd.f32 %v596_v1, %v249_v21 }
  0x35   : > { %454 = vst [vmem:[%s624_s25 + $0xd0] sm:$0xff] %v413_v28  ;;  %v414_v32 = vsel %vm332_vm11, %v291_v18, %v373_v27  ;;  %v295_v33 = vadd.f32 %v596_v1, %v250_v24  ;;  %v251_v34 = vmul.f32 %v585_v0, %v206_v25  ;;  %v252_v35 = vmul.f32 %v585_v0, %v207_v26 }
  0x36   : > { %455 = vst [vmem:[%s624_s25 + $0xd8] sm:$0xff] %v414_v32  ;;  %v415_v39 = vsel %vm333_vm12, %v292_v19, %v374_v29  ;;  %v416_v40 = vsel %vm334_vm13, %v293_v20, %v375_v30  ;;  %vm335_vm14 = vcmp.ge.f32.partialorder %v294_v31, 0.0  ;;  %v376_v41 = vmul.f32 0.2, %v294_v31 }
  0x37   : > { %456 = vst [vmem:[%s624_s25 + $0xe0] sm:$0xff] %v415_v39  ;;  %vm336_vm15 = vcmp.ge.f32.partialorder %v295_v33, 0.0  ;;  %v377_v42 = vmul.f32 0.2, %v295_v33  ;;  %v296_v43 = vadd.f32 %v596_v1, %v251_v34  ;;  %v297_v44 = vadd.f32 %v596_v1, %v252_v35 }
  0x38   : > { %457 = vst [vmem:[%s624_s25 + $0xe8] sm:$0xff] %v416_v40  ;;  %v417_v45 = vsel %vm335_vm14, %v294_v31, %v376_v41  ;;  %v253_v46 = vmul.f32 %v585_v0, %v208_v36  ;;  %v254_v47 = vmul.f32 %v585_v0, %v209_v37  ;;  %v255_v48 = vmul.f32 %v585_v0, %v210_v38 }
  0x39   : > { %458 = vst [vmem:[%s624_s25 + $0xf0] sm:$0xff] %v417_v45  ;;  %v418_v52 = vsel %vm336_vm15, %v295_v33, %v377_v42  ;;  %vm337_vm0 = vcmp.ge.f32.partialorder %v296_v43, 0.0  ;;  %v378_v53 = vmul.f32 0.2, %v296_v43  ;;  %vm338_vm1 = vcmp.ge.f32.partialorder %v297_v44, 0.0 }
  0x3a   : > { %459 = vst [vmem:[%s624_s25 + $0xf8] sm:$0xff] %v418_v52  ;;  %v379_v54 = vmul.f32 0.2, %v297_v44  ;;  %v298_v55 = vadd.f32 %v596_v1, %v253_v46  ;;  %v299_v56 = vadd.f32 %v596_v1, %v254_v47  ;;  %v300_v57 = vadd.f32 %v596_v1, %v255_v48 }
  0x3b   : > { %v419_v58 = vsel %vm337_vm0, %v296_v43, %v378_v53  ;;  %v256_v59 = vmul.f32 %v585_v0, %v211_v49  ;;  %v257_v60 = vmul.f32 %v585_v0, %v212_v50  ;;  %v258_v61 = vmul.f32 %v585_v0, %v213_v51 }
  0x3c   : > { %460 = vst [vmem:[%s624_s25 + $0x100] sm:$0xff] %v419_v58  ;;  %v420_v63 = vsel %vm338_vm1, %v297_v44, %v379_v54  ;;  %vm339_vm2 = vcmp.ge.f32.partialorder %v298_v55, 0.0  ;;  %v380_v2 = vmul.f32 0.2, %v298_v55  ;;  %vm340_vm3 = vcmp.ge.f32.partialorder %v299_v56, 0.0 }
  0x3d   : > { %461 = vst [vmem:[%s624_s25 + $0x108] sm:$0xff] %v420_v63  ;;  %v381_v3 = vmul.f32 0.2, %v299_v56  ;;  %vm341_vm4 = vcmp.ge.f32.partialorder %v300_v57, 0.0  ;;  %v382_v4 = vmul.f32 0.2, %v300_v57  ;;  %v301_v5 = vadd.f32 %v596_v1, %v256_v59 }
  0x3e   : > { %v421_v6 = vsel %vm339_vm2, %v298_v55, %v380_v2  ;;  %v302_v7 = vadd.f32 %v596_v1, %v257_v60  ;;  %v303_v8 = vadd.f32 %v596_v1, %v258_v61  ;;  %v259_v9 = vmul.f32 %v585_v0, %v214_v62 }
  0x3f   : > { %462 = vst [vmem:[%s624_s25 + $0x110] sm:$0xff] %v421_v6  ;;  %v422_v10 = vsel %vm340_vm3, %v299_v56, %v381_v3  ;;  %v423_v11 = vsel %vm341_vm4, %v300_v57, %v382_v4  ;;  %vm342_vm5 = vcmp.ge.f32.partialorder %v301_v5, 0.0  ;;  %v383_v12 = vmul.f32 0.2, %v301_v5 }
  0x40   : > { %463 = vst [vmem:[%s624_s25 + $0x118] sm:$0xff] %v422_v10  ;;  %vm343_vm6 = vcmp.ge.f32.partialorder %v302_v7, 0.0  ;;  %v384_v13 = vmul.f32 0.2, %v302_v7  ;;  %vm344_vm7 = vcmp.ge.f32.partialorder %v303_v8, 0.0  ;;  %v304_v14 = vadd.f32 %v596_v1, %v259_v9 }
  0x41   : > { %464 = vst [vmem:[%s624_s25 + $0x120] sm:$0xff] %v423_v11  ;;  %v424_v15 = vsel %vm342_vm5, %v301_v5, %v383_v12  ;;  %v385_v16 = vmul.f32 0.2, %v303_v8 }
  0x42   : > { %465 = vst [vmem:[%s624_s25 + $0x128] sm:$0xff] %v424_v15  ;;  %v425_v17 = vsel %vm343_vm6, %v302_v7, %v384_v13  ;;  %vm345_vm8 = vcmp.ge.f32.partialorder %v304_v14, 0.0  ;;  %v386_v0 = vmul.f32 0.2, %v304_v14 }
  0x43   : > { %466 = vst [vmem:[%s624_s25 + $0x130] sm:$0xff] %v425_v17  ;;  %v426_v18 = vsel %vm344_vm7, %v303_v8, %v385_v16 }
  0x44   : > { %467 = vst [vmem:[%s624_s25 + $0x138] sm:$0xff] %v426_v18  ;;  %v427_v19 = vsel %vm345_vm8, %v304_v14, %v386_v0 }
  0x45   : > { %468 = vst [vmem:[%s624_s25 + $0x140] sm:$0xff] %v427_v19 }
  0x46 PF: > { %s13_s12 = sadd.s32 1, %s550_s12  }
  0x47   : > { %p10_p4 = scmp.ge.s32.totalorder %s13_s12, 4  }
  0x49   :  { %12 = sbr.rel (!%p10_p4) target bundleno = 1 (0x1), region = 62 }

// kernel: up_block_forward.6
= control target key start
LH: loop header
LB: loop body
LE: loop exit
PB: predicated region body
PF: predicated region fallthrough
CT: control target
= control target key end

     0   :  { %s1523_s15 = smov 0   ;;  %s1995_s0 = inlined_call_operand.vmem [shape: f32[656,448], index: 0, kind: input, shape index: {}]   ;;  %s1996_s1 = inlined_call_operand.vmem [shape: f32[448,128], index: 1, kind: input, shape index: {}]   ;;  %s1997_s2 = inlined_call_operand.vmem [shape: f32[656,128], index: 2, kind: output, shape index: {0}]   ;;  %s1998_s3 = inlined_call_operand.vmem [shape: f32[16,128], index: 3, kind: output, shape index: {1}]   ;;  %s1999_s4 = inlined_call_operand.vmem [shape: f32[16,128], index: 4, kind: output, shape index: {2}]  }
   0x1 LB: > { %s1529_s16 = sadd.s32 4294967295, %s1496_s15   ;;  %p1432_p0 = scmp.ge.s32.totalorder %s1496_s15, 1  ;;  %s1496_s15 = sphi %s1523_s15, %s15_s15  }
   0x2   : > { %p169_p1 = scmp.lt.s32.totalorder %s1496_s15, 3 }
   0x4   : > { %p170_p2 = pnand %p1432_p0, %p169_p1 }
   0x5   : > { %s204_s23 = smul.u32 (!%p170_p2), 41, %s1529_s16  ;;  %p217_p4 = scmp.lt.s32.totalorder (!%p170_p2), %s1529_s16, 1 }
   0x6   : > { %173 = sbr.rel (%p170_p2) target bundleno = 517 (0x205), region = 28 }
   0x7   : > { %p1608_p3 = scmp.lt.s32.totalorder (!%p170_p2), %s204_s23, 81 }
   0xb   : > { %v436_v0 = vld [vmem:[%s1996_s1 + $0x178] sm:$0xff]  ;;  %v435_v1 = vld [vmem:[%s1996_s1 + $0x170] sm:$0xff]  ;;  %v434_v5 = vld [vmem:[%s1996_s1 + $0x168] sm:$0xff]  ;;  %s2002_s23 = smov (!%p1608_p3, %s204_s23), 81  ;;  %vm445_vm0 = vcmask 523264   ;;  %s2004_s16 = smov (!%p217_p4, %s1529_s16), 1 }
   0xc   : > { %v404_v2 = vld [vmem:[%s1996_s1 + $0x78] sm:$0xff]  ;;  %849 = vmatpush.msra.mxu2 %v436_v0  ;;  %v403_v4 = vld [vmem:[%s1996_s1 + $0x70] sm:$0xff]  ;;  %v402_v7 = vld [vmem:[%s1996_s1 + $0x68] sm:$0xff]  ;;  %s1481_s29 = sshll.u32 %s2002_s23, 5  ;;  %s1435_s18 = sshll.u32 %s2002_s23, 3 }
   0xd   : > { %569 = vmatpush.msra.mxu0 %v404_v2  ;;  %v420_v3 = vld [vmem:[%s1996_s1 + $0xf8] sm:$0xff]  ;;  %v419_v6 = vld [vmem:[%s1996_s1 + $0xf0] sm:$0xff]  ;;  %v418_v8 = vld [vmem:[%s1996_s1 + $0xe8] sm:$0xff]  ;;  %s1688_s20 = scalar_lea.vmem %s1995_s0, %s1481_s29  ;;  %s1811_s22 = scalar_lea.vmem %s1997_s2, %s1435_s18 }
   0xe   : > { %709 = vmatpush.msra.mxu1 %v420_v3  ;;  %850 = vmatpush.msra.mxu2 %v435_v1  ;;  %v433_v9 = vld [vmem:[%s1996_s1 + $0x160] sm:$0xff]  ;;  %v432_v12 = vld [vmem:[%s1996_s1 + $0x158] sm:$0xff]  ;;  %v431_v15 = vld [vmem:[%s1996_s1 + $0x150] sm:$0xff]  ;;  %s1436_s23 = sshll.u32 %s2004_s16, 3 }
   0xf   : > { %570 = vmatpush.msra.mxu0 %v403_v4  ;;  %v401_v10 = vld [vmem:[%s1996_s1 + $0x60] sm:$0xff]  ;;  %v400_v13 = vld [vmem:[%s1996_s1 + $0x58] sm:$0xff]  ;;  %v399_v16 = vld [vmem:[%s1996_s1 + $0x50] sm:$0xff]  ;;  %s220_s25 = scalar_lea.vmem %s1998_s3, %s1436_s23  ;;  %s224_s28 = scalar_lea.vmem %s1999_s4, %s1436_s23 }
  0x10   : > { %710 = vmatpush.msra.mxu1 %v419_v6  ;;  %851 = vmatpush.msra.mxu2 %v434_v5  ;;  %v417_v11 = vld [vmem:[%s1996_s1 + $0xe0] sm:$0xff]  ;;  %v416_v14 = vld [vmem:[%s1996_s1 + $0xd8] sm:$0xff]  ;;  %v415_v18 = vld [vmem:[%s1996_s1 + $0xd0] sm:$0xff] }
  0x11   : > { %571 = vmatpush.msra.mxu0 %v402_v7  ;;  %v444_v17 = vld [vmem:[%s1996_s1 + $0x1b8] sm:$0xff]  ;;  %v430_v19 = vld [vmem:[%s1996_s1 + $0x148] sm:$0xff]  ;;  %v443_v21 = vld [vmem:[%s1996_s1 + $0x1b0] sm:$0xff] }
  0x12   : > { %711 = vmatpush.msra.mxu1 %v418_v8  ;;  %852 = vmatpush.msra.mxu2 %v433_v9  ;;  %v398_v20 = vld [vmem:[%s1996_s1 + $0x48] sm:$0xff]  ;;  %v429_v24 = vld [vmem:[%s1996_s1 + $0x140] sm:$0xff]  ;;  %v428_v28 = vld [vmem:[%s1996_s1 + $0x138] sm:$0xff] }
  0x13   : > { %572 = vmatpush.msra.mxu0 %v401_v10  ;;  %997 = vmatpush.msra.mxu3 %v444_v17  ;;  %v414_v22 = vld [vmem:[%s1996_s1 + $0xc8] sm:$0xff]  ;;  %v397_v25 = vld [vmem:[%s1996_s1 + $0x40] sm:$0xff]  ;;  %v396_v29 = vld [vmem:[%s1996_s1 + $0x38] sm:$0xff] }
  0x14   : > { %712 = vmatpush.msra.mxu1 %v417_v11  ;;  %853 = vmatpush.msra.mxu2 %v432_v12  ;;  %v442_v23 = vld [vmem:[%s1996_s1 + $0x1a8] sm:$0xff]  ;;  %v413_v26 = vld [vmem:[%s1996_s1 + $0xc0] sm:$0xff]  ;;  %v412_v30 = vld [vmem:[%s1996_s1 + $0xb8] sm:$0xff] }
  0x15   : > { %573 = vmatpush.msra.mxu0 %v400_v13  ;;  %998 = vmatpush.msra.mxu3 %v443_v21  ;;  %v441_v27 = vld [vmem:[%s1996_s1 + $0x1a0] sm:$0xff]  ;;  %v440_v31 = vld [vmem:[%s1996_s1 + $0x198] sm:$0xff]  ;;  %v427_v32 = vld [vmem:[%s1996_s1 + $0x130] sm:$0xff] }
  0x16   : > { %713 = vmatpush.msra.mxu1 %v416_v14  ;;  %854 = vmatpush.msra.mxu2 %v431_v15  ;;  %v395_v33 = vld [vmem:[%s1996_s1 + $0x30] sm:$0xff]  ;;  %v426_v36 = vld [vmem:[%s1996_s1 + $0x128] sm:$0xff]  ;;  %v425_v40 = vld [vmem:[%s1996_s1 + $0x120] sm:$0xff] }
  0x17   : > { %574 = vmatpush.msra.mxu0 %v399_v16  ;;  %999 = vmatpush.msra.mxu3 %v442_v23  ;;  %v411_v34 = vld [vmem:[%s1996_s1 + $0xb0] sm:$0xff]  ;;  %v394_v37 = vld [vmem:[%s1996_s1 + $0x28] sm:$0xff]  ;;  %v393_v41 = vld [vmem:[%s1996_s1 + $0x20] sm:$0xff] }
  0x18   : > { %714 = vmatpush.msra.mxu1 %v415_v18  ;;  %855 = vmatpush.msra.mxu2 %v430_v19  ;;  %v439_v35 = vld [vmem:[%s1996_s1 + $0x190] sm:$0xff]  ;;  %v410_v38 = vld [vmem:[%s1996_s1 + $0xa8] sm:$0xff]  ;;  %v409_v42 = vld [vmem:[%s1996_s1 + $0xa0] sm:$0xff] }
  0x19   : > { %575 = vmatpush.msra.mxu0 %v398_v20  ;;  %1000 = vmatpush.msra.mxu3 %v441_v27  ;;  %v438_v39 = vld [vmem:[%s1996_s1 + $0x188] sm:$0xff]  ;;  %v437_v43 = vld [vmem:[%s1996_s1 + $0x180] sm:$0xff]  ;;  %v424_v44 = vld [vmem:[%s1996_s1 + $0x118] sm:$0xff] }
  0x1a   : > { %715 = vmatpush.msra.mxu1 %v414_v22  ;;  %856 = vmatpush.msra.mxu2 %v429_v24  ;;  %v392_v45 = vld [vmem:[%s1996_s1 + $0x18] sm:$0xff]  ;;  %v423_v48 = vld [vmem:[%s1996_s1 + $0x110] sm:$0xff]  ;;  %v422_v51 = vld [vmem:[%s1996_s1 + $0x108] sm:$0xff] }
  0x1b   : > { %576 = vmatpush.msra.mxu0 %v397_v25  ;;  %1001 = vmatpush.msra.mxu3 %v440_v31  ;;  %v408_v46 = vld [vmem:[%s1996_s1 + $0x98] sm:$0xff]  ;;  %v391_v49 = vld [vmem:[%s1996_s1 + $0x10] sm:$0xff]  ;;  %v390_v52 = vld [vmem:[%s1996_s1 + $0x8] sm:$0xff] }
  0x1c   : > { %716 = vmatpush.msra.mxu1 %v413_v26  ;;  %857 = vmatpush.msra.mxu2 %v428_v28  ;;  %v228_v47 = vld [vmem:[%s1688_s20 + $0x18] sm:$0xff]  ;;  %v407_v50 = vld [vmem:[%s1996_s1 + $0x90] sm:$0xff]  ;;  %v406_v53 = vld [vmem:[%s1996_s1 + $0x88] sm:$0xff] }
  0x1d   : > { %577 = vmatpush.msra.mxu0 %v396_v29  ;;  %1002 = vmatpush.msra.mxu3 %v439_v35  ;;  %v421_v54 = vld [vmem:[%s1996_s1 + $0x100] sm:$0xff]  ;;  %v227_v56 = vld [vmem:[%s1688_s20 + $0x10] sm:$0xff]  ;;  %v226_v59 = vld [vmem:[%s1688_s20 + $0x8] sm:$0xff] }
  0x1e   : > { %717 = vmatpush.msra.mxu1 %v412_v30  ;;  %858 = vmatpush.msra.mxu2 %v427_v32  ;;  %v389_v55 = vld [vmem:[%s1996_s1] sm:$0xff]  ;;  %v232_v60 = vld [vmem:[%s1688_s20 + $0x38] sm:$0xff]  ;;  %v231_v61 = vld [vmem:[%s1688_s20 + $0x30] sm:$0xff] }
  0x1f   : > { %578 = vmatpush.msra.mxu0 %v395_v33  ;;  %1003 = vmatpush.msra.mxu3 %v438_v39  ;;  %v405_v57 = vld [vmem:[%s1996_s1 + $0x80] sm:$0xff]  ;;  %v230_v63 = vld [vmem:[%s1688_s20 + $0x28] sm:$0xff]  ;;  %v236_v0 = vld [vmem:[%s1688_s20 + $0x58] sm:$0xff] }
  0x20   : > { %718 = vmatpush.msra.mxu1 %v411_v34  ;;  %859 = vmatpush.msra.mxu2 %v426_v36  ;;  %v225_v58 = vld [vmem:[%s1688_s20] sm:$0xff]  ;;  %v235_v1 = vld [vmem:[%s1688_s20 + $0x50] sm:$0xff]  ;;  %v234_v3 = vld [vmem:[%s1688_s20 + $0x48] sm:$0xff] }
  0x21   : > { %579 = vmatpush.msra.mxu0 %v394_v37  ;;  %1004 = vmatpush.msra.mxu3 %v437_v43  ;;  %v229_v62 = vld [vmem:[%s1688_s20 + $0x20] sm:$0xff]  ;;  %v240_v4 = vld [vmem:[%s1688_s20 + $0x78] sm:$0xff]  ;;  %v239_v5 = vld [vmem:[%s1688_s20 + $0x70] sm:$0xff] }
  0x22   : > { %719 = vmatpush.msra.mxu1 %v410_v38  ;;  %860 = vmatpush.msra.mxu2 %v425_v40  ;;  %v233_v2 = vld [vmem:[%s1688_s20 + $0x40] sm:$0xff]  ;;  %v238_v7 = vld [vmem:[%s1688_s20 + $0x68] sm:$0xff]  ;;  %v244_v8 = vld [vmem:[%s1688_s20 + $0x98] sm:$0xff] }
  0x23   : > { %580 = vmatpush.msra.mxu0 %v393_v41  ;;  %1438 = vmatmul.msk.f32.vlgmr.msra.gmra.mxu3 %vm445_vm0, %v228_v47  ;;  %v237_v6 = vld [vmem:[%s1688_s20 + $0x60] sm:$0xff]  ;;  %v243_v9 = vld [vmem:[%s1688_s20 + $0x90] sm:$0xff]  ;;  %v242_v11 = vld [vmem:[%s1688_s20 + $0x88] sm:$0xff] }
  0x24   : > { %720 = vmatpush.msra.mxu1 %v409_v42  ;;  %861 = vmatpush.msra.mxu2 %v424_v44  ;;  %v241_v10 = vld [vmem:[%s1688_s20 + $0x80] sm:$0xff]  ;;  %v248_v12 = vld [vmem:[%s1688_s20 + $0xb8] sm:$0xff]  ;;  %v247_v13 = vld [vmem:[%s1688_s20 + $0xb0] sm:$0xff] }
  0x25   : > { %581 = vmatpush.msra.mxu0 %v392_v45  ;;  %v245_v14 = vld [vmem:[%s1688_s20 + $0xa0] sm:$0xff]  ;;  %v246_v15 = vld [vmem:[%s1688_s20 + $0xa8] sm:$0xff]  ;;  %v252_v16 = vld [vmem:[%s1688_s20 + $0xd8] sm:$0xff] }
  0x26   : > { %721 = vmatpush.msra.mxu1 %v408_v46  ;;  %862 = vmatpush.msra.mxu2 %v423_v48  ;;  %v251_v17 = vld [vmem:[%s1688_s20 + $0xd0] sm:$0xff]  ;;  %v249_v18 = vld [vmem:[%s1688_s20 + $0xc0] sm:$0xff]  ;;  %v250_v19 = vld [vmem:[%s1688_s20 + $0xc8] sm:$0xff] }
  0x27   : > { %582 = vmatpush.msra.mxu0 %v391_v49  ;;  %v256_v20 = vld [vmem:[%s1688_s20 + $0xf8] sm:$0xff]  ;;  %v255_v21 = vld [vmem:[%s1688_s20 + $0xf0] sm:$0xff]  ;;  %v253_v22 = vld [vmem:[%s1688_s20 + $0xe0] sm:$0xff] }
  0x28   : > { %722 = vmatpush.msra.mxu1 %v407_v50  ;;  %863 = vmatpush.msra.mxu2 %v422_v51  ;;  %v254_v23 = vld [vmem:[%s1688_s20 + $0xe8] sm:$0xff]  ;;  %v260_v24 = vld [vmem:[%s1688_s20 + $0x118] sm:$0xff]  ;;  %v259_v25 = vld [vmem:[%s1688_s20 + $0x110] sm:$0xff] }
  0x29   : > { %583 = vmatpush.msra.mxu0 %v390_v52  ;;  %v257_v26 = vld [vmem:[%s1688_s20 + $0x100] sm:$0xff]  ;;  %v258_v27 = vld [vmem:[%s1688_s20 + $0x108] sm:$0xff]  ;;  %v264_v28 = vld [vmem:[%s1688_s20 + $0x138] sm:$0xff] }
  0x2a   : > { %723 = vmatpush.msra.mxu1 %v406_v53  ;;  %864 = vmatpush.msra.mxu2 %v421_v54  ;;  %v263_v29 = vld [vmem:[%s1688_s20 + $0x130] sm:$0xff]  ;;  %v261_v30 = vld [vmem:[%s1688_s20 + $0x120] sm:$0xff]  ;;  %v262_v31 = vld [vmem:[%s1688_s20 + $0x128] sm:$0xff] }
  0x2b   : > { %584 = vmatpush.msra.mxu0 %v389_v55  ;;  %865 = vmatmul.f32.vlgmr.msra.gmra.mxu2 %v227_v56  ;;  %v268_v32 = vld [vmem:[%s1688_s20 + $0x158] sm:$0xff]  ;;  %v267_v33 = vld [vmem:[%s1688_s20 + $0x150] sm:$0xff]  ;;  %v265_v34 = vld [vmem:[%s1688_s20 + $0x140] sm:$0xff] }
  0x2c   : > { %724 = vmatpush.msra.mxu1 %v405_v57  ;;  %585 = vmatmul.f32.vlgmr.msra.gmra.mxu0 %v225_v58  ;;  %v266_v35 = vld [vmem:[%s1688_s20 + $0x148] sm:$0xff]  ;;  %v272_v36 = vld [vmem:[%s1688_s20 + $0x178] sm:$0xff]  ;;  %v271_v37 = vld [vmem:[%s1688_s20 + $0x170] sm:$0xff] }
  0x2d   : > { %725 = vmatmul.f32.vlgmr.msra.gmra.mxu1 %v226_v59  ;;  %1439 = vmatmul.msk.f32.gmra.mxu3 %vm445_vm0, %v232_v60  ;;  %v269_v38 = vld [vmem:[%s1688_s20 + $0x160] sm:$0xff]  ;;  %v270_v39 = vld [vmem:[%s1688_s20 + $0x168] sm:$0xff]  ;;  %v276_v40 = vld [vmem:[%s1688_s20 + $0x198] sm:$0xff] }
  0x2e   : > { %v275_v41 = vld [vmem:[%s1688_s20 + $0x190] sm:$0xff]  ;;  %v273_v42 = vld [vmem:[%s1688_s20 + $0x180] sm:$0xff]  ;;  %v274_v43 = vld [vmem:[%s1688_s20 + $0x188] sm:$0xff] }
  0x2f   : > { %v280_v44 = vld [vmem:[%s1688_s20 + $0x1b8] sm:$0xff]  ;;  %v279_v45 = vld [vmem:[%s1688_s20 + $0x1b0] sm:$0xff]  ;;  %v277_v46 = vld [vmem:[%s1688_s20 + $0x1a0] sm:$0xff] }
  0x30   : > { %v278_v47 = vld [vmem:[%s1688_s20 + $0x1a8] sm:$0xff]  ;;  %v284_v48 = vld [vmem:[%s1688_s20 + $0x1d8] sm:$0xff]  ;;  %v283_v49 = vld [vmem:[%s1688_s20 + $0x1d0] sm:$0xff] }
  0x31   : > { %v281_v50 = vld [vmem:[%s1688_s20 + $0x1c0] sm:$0xff]  ;;  %v282_v51 = vld [vmem:[%s1688_s20 + $0x1c8] sm:$0xff]  ;;  %v288_v52 = vld [vmem:[%s1688_s20 + $0x1f8] sm:$0xff] }
  0x32   : > { %v287_v53 = vld [vmem:[%s1688_s20 + $0x1f0] sm:$0xff]  ;;  %v285_v54 = vld [vmem:[%s1688_s20 + $0x1e0] sm:$0xff]  ;;  %v286_v55 = vld [vmem:[%s1688_s20 + $0x1e8] sm:$0xff] }
  0x33   : > { %868 = vmatmul.f32.gmra.mxu2 %v231_v61  ;;  %v292_v56 = vld [vmem:[%s1688_s20 + $0x218] sm:$0xff]  ;;  %v291_v57 = vld [vmem:[%s1688_s20 + $0x210] sm:$0xff]  ;;  %v289_v61 = vld [vmem:[%s1688_s20 + $0x200] sm:$0xff] }
  0x34   : > { %588 = vmatmul.f32.gmra.mxu0 %v229_v62  ;;  %v290_v62 = vld [vmem:[%s1688_s20 + $0x208] sm:$0xff] }
  0x35   : > { %728 = vmatmul.f32.gmra.mxu1 %v230_v63  ;;  %1440 = vmatmul.msk.f32.gmra.mxu3 %vm445_vm0, %v236_v0  ;;  %v296_v63 = vld [vmem:[%s1688_s20 + $0x238] sm:$0xff] }
  0x3b   : > { %871 = vmatmul.f32.gmra.mxu2 %v235_v1 }
  0x3c   : > { %591 = vmatmul.f32.gmra.mxu0 %v233_v2 }
  0x3d   : > { %731 = vmatmul.f32.gmra.mxu1 %v234_v3  ;;  %1441 = vmatmul.msk.f32.gmra.mxu3 %vm445_vm0, %v240_v4  ;;  %v295_v3 = vld [vmem:[%s1688_s20 + $0x230] sm:$0xff] }
  0x43   : > { %874 = vmatmul.f32.gmra.mxu2 %v239_v5 }
  0x44   : > { %594 = vmatmul.f32.gmra.mxu0 %v237_v6 }
  0x45   : > { %734 = vmatmul.f32.gmra.mxu1 %v238_v7  ;;  %1442 = vmatmul.msk.f32.gmra.mxu3 %vm445_vm0, %v244_v8  ;;  %v293_v8 = vld [vmem:[%s1688_s20 + $0x220] sm:$0xff] }
  0x4b   : > { %877 = vmatmul.f32.gmra.mxu2 %v243_v9  ;;  %v294_v9 = vld [vmem:[%s1688_s20 + $0x228] sm:$0xff] }
  0x4c   : > { %597 = vmatmul.f32.gmra.mxu0 %v241_v10  ;;  %v300_v10 = vld [vmem:[%s1688_s20 + $0x258] sm:$0xff] }
  0x4d   : > { %737 = vmatmul.f32.gmra.mxu1 %v242_v11  ;;  %1443 = vmatmul.msk.f32.gmra.mxu3 %vm445_vm0, %v248_v12 }
  0x53   : > { %880 = vmatmul.f32.gmra.mxu2 %v247_v13 }
  0x54   : > { %600 = vmatmul.f32.gmra.mxu0 %v245_v14  ;;  %v299_v14 = vld [vmem:[%s1688_s20 + $0x250] sm:$0xff] }
  0x55   : > { %740 = vmatmul.f32.gmra.mxu1 %v246_v15  ;;  %1444 = vmatmul.msk.f32.gmra.mxu3 %vm445_vm0, %v252_v16 }
  0x5b   : > { %883 = vmatmul.f32.gmra.mxu2 %v251_v17 }
  0x5c   : > { %603 = vmatmul.f32.gmra.mxu0 %v249_v18 }
  0x5d   : > { %743 = vmatmul.f32.gmra.mxu1 %v250_v19  ;;  %1445 = vmatmul.msk.f32.gmra.mxu3 %vm445_vm0, %v256_v20  ;;  %v297_v19 = vld [vmem:[%s1688_s20 + $0x240] sm:$0xff]  ;;  %v298_v20 = vld [vmem:[%s1688_s20 + $0x248] sm:$0xff] }
  0x63   : > { %886 = vmatmul.f32.gmra.mxu2 %v255_v21 }
  0x64   : > { %606 = vmatmul.f32.gmra.mxu0 %v253_v22  ;;  %v304_v22 = vld [vmem:[%s1688_s20 + $0x278] sm:$0xff] }
  0x65   : > { %746 = vmatmul.f32.gmra.mxu1 %v254_v23  ;;  %1446 = vmatmul.msk.f32.gmra.mxu3 %vm445_vm0, %v260_v24 }
  0x6b   : > { %889 = vmatmul.f32.gmra.mxu2 %v259_v25 }
  0x6c   : > { %609 = vmatmul.f32.gmra.mxu0 %v257_v26 }
  0x6d   : > { %749 = vmatmul.f32.gmra.mxu1 %v258_v27  ;;  %1447 = vmatmul.msk.f32.gmra.mxu3 %vm445_vm0, %v264_v28 }
  0x73   : > { %892 = vmatmul.f32.gmra.mxu2 %v263_v29  ;;  %v303_v29 = vld [vmem:[%s1688_s20 + $0x270] sm:$0xff] }
  0x74   : > { %612 = vmatmul.f32.gmra.mxu0 %v261_v30 }
  0x75   : > { %752 = vmatmul.f32.gmra.mxu1 %v262_v31  ;;  %1448 = vmatmul.msk.f32.gmra.mxu3 %vm445_vm0, %v268_v32 }
  0x7b   : > { %895 = vmatmul.f32.gmra.mxu2 %v267_v33 }
  0x7c   : > { %615 = vmatmul.f32.gmra.mxu0 %v265_v34  ;;  %v301_v34 = vld [vmem:[%s1688_s20 + $0x260] sm:$0xff] }
  0x7d   : > { %755 = vmatmul.f32.gmra.mxu1 %v266_v35  ;;  %1449 = vmatmul.msk.f32.gmra.mxu3 %vm445_vm0, %v272_v36  ;;  %v302_v35 = vld [vmem:[%s1688_s20 + $0x268] sm:$0xff]  ;;  %v308_v36 = vld [vmem:[%s1688_s20 + $0x298] sm:$0xff] }
  0x83   : > { %898 = vmatmul.f32.gmra.mxu2 %v271_v37 }
  0x84   : > { %618 = vmatmul.f32.gmra.mxu0 %v269_v38 }
  0x85   : > { %758 = vmatmul.f32.gmra.mxu1 %v270_v39  ;;  %1450 = vmatmul.msk.f32.gmra.mxu3 %vm445_vm0, %v276_v40 }
  0x8b   : > { %901 = vmatmul.f32.gmra.mxu2 %v275_v41 }
  0x8c   : > { %621 = vmatmul.f32.gmra.mxu0 %v273_v42 }
  0x8d   : > { %761 = vmatmul.f32.gmra.mxu1 %v274_v43  ;;  %1451 = vmatmul.msk.f32.gmra.mxu3 %vm445_vm0, %v280_v44  ;;  %v307_v43 = vld [vmem:[%s1688_s20 + $0x290] sm:$0xff] }
  0x93   : > { %904 = vmatmul.f32.gmra.mxu2 %v279_v45 }
  0x94   : > { %624 = vmatmul.f32.gmra.mxu0 %v277_v46 }
  0x95   : > { %764 = vmatmul.f32.gmra.mxu1 %v278_v47  ;;  %1452 = vmatmul.msk.f32.gmra.mxu3 %vm445_vm0, %v284_v48  ;;  %v305_v48 = vld [vmem:[%s1688_s20 + $0x280] sm:$0xff] }
  0x9b   : > { %907 = vmatmul.f32.gmra.mxu2 %v283_v49  ;;  %v306_v49 = vld [vmem:[%s1688_s20 + $0x288] sm:$0xff] }
  0x9c   : > { %627 = vmatmul.f32.gmra.mxu0 %v281_v50  ;;  %v312_v50 = vld [vmem:[%s1688_s20 + $0x2b8] sm:$0xff] }
  0x9d   : > { %767 = vmatmul.f32.gmra.mxu1 %v282_v51  ;;  %1453 = vmatmul.msk.f32.gmra.mxu3 %vm445_vm0, %v288_v52 }
  0xa3   : > { %910 = vmatmul.f32.gmra.mxu2 %v287_v53 }
  0xa4   : > { %630 = vmatmul.f32.gmra.mxu0 %v285_v54 }
  0xa5   : > { %770 = vmatmul.f32.gmra.mxu1 %v286_v55  ;;  %1454 = vmatmul.msk.f32.gmra.mxu3 %vm445_vm0, %v292_v56 }
  0xa6   : > { %v1006_v58 = vpop.f32.mrf.mxu3 }
  0xa9   : > { %v586_v59 = vpop.f32.mrf.mxu0 }
  0xaa   : > { %v726_v60 = vpop.f32.mrf.mxu1 }
  0xab   : > { %913 = vmatmul.f32.gmra.mxu2 %v291_v57  ;;  %v727_v0 = vadd.f32 %v726_v60, %v586_v59  ;;  %v311_v57 = vld [vmem:[%s1688_s20 + $0x2b0] sm:$0xff] }
  0xac   : > { %633 = vmatmul.f32.gmra.mxu0 %v289_v61 }
  0xad   : > { %773 = vmatmul.f32.gmra.mxu1 %v290_v62  ;;  %1455 = vmatmul.msk.f32.gmra.mxu3 %vm445_vm0, %v296_v63  ;;  %v309_v62 = vld [vmem:[%s1688_s20 + $0x2a0] sm:$0xff]  ;;  %v310_v63 = vld [vmem:[%s1688_s20 + $0x2a8] sm:$0xff] }
  0xae   : > { %v866_v1 = vpop.f32.mrf.mxu2 }
  0xaf   : > { %v867_v2 = vadd.f32 %v866_v1, %v727_v0  ;;  %v316_v0 = vld [vmem:[%s1688_s20 + $0x2d8] sm:$0xff] }
  0xb0   : > { %v1009_v4 = vpop.f32.mrf.mxu3 }
  0xb1   : > { %v1007_v5 = vadd.f32 %v1006_v58, %v867_v2  ;;  %v589_v6 = vpop.f32.mrf.mxu0 }
  0xb2   : > { %v729_v7 = vpop.f32.mrf.mxu1 }
  0xb3   : > { %1129 = vst [vmem:[%s1811_s22] sm:$0xff] %v1007_v5  ;;  %916 = vmatmul.f32.gmra.mxu2 %v295_v3  ;;  %v730_v11 = vadd.f32 %v729_v7, %v589_v6  ;;  %v1216_v21 = vmul.f32 %v1007_v5, %v1007_v5  ;;  %v315_v7 = vld [vmem:[%s1688_s20 + $0x2d0] sm:$0xff] }
  0xb4   : > { %636 = vmatmul.f32.gmra.mxu0 %v293_v8 }
  0xb5   : > { %776 = vmatmul.f32.gmra.mxu1 %v294_v9  ;;  %1456 = vmatmul.msk.f32.gmra.mxu3 %vm445_vm0, %v300_v10 }
  0xb6   : > { %v869_v12 = vpop.f32.mrf.mxu2 }
  0xb7   : > { %v870_v13 = vadd.f32 %v869_v12, %v730_v11  ;;  %v313_v12 = vld [vmem:[%s1688_s20 + $0x2c0] sm:$0xff] }
  0xb8   : > { %v1012_v15 = vpop.f32.mrf.mxu3 }
  0xb9   : > { %v1010_v16 = vadd.f32 %v1009_v4, %v870_v13  ;;  %v592_v17 = vpop.f32.mrf.mxu0  ;;  %v314_v13 = vld [vmem:[%s1688_s20 + $0x2c8] sm:$0xff] }
  0xba   : > { %v732_v18 = vpop.f32.mrf.mxu1 }
  0xbb   : > { %1130 = vst [vmem:[%s1811_s22 + $0x8] sm:$0xff] %v1010_v16  ;;  %v1170_v23 = vadd.f32 %v1010_v16, %v1007_v5  ;;  %v1217_v24 = vmul.f32 %v1010_v16, %v1010_v16  ;;  %919 = vmatmul.f32.gmra.mxu2 %v299_v14  ;;  %v733_v25 = vadd.f32 %v732_v18, %v592_v17  ;;  %v320_v14 = vld [vmem:[%s1688_s20 + $0x2f8] sm:$0xff] }
  0xbc   : > { %639 = vmatmul.f32.gmra.mxu0 %v297_v19 }
  0xbd   : > { %779 = vmatmul.f32.gmra.mxu1 %v298_v20  ;;  %v1257_v26 = vadd.f32 %v1217_v24, %v1216_v21  ;;  %1457 = vmatmul.msk.f32.gmra.mxu3 %vm445_vm0, %v304_v22  ;;  %v319_v21 = vld [vmem:[%s1688_s20 + $0x2f0] sm:$0xff] }
  0xbe   : > { %v872_v27 = vpop.f32.mrf.mxu2 }
  0xbf   : > { %v873_v28 = vadd.f32 %v872_v27, %v733_v25  ;;  %v318_v27 = vld [vmem:[%s1688_s20 + $0x2e8] sm:$0xff] }
  0xc0   : > { %v1015_v30 = vpop.f32.mrf.mxu3 }
  0xc1   : > { %v1013_v31 = vadd.f32 %v1012_v15, %v873_v28  ;;  %v595_v32 = vpop.f32.mrf.mxu0  ;;  %v324_v28 = vld [vmem:[%s1688_s20 + $0x318] sm:$0xff] }
  0xc2   : > { %v735_v33 = vpop.f32.mrf.mxu1 }
  0xc3   : > { %1131 = vst [vmem:[%s1811_s22 + $0x10] sm:$0xff] %v1013_v31  ;;  %v1171_v37 = vadd.f32 %v1170_v23, %v1013_v31  ;;  %v1218_v38 = vmul.f32 %v1013_v31, %v1013_v31  ;;  %922 = vmatmul.f32.gmra.mxu2 %v303_v29  ;;  %v736_v39 = vadd.f32 %v735_v33, %v595_v32 }
  0xc4   : > { %642 = vmatmul.f32.gmra.mxu0 %v301_v34 }
  0xc5   : > { %782 = vmatmul.f32.gmra.mxu1 %v302_v35  ;;  %v1258_v40 = vadd.f32 %v1257_v26, %v1218_v38  ;;  %1458 = vmatmul.msk.f32.gmra.mxu3 %vm445_vm0, %v308_v36  ;;  %v317_v26 = vld [vmem:[%s1688_s20 + $0x2e0] sm:$0xff]  ;;  %v323_v35 = vld [vmem:[%s1688_s20 + $0x310] sm:$0xff] }
  0xc6   : > { %v875_v41 = vpop.f32.mrf.mxu2 }
  0xc7   : > { %v876_v42 = vadd.f32 %v875_v41, %v736_v39  ;;  %v322_v41 = vld [vmem:[%s1688_s20 + $0x308] sm:$0xff] }
  0xc8   : > { %v1018_v44 = vpop.f32.mrf.mxu3 }
  0xc9   : > { %v1016_v45 = vadd.f32 %v1015_v30, %v876_v42  ;;  %v598_v46 = vpop.f32.mrf.mxu0  ;;  %v328_v42 = vld [vmem:[%s1688_s20 + $0x338] sm:$0xff] }
  0xca   : > { %v738_v47 = vpop.f32.mrf.mxu1 }
  0xcb   : > { %1132 = vst [vmem:[%s1811_s22 + $0x18] sm:$0xff] %v1016_v45  ;;  %v1172_v51 = vadd.f32 %v1171_v37, %v1016_v45  ;;  %v1219_v52 = vmul.f32 %v1016_v45, %v1016_v45  ;;  %925 = vmatmul.f32.gmra.mxu2 %v307_v43  ;;  %v739_v53 = vadd.f32 %v738_v47, %v598_v46 }
  0xcc   : > { %645 = vmatmul.f32.gmra.mxu0 %v305_v48 }
  0xcd   : > { %785 = vmatmul.f32.gmra.mxu1 %v306_v49  ;;  %v1259_v54 = vadd.f32 %v1258_v40, %v1219_v52  ;;  %1459 = vmatmul.msk.f32.gmra.mxu3 %vm445_vm0, %v312_v50  ;;  %v321_v40 = vld [vmem:[%s1688_s20 + $0x300] sm:$0xff]  ;;  %v327_v49 = vld [vmem:[%s1688_s20 + $0x330] sm:$0xff] }
  0xce   : > { %v878_v55 = vpop.f32.mrf.mxu2 }
  0xcf   : > { %v879_v56 = vadd.f32 %v878_v55, %v739_v53  ;;  %v326_v55 = vld [vmem:[%s1688_s20 + $0x328] sm:$0xff] }
  0xd0   : > { %v1021_v58 = vpop.f32.mrf.mxu3 }
  0xd1   : > { %v1019_v59 = vadd.f32 %v1018_v44, %v879_v56  ;;  %v601_v60 = vpop.f32.mrf.mxu0  ;;  %v332_v56 = vld [vmem:[%s1688_s20 + $0x358] sm:$0xff] }
  0xd2   : > { %v741_v61 = vpop.f32.mrf.mxu1 }
  0xd3   : > { %1133 = vst [vmem:[%s1811_s22 + $0x20] sm:$0xff] %v1019_v59  ;;  %v1173_v1 = vadd.f32 %v1172_v51, %v1019_v59  ;;  %v1220_v2 = vmul.f32 %v1019_v59, %v1019_v59  ;;  %928 = vmatmul.f32.gmra.mxu2 %v311_v57  ;;  %v742_v3 = vadd.f32 %v741_v61, %v601_v60 }
  0xd4   : > { %648 = vmatmul.f32.gmra.mxu0 %v309_v62 }
  0xd5   : > { %788 = vmatmul.f32.gmra.mxu1 %v310_v63  ;;  %v1260_v4 = vadd.f32 %v1259_v54, %v1220_v2  ;;  %1460 = vmatmul.msk.f32.gmra.mxu3 %vm445_vm0, %v316_v0  ;;  %v325_v54 = vld [vmem:[%s1688_s20 + $0x320] sm:$0xff]  ;;  %v331_v63 = vld [vmem:[%s1688_s20 + $0x350] sm:$0xff] }
  0xd6   : > { %v881_v5 = vpop.f32.mrf.mxu2 }
  0xd7   : > { %v882_v6 = vadd.f32 %v881_v5, %v742_v3  ;;  %v330_v5 = vld [vmem:[%s1688_s20 + $0x348] sm:$0xff] }
  0xd8   : > { %v1024_v8 = vpop.f32.mrf.mxu3 }
  0xd9   : > { %v1022_v9 = vadd.f32 %v1021_v58, %v882_v6  ;;  %v604_v10 = vpop.f32.mrf.mxu0  ;;  %v336_v6 = vld [vmem:[%s1688_s20 + $0x378] sm:$0xff] }
  0xda   : > { %v744_v11 = vpop.f32.mrf.mxu1 }
  0xdb   : > { %1134 = vst [vmem:[%s1811_s22 + $0x28] sm:$0xff] %v1022_v9  ;;  %v1174_v15 = vadd.f32 %v1173_v1, %v1022_v9  ;;  %v1221_v16 = vmul.f32 %v1022_v9, %v1022_v9  ;;  %931 = vmatmul.f32.gmra.mxu2 %v315_v7  ;;  %v745_v17 = vadd.f32 %v744_v11, %v604_v10 }
  0xdc   : > { %651 = vmatmul.f32.gmra.mxu0 %v313_v12 }
  0xdd   : > { %791 = vmatmul.f32.gmra.mxu1 %v314_v13  ;;  %v1261_v18 = vadd.f32 %v1260_v4, %v1221_v16  ;;  %1461 = vmatmul.msk.f32.gmra.mxu3 %vm445_vm0, %v320_v14  ;;  %v329_v4 = vld [vmem:[%s1688_s20 + $0x340] sm:$0xff]  ;;  %v335_v13 = vld [vmem:[%s1688_s20 + $0x370] sm:$0xff] }
  0xde   : > { %v884_v19 = vpop.f32.mrf.mxu2 }
  0xdf   : > { %v885_v20 = vadd.f32 %v884_v19, %v745_v17  ;;  %v334_v19 = vld [vmem:[%s1688_s20 + $0x368] sm:$0xff] }
  0xe0   : > { %v1027_v22 = vpop.f32.mrf.mxu3 }
  0xe1   : > { %v1025_v23 = vadd.f32 %v1024_v8, %v885_v20  ;;  %v607_v24 = vpop.f32.mrf.mxu0  ;;  %v340_v20 = vld [vmem:[%s1688_s20 + $0x398] sm:$0xff] }
  0xe2   : > { %v747_v25 = vpop.f32.mrf.mxu1 }
  0xe3   : > { %1135 = vst [vmem:[%s1811_s22 + $0x30] sm:$0xff] %v1025_v23  ;;  %v1175_v29 = vadd.f32 %v1174_v15, %v1025_v23  ;;  %v1222_v30 = vmul.f32 %v1025_v23, %v1025_v23  ;;  %934 = vmatmul.f32.gmra.mxu2 %v319_v21  ;;  %v748_v31 = vadd.f32 %v747_v25, %v607_v24 }
  0xe4   : > { %654 = vmatmul.f32.gmra.mxu0 %v317_v26 }
  0xe5   : > { %794 = vmatmul.f32.gmra.mxu1 %v318_v27  ;;  %v1262_v32 = vadd.f32 %v1261_v18, %v1222_v30  ;;  %1462 = vmatmul.msk.f32.gmra.mxu3 %vm445_vm0, %v324_v28  ;;  %v333_v18 = vld [vmem:[%s1688_s20 + $0x360] sm:$0xff]  ;;  %v339_v27 = vld [vmem:[%s1688_s20 + $0x390] sm:$0xff] }
  0xe6   : > { %v887_v33 = vpop.f32.mrf.mxu2 }
  0xe7   : > { %v888_v34 = vadd.f32 %v887_v33, %v748_v31  ;;  %v338_v33 = vld [vmem:[%s1688_s20 + $0x388] sm:$0xff] }
  0xe8   : > { %v1030_v36 = vpop.f32.mrf.mxu3 }
  0xe9   : > { %v1028_v37 = vadd.f32 %v1027_v22, %v888_v34  ;;  %v610_v38 = vpop.f32.mrf.mxu0  ;;  %v344_v34 = vld [vmem:[%s1688_s20 + $0x3b8] sm:$0xff] }
  0xea   : > { %v750_v39 = vpop.f32.mrf.mxu1 }
  0xeb   : > { %1136 = vst [vmem:[%s1811_s22 + $0x38] sm:$0xff] %v1028_v37  ;;  %v1176_v43 = vadd.f32 %v1175_v29, %v1028_v37  ;;  %v1223_v44 = vmul.f32 %v1028_v37, %v1028_v37  ;;  %937 = vmatmul.f32.gmra.mxu2 %v323_v35  ;;  %v751_v45 = vadd.f32 %v750_v39, %v610_v38 }
  0xec   : > { %657 = vmatmul.f32.gmra.mxu0 %v321_v40 }
  0xed   : > { %797 = vmatmul.f32.gmra.mxu1 %v322_v41  ;;  %v1263_v46 = vadd.f32 %v1262_v32, %v1223_v44  ;;  %1463 = vmatmul.msk.f32.gmra.mxu3 %vm445_vm0, %v328_v42  ;;  %v337_v32 = vld [vmem:[%s1688_s20 + $0x380] sm:$0xff]  ;;  %v343_v41 = vld [vmem:[%s1688_s20 + $0x3b0] sm:$0xff] }
  0xee   : > { %v890_v47 = vpop.f32.mrf.mxu2 }
  0xef   : > { %v891_v48 = vadd.f32 %v890_v47, %v751_v45  ;;  %v342_v47 = vld [vmem:[%s1688_s20 + $0x3a8] sm:$0xff] }
  0xf0   : > { %v1033_v50 = vpop.f32.mrf.mxu3 }
  0xf1   : > { %v1031_v51 = vadd.f32 %v1030_v36, %v891_v48  ;;  %v613_v52 = vpop.f32.mrf.mxu0  ;;  %v348_v48 = vld [vmem:[%s1688_s20 + $0x3d8] sm:$0xff] }
  0xf2   : > { %v753_v53 = vpop.f32.mrf.mxu1 }
  0xf3   : > { %1137 = vst [vmem:[%s1811_s22 + $0x40] sm:$0xff] %v1031_v51  ;;  %v1177_v57 = vadd.f32 %v1176_v43, %v1031_v51  ;;  %v1224_v58 = vmul.f32 %v1031_v51, %v1031_v51  ;;  %940 = vmatmul.f32.gmra.mxu2 %v327_v49  ;;  %v754_v59 = vadd.f32 %v753_v53, %v613_v52 }
  0xf4   : > { %660 = vmatmul.f32.gmra.mxu0 %v325_v54 }
  0xf5   : > { %800 = vmatmul.f32.gmra.mxu1 %v326_v55  ;;  %v1264_v60 = vadd.f32 %v1263_v46, %v1224_v58  ;;  %1464 = vmatmul.msk.f32.gmra.mxu3 %vm445_vm0, %v332_v56  ;;  %v341_v46 = vld [vmem:[%s1688_s20 + $0x3a0] sm:$0xff]  ;;  %v347_v55 = vld [vmem:[%s1688_s20 + $0x3d0] sm:$0xff] }
  0xf6   : > { %v893_v61 = vpop.f32.mrf.mxu2 }
  0xf7   : > { %v894_v62 = vadd.f32 %v893_v61, %v754_v59  ;;  %v346_v61 = vld [vmem:[%s1688_s20 + $0x3c8] sm:$0xff] }
  0xf8   : > { %v1036_v0 = vpop.f32.mrf.mxu3 }
  0xf9   : > { %v1034_v1 = vadd.f32 %v1033_v50, %v894_v62  ;;  %v616_v2 = vpop.f32.mrf.mxu0  ;;  %v352_v62 = vld [vmem:[%s1688_s20 + $0x3f8] sm:$0xff] }
  0xfa   : > { %v756_v3 = vpop.f32.mrf.mxu1 }
  0xfb   : > { %1138 = vst [vmem:[%s1811_s22 + $0x48] sm:$0xff] %v1034_v1  ;;  %v1178_v7 = vadd.f32 %v1177_v57, %v1034_v1  ;;  %v1225_v8 = vmul.f32 %v1034_v1, %v1034_v1  ;;  %943 = vmatmul.f32.gmra.mxu2 %v331_v63  ;;  %v757_v9 = vadd.f32 %v756_v3, %v616_v2 }
  0xfc   : > { %663 = vmatmul.f32.gmra.mxu0 %v329_v4 }
  0xfd   : > { %803 = vmatmul.f32.gmra.mxu1 %v330_v5  ;;  %v1265_v10 = vadd.f32 %v1264_v60, %v1225_v8  ;;  %1465 = vmatmul.msk.f32.gmra.mxu3 %vm445_vm0, %v336_v6  ;;  %v345_v60 = vld [vmem:[%s1688_s20 + $0x3c0] sm:$0xff]  ;;  %v351_v5 = vld [vmem:[%s1688_s20 + $0x3f0] sm:$0xff] }
  0xfe   : > { %v896_v11 = vpop.f32.mrf.mxu2 }
  0xff   : > { %v897_v12 = vadd.f32 %v896_v11, %v757_v9  ;;  %v350_v11 = vld [vmem:[%s1688_s20 + $0x3e8] sm:$0xff] }
 0x100   : > { %v1039_v14 = vpop.f32.mrf.mxu3 }
 0x101   : > { %v1037_v15 = vadd.f32 %v1036_v0, %v897_v12  ;;  %v619_v16 = vpop.f32.mrf.mxu0  ;;  %v356_v12 = vld [vmem:[%s1688_s20 + $0x418] sm:$0xff] }
 0x102   : > { %v759_v17 = vpop.f32.mrf.mxu1 }
 0x103   : > { %1139 = vst [vmem:[%s1811_s22 + $0x50] sm:$0xff] %v1037_v15  ;;  %v1179_v21 = vadd.f32 %v1178_v7, %v1037_v15  ;;  %v1226_v22 = vmul.f32 %v1037_v15, %v1037_v15  ;;  %946 = vmatmul.f32.gmra.mxu2 %v335_v13  ;;  %v760_v23 = vadd.f32 %v759_v17, %v619_v16 }
 0x104   : > { %666 = vmatmul.f32.gmra.mxu0 %v333_v18 }
 0x105   : > { %806 = vmatmul.f32.gmra.mxu1 %v334_v19  ;;  %v1266_v24 = vadd.f32 %v1265_v10, %v1226_v22  ;;  %1466 = vmatmul.msk.f32.gmra.mxu3 %vm445_vm0, %v340_v20  ;;  %v349_v10 = vld [vmem:[%s1688_s20 + $0x3e0] sm:$0xff]  ;;  %v355_v19 = vld [vmem:[%s1688_s20 + $0x410] sm:$0xff] }
 0x106   : > { %v899_v25 = vpop.f32.mrf.mxu2 }
 0x107   : > { %v900_v26 = vadd.f32 %v899_v25, %v760_v23  ;;  %v354_v25 = vld [vmem:[%s1688_s20 + $0x408] sm:$0xff] }
 0x108   : > { %v1042_v28 = vpop.f32.mrf.mxu3 }
 0x109   : > { %v1040_v29 = vadd.f32 %v1039_v14, %v900_v26  ;;  %v622_v30 = vpop.f32.mrf.mxu0  ;;  %v360_v26 = vld [vmem:[%s1688_s20 + $0x438] sm:$0xff] }
 0x10a   : > { %v762_v31 = vpop.f32.mrf.mxu1 }
 0x10b   : > { %1140 = vst [vmem:[%s1811_s22 + $0x58] sm:$0xff] %v1040_v29  ;;  %v1180_v35 = vadd.f32 %v1179_v21, %v1040_v29  ;;  %v1227_v36 = vmul.f32 %v1040_v29, %v1040_v29  ;;  %949 = vmatmul.f32.gmra.mxu2 %v339_v27  ;;  %v763_v37 = vadd.f32 %v762_v31, %v622_v30 }
 0x10c   : > { %669 = vmatmul.f32.gmra.mxu0 %v337_v32 }
 0x10d   : > { %809 = vmatmul.f32.gmra.mxu1 %v338_v33  ;;  %v1267_v38 = vadd.f32 %v1266_v24, %v1227_v36  ;;  %1467 = vmatmul.msk.f32.gmra.mxu3 %vm445_vm0, %v344_v34  ;;  %v353_v24 = vld [vmem:[%s1688_s20 + $0x400] sm:$0xff]  ;;  %v359_v33 = vld [vmem:[%s1688_s20 + $0x430] sm:$0xff] }
 0x10e   : > { %v902_v39 = vpop.f32.mrf.mxu2 }
 0x10f   : > { %v903_v40 = vadd.f32 %v902_v39, %v763_v37  ;;  %v358_v39 = vld [vmem:[%s1688_s20 + $0x428] sm:$0xff] }
 0x110   : > { %v1045_v42 = vpop.f32.mrf.mxu3 }
 0x111   : > { %v1043_v43 = vadd.f32 %v1042_v28, %v903_v40  ;;  %v625_v44 = vpop.f32.mrf.mxu0  ;;  %v364_v40 = vld [vmem:[%s1688_s20 + $0x458] sm:$0xff] }
 0x112   : > { %v765_v45 = vpop.f32.mrf.mxu1 }
 0x113   : > { %1141 = vst [vmem:[%s1811_s22 + $0x60] sm:$0xff] %v1043_v43  ;;  %v1181_v49 = vadd.f32 %v1180_v35, %v1043_v43  ;;  %v1228_v50 = vmul.f32 %v1043_v43, %v1043_v43  ;;  %952 = vmatmul.f32.gmra.mxu2 %v343_v41  ;;  %v766_v51 = vadd.f32 %v765_v45, %v625_v44 }
 0x114   : > { %672 = vmatmul.f32.gmra.mxu0 %v341_v46 }
 0x115   : > { %812 = vmatmul.f32.gmra.mxu1 %v342_v47  ;;  %v1268_v52 = vadd.f32 %v1267_v38, %v1228_v50  ;;  %1468 = vmatmul.msk.f32.gmra.mxu3 %vm445_vm0, %v348_v48  ;;  %v357_v38 = vld [vmem:[%s1688_s20 + $0x420] sm:$0xff]  ;;  %v363_v47 = vld [vmem:[%s1688_s20 + $0x450] sm:$0xff] }
 0x116   : > { %v905_v53 = vpop.f32.mrf.mxu2 }
 0x117   : > { %v906_v54 = vadd.f32 %v905_v53, %v766_v51  ;;  %v362_v53 = vld [vmem:[%s1688_s20 + $0x448] sm:$0xff] }
 0x118   : > { %v1048_v56 = vpop.f32.mrf.mxu3 }
 0x119   : > { %v1046_v57 = vadd.f32 %v1045_v42, %v906_v54  ;;  %v628_v58 = vpop.f32.mrf.mxu0  ;;  %v368_v54 = vld [vmem:[%s1688_s20 + $0x478] sm:$0xff] }
 0x11a   : > { %v768_v59 = vpop.f32.mrf.mxu1 }
 0x11b   : > { %1142 = vst [vmem:[%s1811_s22 + $0x68] sm:$0xff] %v1046_v57  ;;  %v1182_v63 = vadd.f32 %v1181_v49, %v1046_v57  ;;  %v1229_v0 = vmul.f32 %v1046_v57, %v1046_v57  ;;  %955 = vmatmul.f32.gmra.mxu2 %v347_v55  ;;  %v769_v1 = vadd.f32 %v768_v59, %v628_v58 }
 0x11c   : > { %675 = vmatmul.f32.gmra.mxu0 %v345_v60 }
 0x11d   : > { %815 = vmatmul.f32.gmra.mxu1 %v346_v61  ;;  %v1269_v2 = vadd.f32 %v1268_v52, %v1229_v0  ;;  %1469 = vmatmul.msk.f32.gmra.mxu3 %vm445_vm0, %v352_v62  ;;  %v361_v52 = vld [vmem:[%s1688_s20 + $0x440] sm:$0xff]  ;;  %v367_v61 = vld [vmem:[%s1688_s20 + $0x470] sm:$0xff] }
 0x11e   : > { %v908_v3 = vpop.f32.mrf.mxu2 }
 0x11f   : > { %v909_v4 = vadd.f32 %v908_v3, %v769_v1  ;;  %v366_v3 = vld [vmem:[%s1688_s20 + $0x468] sm:$0xff] }
 0x120   : > { %v1051_v6 = vpop.f32.mrf.mxu3 }
 0x121   : > { %v1049_v7 = vadd.f32 %v1048_v56, %v909_v4  ;;  %v631_v8 = vpop.f32.mrf.mxu0  ;;  %v372_v4 = vld [vmem:[%s1688_s20 + $0x498] sm:$0xff] }
 0x122   : > { %v771_v9 = vpop.f32.mrf.mxu1 }
 0x123   : > { %1143 = vst [vmem:[%s1811_s22 + $0x70] sm:$0xff] %v1049_v7  ;;  %v1183_v13 = vadd.f32 %v1182_v63, %v1049_v7  ;;  %v1230_v14 = vmul.f32 %v1049_v7, %v1049_v7  ;;  %958 = vmatmul.f32.gmra.mxu2 %v351_v5  ;;  %v772_v15 = vadd.f32 %v771_v9, %v631_v8 }
 0x124   : > { %678 = vmatmul.f32.gmra.mxu0 %v349_v10 }
 0x125   : > { %818 = vmatmul.f32.gmra.mxu1 %v350_v11  ;;  %v1270_v16 = vadd.f32 %v1269_v2, %v1230_v14  ;;  %1470 = vmatmul.msk.f32.gmra.mxu3 %vm445_vm0, %v356_v12  ;;  %v365_v2 = vld [vmem:[%s1688_s20 + $0x460] sm:$0xff]  ;;  %v371_v11 = vld [vmem:[%s1688_s20 + $0x490] sm:$0xff] }
 0x126   : > { %v911_v17 = vpop.f32.mrf.mxu2 }
 0x127   : > { %v912_v18 = vadd.f32 %v911_v17, %v772_v15  ;;  %v370_v17 = vld [vmem:[%s1688_s20 + $0x488] sm:$0xff] }
 0x128   : > { %v1054_v20 = vpop.f32.mrf.mxu3 }
 0x129   : > { %v1052_v21 = vadd.f32 %v1051_v6, %v912_v18  ;;  %v634_v22 = vpop.f32.mrf.mxu0  ;;  %v376_v18 = vld [vmem:[%s1688_s20 + $0x4b8] sm:$0xff] }
 0x12a   : > { %v774_v23 = vpop.f32.mrf.mxu1 }
 0x12b   : > { %1144 = vst [vmem:[%s1811_s22 + $0x78] sm:$0xff] %v1052_v21  ;;  %v1184_v27 = vadd.f32 %v1183_v13, %v1052_v21  ;;  %v1231_v28 = vmul.f32 %v1052_v21, %v1052_v21  ;;  %961 = vmatmul.f32.gmra.mxu2 %v355_v19  ;;  %v775_v29 = vadd.f32 %v774_v23, %v634_v22 }
 0x12c   : > { %681 = vmatmul.f32.gmra.mxu0 %v353_v24 }
 0x12d   : > { %821 = vmatmul.f32.gmra.mxu1 %v354_v25  ;;  %v1271_v30 = vadd.f32 %v1270_v16, %v1231_v28  ;;  %1471 = vmatmul.msk.f32.gmra.mxu3 %vm445_vm0, %v360_v26  ;;  %v369_v16 = vld [vmem:[%s1688_s20 + $0x480] sm:$0xff]  ;;  %v375_v25 = vld [vmem:[%s1688_s20 + $0x4b0] sm:$0xff] }
 0x12e   : > { %v914_v31 = vpop.f32.mrf.mxu2 }
 0x12f   : > { %v915_v32 = vadd.f32 %v914_v31, %v775_v29  ;;  %v374_v31 = vld [vmem:[%s1688_s20 + $0x4a8] sm:$0xff] }
 0x130   : > { %v1057_v34 = vpop.f32.mrf.mxu3 }
 0x131   : > { %v1055_v35 = vadd.f32 %v1054_v20, %v915_v32  ;;  %v637_v36 = vpop.f32.mrf.mxu0  ;;  %v380_v32 = vld [vmem:[%s1688_s20 + $0x4d8] sm:$0xff] }
 0x132   : > { %v777_v37 = vpop.f32.mrf.mxu1 }
 0x133   : > { %1145 = vst [vmem:[%s1811_s22 + $0x80] sm:$0xff] %v1055_v35  ;;  %v1185_v41 = vadd.f32 %v1184_v27, %v1055_v35  ;;  %v1232_v42 = vmul.f32 %v1055_v35, %v1055_v35  ;;  %964 = vmatmul.f32.gmra.mxu2 %v359_v33  ;;  %v778_v43 = vadd.f32 %v777_v37, %v637_v36 }
 0x134   : > { %684 = vmatmul.f32.gmra.mxu0 %v357_v38 }
 0x135   : > { %824 = vmatmul.f32.gmra.mxu1 %v358_v39  ;;  %v1272_v44 = vadd.f32 %v1271_v30, %v1232_v42  ;;  %1472 = vmatmul.msk.f32.gmra.mxu3 %vm445_vm0, %v364_v40  ;;  %v373_v30 = vld [vmem:[%s1688_s20 + $0x4a0] sm:$0xff]  ;;  %v379_v39 = vld [vmem:[%s1688_s20 + $0x4d0] sm:$0xff] }
 0x136   : > { %v917_v45 = vpop.f32.mrf.mxu2 }
 0x137   : > { %v918_v46 = vadd.f32 %v917_v45, %v778_v43  ;;  %v378_v45 = vld [vmem:[%s1688_s20 + $0x4c8] sm:$0xff] }
 0x138   : > { %v1060_v48 = vpop.f32.mrf.mxu3 }
 0x139   : > { %v1058_v49 = vadd.f32 %v1057_v34, %v918_v46  ;;  %v640_v50 = vpop.f32.mrf.mxu0  ;;  %v384_v46 = vld [vmem:[%s1688_s20 + $0x4f8] sm:$0xff] }
 0x13a   : > { %v780_v51 = vpop.f32.mrf.mxu1 }
 0x13b   : > { %1146 = vst [vmem:[%s1811_s22 + $0x88] sm:$0xff] %v1058_v49  ;;  %v1186_v55 = vadd.f32 %v1185_v41, %v1058_v49  ;;  %v1233_v56 = vmul.f32 %v1058_v49, %v1058_v49  ;;  %967 = vmatmul.f32.gmra.mxu2 %v363_v47  ;;  %v781_v57 = vadd.f32 %v780_v51, %v640_v50 }
 0x13c   : > { %687 = vmatmul.f32.gmra.mxu0 %v361_v52 }
 0x13d   : > { %827 = vmatmul.f32.gmra.mxu1 %v362_v53  ;;  %v1273_v58 = vadd.f32 %v1272_v44, %v1233_v56  ;;  %1473 = vmatmul.msk.f32.gmra.mxu3 %vm445_vm0, %v368_v54  ;;  %v377_v44 = vld [vmem:[%s1688_s20 + $0x4c0] sm:$0xff]  ;;  %v383_v53 = vld [vmem:[%s1688_s20 + $0x4f0] sm:$0xff] }
 0x13e   : > { %v920_v59 = vpop.f32.mrf.mxu2 }
 0x13f   : > { %v921_v60 = vadd.f32 %v920_v59, %v781_v57  ;;  %v382_v59 = vld [vmem:[%s1688_s20 + $0x4e8] sm:$0xff] }
 0x140   : > { %v1063_v62 = vpop.f32.mrf.mxu3 }
 0x141   : > { %v1061_v63 = vadd.f32 %v1060_v48, %v921_v60  ;;  %v643_v0 = vpop.f32.mrf.mxu0  ;;  %v388_v60 = vld [vmem:[%s1688_s20 + $0x518] sm:$0xff] }
 0x142   : > { %v783_v1 = vpop.f32.mrf.mxu1 }
 0x143   : > { %1147 = vst [vmem:[%s1811_s22 + $0x90] sm:$0xff] %v1061_v63  ;;  %v1187_v5 = vadd.f32 %v1186_v55, %v1061_v63  ;;  %v1234_v6 = vmul.f32 %v1061_v63, %v1061_v63  ;;  %970 = vmatmul.f32.gmra.mxu2 %v367_v61  ;;  %v784_v7 = vadd.f32 %v783_v1, %v643_v0 }
 0x144   : > { %690 = vmatmul.f32.gmra.mxu0 %v365_v2 }
 0x145   : > { %830 = vmatmul.f32.gmra.mxu1 %v366_v3  ;;  %v1274_v8 = vadd.f32 %v1273_v58, %v1234_v6  ;;  %1474 = vmatmul.msk.f32.gmra.mxu3 %vm445_vm0, %v372_v4  ;;  %v381_v58 = vld [vmem:[%s1688_s20 + $0x4e0] sm:$0xff]  ;;  %v387_v3 = vld [vmem:[%s1688_s20 + $0x510] sm:$0xff] }
 0x146   : > { %v923_v9 = vpop.f32.mrf.mxu2 }
 0x147   : > { %v924_v10 = vadd.f32 %v923_v9, %v784_v7  ;;  %v386_v9 = vld [vmem:[%s1688_s20 + $0x508] sm:$0xff] }
 0x148   : > { %v1066_v12 = vpop.f32.mrf.mxu3 }
 0x149   : > { %v1064_v13 = vadd.f32 %v1063_v62, %v924_v10  ;;  %v646_v14 = vpop.f32.mrf.mxu0 }
 0x14a   : > { %v786_v15 = vpop.f32.mrf.mxu1 }
 0x14b   : > { %1148 = vst [vmem:[%s1811_s22 + $0x98] sm:$0xff] %v1064_v13  ;;  %v1188_v19 = vadd.f32 %v1187_v5, %v1064_v13  ;;  %v1235_v20 = vmul.f32 %v1064_v13, %v1064_v13  ;;  %973 = vmatmul.f32.gmra.mxu2 %v371_v11  ;;  %v787_v21 = vadd.f32 %v786_v15, %v646_v14 }
 0x14c   : > { %693 = vmatmul.f32.gmra.mxu0 %v369_v16 }
 0x14d   : > { %833 = vmatmul.f32.gmra.mxu1 %v370_v17  ;;  %v1275_v22 = vadd.f32 %v1274_v8, %v1235_v20  ;;  %1475 = vmatmul.msk.f32.gmra.mxu3 %vm445_vm0, %v376_v18  ;;  %v385_v8 = vld [vmem:[%s1688_s20 + $0x500] sm:$0xff] }
 0x14e   : > { %v926_v23 = vpop.f32.mrf.mxu2 }
 0x14f   : > { %v927_v24 = vadd.f32 %v926_v23, %v787_v21 }
 0x150   : > { %v1069_v26 = vpop.f32.mrf.mxu3 }
 0x151   : > { %v1067_v27 = vadd.f32 %v1066_v12, %v927_v24  ;;  %v649_v28 = vpop.f32.mrf.mxu0 }
 0x152   : > { %v789_v29 = vpop.f32.mrf.mxu1 }
 0x153   : > { %1149 = vst [vmem:[%s1811_s22 + $0xa0] sm:$0xff] %v1067_v27  ;;  %v1189_v33 = vadd.f32 %v1188_v19, %v1067_v27  ;;  %v1236_v34 = vmul.f32 %v1067_v27, %v1067_v27  ;;  %976 = vmatmul.f32.gmra.mxu2 %v375_v25  ;;  %v790_v35 = vadd.f32 %v789_v29, %v649_v28 }
 0x154   : > { %696 = vmatmul.f32.gmra.mxu0 %v373_v30 }
 0x155   : > { %836 = vmatmul.f32.gmra.mxu1 %v374_v31  ;;  %v1276_v36 = vadd.f32 %v1275_v22, %v1236_v34  ;;  %1476 = vmatmul.msk.f32.gmra.mxu3 %vm445_vm0, %v380_v32 }
 0x156   : > { %v929_v37 = vpop.f32.mrf.mxu2 }
 0x157   : > { %v930_v38 = vadd.f32 %v929_v37, %v790_v35 }
 0x158   : > { %v1072_v40 = vpop.f32.mrf.mxu3 }
 0x159   : > { %v1070_v41 = vadd.f32 %v1069_v26, %v930_v38  ;;  %v652_v42 = vpop.f32.mrf.mxu0 }
 0x15a   : > { %v792_v43 = vpop.f32.mrf.mxu1 }
 0x15b   : > { %1150 = vst [vmem:[%s1811_s22 + $0xa8] sm:$0xff] %v1070_v41  ;;  %v1190_v47 = vadd.f32 %v1189_v33, %v1070_v41  ;;  %v1237_v48 = vmul.f32 %v1070_v41, %v1070_v41  ;;  %979 = vmatmul.f32.gmra.mxu2 %v379_v39  ;;  %v793_v49 = vadd.f32 %v792_v43, %v652_v42 }
 0x15c   : > { %699 = vmatmul.f32.gmra.mxu0 %v377_v44 }
 0x15d   : > { %839 = vmatmul.f32.gmra.mxu1 %v378_v45  ;;  %v1277_v50 = vadd.f32 %v1276_v36, %v1237_v48  ;;  %1477 = vmatmul.msk.f32.gmra.mxu3 %vm445_vm0, %v384_v46 }
 0x15e   : > { %v932_v51 = vpop.f32.mrf.mxu2 }
 0x15f   : > { %v933_v52 = vadd.f32 %v932_v51, %v793_v49 }
 0x160   : > { %v1075_v54 = vpop.f32.mrf.mxu3 }
 0x161   : > { %v1073_v55 = vadd.f32 %v1072_v40, %v933_v52  ;;  %v655_v56 = vpop.f32.mrf.mxu0 }
 0x162   : > { %v795_v57 = vpop.f32.mrf.mxu1 }
 0x163   : > { %1151 = vst [vmem:[%s1811_s22 + $0xb0] sm:$0xff] %v1073_v55  ;;  %v1191_v61 = vadd.f32 %v1190_v47, %v1073_v55  ;;  %v1238_v62 = vmul.f32 %v1073_v55, %v1073_v55  ;;  %982 = vmatmul.f32.gmra.mxu2 %v383_v53  ;;  %v796_v63 = vadd.f32 %v795_v57, %v655_v56 }
 0x164   : > { %702 = vmatmul.f32.gmra.mxu0 %v381_v58 }
 0x165   : > { %842 = vmatmul.f32.gmra.mxu1 %v382_v59  ;;  %v1278_v0 = vadd.f32 %v1277_v50, %v1238_v62  ;;  %1478 = vmatmul.msk.f32.gmra.mxu3 %vm445_vm0, %v388_v60 }
 0x166   : > { %v935_v1 = vpop.f32.mrf.mxu2 }
 0x167   : > { %v936_v2 = vadd.f32 %v935_v1, %v796_v63 }
 0x168   : > { %v1078_v4 = vpop.f32.mrf.mxu3 }
 0x169   : > { %v1076_v5 = vadd.f32 %v1075_v54, %v936_v2  ;;  %v658_v6 = vpop.f32.mrf.mxu0 }
 0x16a   : > { %v798_v7 = vpop.f32.mrf.mxu1 }
 0x16b   : > { %1152 = vst [vmem:[%s1811_s22 + $0xb8] sm:$0xff] %v1076_v5  ;;  %v1192_v10 = vadd.f32 %v1191_v61, %v1076_v5  ;;  %v1239_v11 = vmul.f32 %v1076_v5, %v1076_v5  ;;  %985 = vmatmul.f32.gmra.mxu2 %v387_v3  ;;  %v799_v12 = vadd.f32 %v798_v7, %v658_v6 }
 0x16c   : > { %705 = vmatmul.f32.gmra.mxu0 %v385_v8 }
 0x16d   : > { %845 = vmatmul.f32.gmra.mxu1 %v386_v9  ;;  %v1279_v13 = vadd.f32 %v1278_v0, %v1239_v11 }
 0x16e   : > { %v938_v14 = vpop.f32.mrf.mxu2 }
 0x16f   : > { %v939_v15 = vadd.f32 %v938_v14, %v799_v12 }
 0x170   : > { %v1081_v16 = vpop.f32.mrf.mxu3 }
 0x171   : > { %v1079_v17 = vadd.f32 %v1078_v4, %v939_v15  ;;  %v661_v18 = vpop.f32.mrf.mxu0 }
 0x172   : > { %v801_v19 = vpop.f32.mrf.mxu1 }
 0x173   : > { %1153 = vst [vmem:[%s1811_s22 + $0xc0] sm:$0xff] %v1079_v17  ;;  %v1193_v20 = vadd.f32 %v1192_v10, %v1079_v17  ;;  %v1240_v21 = vmul.f32 %v1079_v17, %v1079_v17  ;;  %v802_v22 = vadd.f32 %v801_v19, %v661_v18 }
 0x175   : > { %v1280_v23 = vadd.f32 %v1279_v13, %v1240_v21 }
 0x176   : > { %v941_v24 = vpop.f32.mrf.mxu2 }
 0x177   : > { %v942_v25 = vadd.f32 %v941_v24, %v802_v22 }
 0x178   : > { %v1084_v26 = vpop.f32.mrf.mxu3 }
 0x179   : > { %v1082_v27 = vadd.f32 %v1081_v16, %v942_v25  ;;  %v664_v28 = vpop.f32.mrf.mxu0 }
 0x17a   : > { %v804_v29 = vpop.f32.mrf.mxu1 }
 0x17b   : > { %1154 = vst [vmem:[%s1811_s22 + $0xc8] sm:$0xff] %v1082_v27  ;;  %v1194_v30 = vadd.f32 %v1193_v20, %v1082_v27  ;;  %v1241_v31 = vmul.f32 %v1082_v27, %v1082_v27  ;;  %v805_v32 = vadd.f32 %v804_v29, %v664_v28 }
 0x17d   : > { %v1281_v33 = vadd.f32 %v1280_v23, %v1241_v31 }
 0x17e   : > { %v944_v34 = vpop.f32.mrf.mxu2 }
 0x17f   : > { %v945_v35 = vadd.f32 %v944_v34, %v805_v32 }
 0x180   : > { %v1087_v36 = vpop.f32.mrf.mxu3 }
 0x181   : > { %v1085_v37 = vadd.f32 %v1084_v26, %v945_v35  ;;  %v667_v38 = vpop.f32.mrf.mxu0 }
 0x182   : > { %v807_v39 = vpop.f32.mrf.mxu1 }
 0x183   : > { %1155 = vst [vmem:[%s1811_s22 + $0xd0] sm:$0xff] %v1085_v37  ;;  %v1195_v40 = vadd.f32 %v1194_v30, %v1085_v37  ;;  %v1242_v41 = vmul.f32 %v1085_v37, %v1085_v37  ;;  %v808_v42 = vadd.f32 %v807_v39, %v667_v38 }
 0x185   : > { %v1282_v43 = vadd.f32 %v1281_v33, %v1242_v41 }
 0x186   : > { %v947_v44 = vpop.f32.mrf.mxu2 }
 0x187   : > { %v948_v45 = vadd.f32 %v947_v44, %v808_v42 }
 0x188   : > { %v1090_v46 = vpop.f32.mrf.mxu3 }
 0x189   : > { %v1088_v47 = vadd.f32 %v1087_v36, %v948_v45  ;;  %v670_v48 = vpop.f32.mrf.mxu0 }
 0x18a   : > { %v810_v49 = vpop.f32.mrf.mxu1 }
 0x18b   : > { %1156 = vst [vmem:[%s1811_s22 + $0xd8] sm:$0xff] %v1088_v47  ;;  %v1196_v50 = vadd.f32 %v1195_v40, %v1088_v47  ;;  %v1243_v51 = vmul.f32 %v1088_v47, %v1088_v47  ;;  %v811_v52 = vadd.f32 %v810_v49, %v670_v48 }
 0x18d   : > { %v1283_v53 = vadd.f32 %v1282_v43, %v1243_v51 }
 0x18e   : > { %v950_v54 = vpop.f32.mrf.mxu2 }
 0x18f   : > { %v951_v55 = vadd.f32 %v950_v54, %v811_v52 }
 0x190   : > { %v1093_v56 = vpop.f32.mrf.mxu3 }
 0x191   : > { %v1091_v57 = vadd.f32 %v1090_v46, %v951_v55  ;;  %v673_v58 = vpop.f32.mrf.mxu0 }
 0x192   : > { %v813_v59 = vpop.f32.mrf.mxu1 }
 0x193   : > { %1157 = vst [vmem:[%s1811_s22 + $0xe0] sm:$0xff] %v1091_v57  ;;  %v1197_v60 = vadd.f32 %v1196_v50, %v1091_v57  ;;  %v1244_v61 = vmul.f32 %v1091_v57, %v1091_v57  ;;  %v814_v62 = vadd.f32 %v813_v59, %v673_v58 }
 0x195   : > { %v1284_v63 = vadd.f32 %v1283_v53, %v1244_v61 }
 0x196   : > { %v953_v0 = vpop.f32.mrf.mxu2 }
 0x197   : > { %v954_v1 = vadd.f32 %v953_v0, %v814_v62 }
 0x198   : > { %v1096_v2 = vpop.f32.mrf.mxu3 }
 0x199   : > { %v1094_v3 = vadd.f32 %v1093_v56, %v954_v1  ;;  %v676_v4 = vpop.f32.mrf.mxu0 }
 0x19a   : > { %v816_v5 = vpop.f32.mrf.mxu1 }
 0x19b   : > { %1158 = vst [vmem:[%s1811_s22 + $0xe8] sm:$0xff] %v1094_v3  ;;  %v1961_v6 = vadd.f32 %v1197_v60, %v1094_v3  ;;  %v1245_v7 = vmul.f32 %v1094_v3, %v1094_v3  ;;  %v817_v8 = vadd.f32 %v816_v5, %v676_v4 }
 0x19d   : > { %v1963_v9 = vadd.f32 %v1284_v63, %v1245_v7 }
 0x19e   : > { %v956_v10 = vpop.f32.mrf.mxu2 }
 0x19f   : > { %v957_v11 = vadd.f32 %v956_v10, %v817_v8 }
 0x1a0   : > { %v1099_v12 = vpop.f32.mrf.mxu3 }
 0x1a1   : > { %v1965_v13 = vadd.f32 %v1096_v2, %v957_v11  ;;  %v679_v14 = vpop.f32.mrf.mxu0 }
 0x1a2   : > { %v819_v15 = vpop.f32.mrf.mxu1 }
 0x1a3   : > { %1159 = vst [vmem:[%s1811_s22 + $0xf0] sm:$0xff] %v1965_v13  ;;  %v820_v16 = vadd.f32 %v819_v15, %v679_v14  ;;  %v1246_v2 = vmul.f32 %v1965_v13, %v1965_v13  ;;  %v1199_v4 = vadd.f32 %v1961_v6, %v1965_v13 }
 0x1a5   : > { %v1286_v8 = vadd.f32 %v1963_v9, %v1246_v2 }
 0x1a6   : > { %v959_v17 = vpop.f32.mrf.mxu2 }
 0x1a7   : > { %v960_v18 = vadd.f32 %v959_v17, %v820_v16 }
 0x1a8   : > { %v1102_v19 = vpop.f32.mrf.mxu3 }
 0x1a9   : > { %v1100_v20 = vadd.f32 %v1099_v12, %v960_v18  ;;  %v682_v21 = vpop.f32.mrf.mxu0 }
 0x1aa   : > { %v822_v22 = vpop.f32.mrf.mxu1 }
 0x1ab   : > { %1160 = vst [vmem:[%s1811_s22 + $0xf8] sm:$0xff] %v1100_v20  ;;  %v823_v23 = vadd.f32 %v822_v22, %v682_v21  ;;  %v1247_v5 = vmul.f32 %v1100_v20, %v1100_v20  ;;  %v1200_v10 = vadd.f32 %v1199_v4, %v1100_v20 }
 0x1ad   : > { %v1287_v16 = vadd.f32 %v1286_v8, %v1247_v5 }
 0x1ae   : > { %v962_v24 = vpop.f32.mrf.mxu2 }
 0x1af   : > { %v963_v25 = vadd.f32 %v962_v24, %v823_v23 }
 0x1b0   : > { %v1105_v26 = vpop.f32.mrf.mxu3 }
 0x1b1   : > { %v1103_v27 = vadd.f32 %v1102_v19, %v963_v25  ;;  %v685_v28 = vpop.f32.mrf.mxu0 }
 0x1b2   : > { %v825_v29 = vpop.f32.mrf.mxu1 }
 0x1b3   : > { %1161 = vst [vmem:[%s1811_s22 + $0x100] sm:$0xff] %v1103_v27  ;;  %v826_v30 = vadd.f32 %v825_v29, %v685_v28  ;;  %v1248_v11 = vmul.f32 %v1103_v27, %v1103_v27  ;;  %v1201_v17 = vadd.f32 %v1200_v10, %v1103_v27 }
 0x1b5   : > { %v1288_v22 = vadd.f32 %v1287_v16, %v1248_v11 }
 0x1b6   : > { %v965_v31 = vpop.f32.mrf.mxu2 }
 0x1b7   : > { %v966_v32 = vadd.f32 %v965_v31, %v826_v30 }
 0x1b8   : > { %v1108_v33 = vpop.f32.mrf.mxu3 }
 0x1b9   : > { %v1106_v34 = vadd.f32 %v1105_v26, %v966_v32  ;;  %v688_v35 = vpop.f32.mrf.mxu0 }
 0x1ba   : > { %v828_v36 = vpop.f32.mrf.mxu1 }
 0x1bb   : > { %1162 = vst [vmem:[%s1811_s22 + $0x108] sm:$0xff] %v1106_v34  ;;  %v829_v37 = vadd.f32 %v828_v36, %v688_v35  ;;  %v1249_v18 = vmul.f32 %v1106_v34, %v1106_v34  ;;  %v1202_v23 = vadd.f32 %v1201_v17, %v1106_v34 }
 0x1bd   : > { %v1289_v13 = vadd.f32 %v1288_v22, %v1249_v18 }
 0x1be   : > { %v968_v38 = vpop.f32.mrf.mxu2 }
 0x1bf   : > { %v969_v39 = vadd.f32 %v968_v38, %v829_v37 }
 0x1c0   : > { %v1111_v40 = vpop.f32.mrf.mxu3 }
 0x1c1   : > { %v1109_v41 = vadd.f32 %v1108_v33, %v969_v39  ;;  %v691_v42 = vpop.f32.mrf.mxu0 }
 0x1c2   : > { %v831_v43 = vpop.f32.mrf.mxu1 }
 0x1c3   : > { %1163 = vst [vmem:[%s1811_s22 + $0x110] sm:$0xff] %v1109_v41  ;;  %v832_v44 = vadd.f32 %v831_v43, %v691_v42  ;;  %v1250_v24 = vmul.f32 %v1109_v41, %v1109_v41  ;;  %v1203_v25 = vadd.f32 %v1202_v23, %v1109_v41 }
 0x1c5   : > { %v1290_v20 = vadd.f32 %v1289_v13, %v1250_v24 }
 0x1c6   : > { %v971_v45 = vpop.f32.mrf.mxu2 }
 0x1c7   : > { %v972_v46 = vadd.f32 %v971_v45, %v832_v44 }
 0x1c8   : > { %v1114_v47 = vpop.f32.mrf.mxu3 }
 0x1c9   : > { %v1112_v48 = vadd.f32 %v1111_v40, %v972_v46  ;;  %v694_v49 = vpop.f32.mrf.mxu0 }
 0x1ca   : > { %v834_v50 = vpop.f32.mrf.mxu1 }
 0x1cb   : > { %1164 = vst [vmem:[%s1811_s22 + $0x118] sm:$0xff] %v1112_v48  ;;  %v835_v51 = vadd.f32 %v834_v50, %v694_v49  ;;  %v1251_v26 = vmul.f32 %v1112_v48, %v1112_v48  ;;  %v1204_v28 = vadd.f32 %v1203_v25, %v1112_v48 }
 0x1cd   : > { %v1291_v27 = vadd.f32 %v1290_v20, %v1251_v26 }
 0x1ce   : > { %v974_v52 = vpop.f32.mrf.mxu2 }
 0x1cf   : > { %v975_v53 = vadd.f32 %v974_v52, %v835_v51 }
 0x1d0   : > { %v1117_v54 = vpop.f32.mrf.mxu3 }
 0x1d1   : > { %v1115_v55 = vadd.f32 %v1114_v47, %v975_v53  ;;  %v697_v56 = vpop.f32.mrf.mxu0  ;;  %v1303_v53 = vlaneseq }
 0x1d2   : > { %v837_v57 = vpop.f32.mrf.mxu1 }
 0x1d3   : > { %1165 = vst [vmem:[%s1811_s22 + $0x120] sm:$0xff] %v1115_v55  ;;  %v838_v58 = vadd.f32 %v837_v57, %v697_v56  ;;  %v1252_v29 = vmul.f32 %v1115_v55, %v1115_v55  ;;  %v1205_v33 = vadd.f32 %v1204_v28, %v1115_v55 }
 0x1d5   : > { %v1292_v34 = vadd.f32 %v1291_v27, %v1252_v29 }
 0x1d6   : > { %v977_v59 = vpop.f32.mrf.mxu2 }
 0x1d7   : > { %v978_v60 = vadd.f32 %v977_v59, %v838_v58  ;;  %v1304_v58 = vshrl.u32 %v1303_v53, 7 }
 0x1d8   : > { %v1120_v0 = vpop.f32.mrf.mxu3 }
 0x1d9   : > { %v1118_v61 = vadd.f32 %v1117_v54, %v978_v60  ;;  %v700_v62 = vpop.f32.mrf.mxu0  ;;  %vm1305_vm1 = vcmp.eq.s32.totalorder %v1304_v58, 0 }
 0x1da   : > { %v840_v63 = vpop.f32.mrf.mxu1 }
 0x1db   : > { %1166 = vst [vmem:[%s1811_s22 + $0x128] sm:$0xff] %v1118_v61  ;;  %v841_v1 = vadd.f32 %v840_v63, %v700_v62  ;;  %v1253_v35 = vmul.f32 %v1118_v61, %v1118_v61  ;;  %v1206_v37 = vadd.f32 %v1205_v33, %v1118_v61 }
 0x1dd   : > { %v1293_v41 = vadd.f32 %v1292_v34, %v1253_v35 }
 0x1de   : > { %v980_v3 = vpop.f32.mrf.mxu2 }
 0x1df   : > { %v981_v7 = vadd.f32 %v980_v3, %v841_v1 }
 0x1e0   : > { %v1123_v21 = vpop.f32.mrf.mxu3 }
 0x1e1   : > { %v1121_v12 = vadd.f32 %v1120_v0, %v981_v7  ;;  %v703_v14 = vpop.f32.mrf.mxu0 }
 0x1e2   : > { %v843_v15 = vpop.f32.mrf.mxu1 }
 0x1e3   : > { %1167 = vst [vmem:[%s1811_s22 + $0x130] sm:$0xff] %v1121_v12  ;;  %v844_v19 = vadd.f32 %v843_v15, %v703_v14  ;;  %v1254_v38 = vmul.f32 %v1121_v12, %v1121_v12  ;;  %v1207_v42 = vadd.f32 %v1206_v37, %v1121_v12 }
 0x1e5   : > { %v1294_v45 = vadd.f32 %v1293_v41, %v1254_v38 }
 0x1e6   : > { %v983_v6 = vpop.f32.mrf.mxu2 }
 0x1e7   : > { %v984_v9 = vadd.f32 %v983_v6, %v844_v19 }
 0x1e8   : > { %v1126_v40 = vpop.f32.mrf.mxu3 }
 0x1e9   : > { %v1124_v30 = vadd.f32 %v1123_v21, %v984_v9  ;;  %v706_v31 = vpop.f32.mrf.mxu0 }
 0x1ea   : > { %v846_v32 = vpop.f32.mrf.mxu1 }
 0x1eb   : > { %1168 = vst [vmem:[%s1811_s22 + $0x138] sm:$0xff] %v1124_v30  ;;  %v847_v36 = vadd.f32 %v846_v32, %v706_v31  ;;  %v1255_v43 = vmul.f32 %v1124_v30, %v1124_v30  ;;  %v1208_v46 = vadd.f32 %v1207_v42, %v1124_v30 }
 0x1ed   : > { %v1295_v48 = vadd.f32 %v1294_v45, %v1255_v43 }
 0x1ee   : > { %v986_v39 = vpop.f32.mrf.mxu2 }
 0x1ef   : > { %v987_v44 = vadd.f32 %v986_v39, %v847_v36 }
 0x1f1   : > { %v1127_v47 = vadd.f32 %v1126_v40, %v987_v44 }
 0x1f3   : > { %1169 = vst [vmem:[%s1811_s22 + $0x140] sm:$0xff] %v1127_v47  ;;  %v1209_v49 = vadd.f32 %v1208_v46, %v1127_v47  ;;  %v1256_v50 = vmul.f32 %v1127_v47, %v1127_v47 }
 0x1f5   : > { %v1210_v51 = vrot.slane %v1209_v49, 4  ;;  %v1296_v52 = vadd.f32 %v1295_v48, %v1256_v50 }
 0x1f7   : > { %v1211_v54 = vadd.f32 %v1210_v51, %v1209_v49  ;;  %v1297_v55 = vrot.slane %v1296_v52, 4 }
 0x1f9   : > { %v1212_v56 = vrot.slane %v1211_v54, 2  ;;  %v1298_v57 = vadd.f32 %v1297_v55, %v1296_v52 }
 0x1fb   : > { %v1213_v59 = vadd.f32 %v1212_v56, %v1211_v54  ;;  %v1299_v60 = vrot.slane %v1298_v57, 2 }
 0x1fd   : > { %v1214_v61 = vrot.slane %v1213_v59, 1  ;;  %v1300_v62 = vadd.f32 %v1299_v60, %v1298_v57 }
 0x1ff   : > { %v1215_v63 = vadd.f32 %v1214_v61, %v1213_v59  ;;  %v1301_v0 = vrot.slane %v1300_v62, 1 }
 0x201   : > { %v1302_v1 = vadd.f32 %v1301_v0, %v1300_v62  ;;  %v1306_v2 = vsel %vm1305_vm1, %v1215_v63, 0.0 }
 0x202   : > { %1307 = vst [vmem:[%s220_s25] sm:$0xff] %v1306_v2 }
 0x203   : > { %v1308_v3 = vsel %vm1305_vm1, %v1302_v1, 0.0 }
 0x204   : > { %1309 = vst [vmem:[%s224_s28] sm:$0xff] %v1308_v3 }
 0x205 PF: > { %s15_s15 = sadd.s32 1, %s1496_s15  }
 0x206   : > { %p12_p5 = scmp.ge.s32.totalorder %s15_s15, 4  }
 0x208   :  { %14 = sbr.rel (!%p12_p5) target bundleno = 1 (0x1), region = 82 }

// kernel: up_block_forward.8
= control target key start
LH: loop header
LB: loop body
LE: loop exit
PB: predicated region body
PF: predicated region fallthrough
CT: control target
= control target key end

     0   :  { %s1161_s15 = smov 0   ;;  %s1568_s0 = inlined_call_operand.vmem [shape: f32[656,224], index: 0, kind: input, shape index: {}]   ;;  %s1569_s1 = inlined_call_operand.vmem [shape: f32[224,128], index: 1, kind: input, shape index: {}]   ;;  %s1570_s2 = inlined_call_operand.vmem [shape: f32[656,128], index: 2, kind: output, shape index: {0}]   ;;  %s1571_s3 = inlined_call_operand.vmem [shape: f32[16,128], index: 3, kind: output, shape index: {1}]   ;;  %s1572_s4 = inlined_call_operand.vmem [shape: f32[16,128], index: 4, kind: output, shape index: {2}]  }
   0x1 LB: > { %s1167_s16 = sadd.s32 4294967295, %s1134_s15   ;;  %p1042_p0 = scmp.ge.s32.totalorder %s1134_s15, 1  ;;  %s1134_s15 = sphi %s1161_s15, %s15_s15  }
   0x2   : > { %p169_p1 = scmp.lt.s32.totalorder %s1134_s15, 3 }
   0x4   : > { %p170_p2 = pnand %p1042_p0, %p169_p1 }
   0x5   : > { %s204_s29 = smul.u32 (!%p170_p2), 41, %s1167_s16  ;;  %p217_p4 = scmp.lt.s32.totalorder (!%p170_p2), %s1167_s16, 1 }
   0x6   : > { %173 = sbr.rel (%p170_p2) target bundleno = 383 (0x17f), region = 28 }
   0x7   : > { %p205_p3 = scmp.lt.s32.totalorder (!%p170_p2), %s204_s29, 81 }
   0xb   : > { %v322_v0 = vld [vmem:[%s1569_s1 + $0x78] sm:$0xff]  ;;  %v321_v2 = vld [vmem:[%s1569_s1 + $0x70] sm:$0xff]  ;;  %v320_v4 = vld [vmem:[%s1569_s1 + $0x68] sm:$0xff]  ;;  %s1574_s29 = smov (!%p205_p3, %s204_s29), 81  ;;  %vm335_vm0 = vcmask 785408   ;;  %s1576_s16 = smov (!%p217_p4, %s1167_s16), 1 }
   0xc   : > { %v334_v1 = vld [vmem:[%s1569_s1 + $0xd8] sm:$0xff]  ;;  %459 = vmatpush.msra.mxu0 %v322_v0  ;;  %v333_v3 = vld [vmem:[%s1569_s1 + $0xd0] sm:$0xff]  ;;  %v332_v5 = vld [vmem:[%s1569_s1 + $0xc8] sm:$0xff]  ;;  %1092 = vmatpush.msra.mxu2 %v322_v0  ;;  %s1091_s5 = sshll.u32 %s1574_s29, 4  ;;  %s1045_s6 = sshll.u32 %s1574_s29, 3 }
   0xd   : > { %603 = vmatpush.msra.mxu1 %v334_v1  ;;  %1108 = vmatpush.msra.mxu3 %v334_v1  ;;  %v319_v6 = vld [vmem:[%s1569_s1 + $0x60] sm:$0xff]  ;;  %v318_v8 = vld [vmem:[%s1569_s1 + $0x58] sm:$0xff]  ;;  %v317_v10 = vld [vmem:[%s1569_s1 + $0x50] sm:$0xff]  ;;  %s1244_s18 = scalar_lea.vmem %s1568_s0, %s1091_s5  ;;  %s1366_s9 = scalar_lea.vmem %s1570_s2, %s1045_s6 }
   0xe   : > { %460 = vmatpush.msra.mxu0 %v321_v2  ;;  %v331_v7 = vld [vmem:[%s1569_s1 + $0xc0] sm:$0xff]  ;;  %1093 = vmatpush.msra.mxu2 %v321_v2  ;;  %v330_v9 = vld [vmem:[%s1569_s1 + $0xb8] sm:$0xff]  ;;  %v329_v11 = vld [vmem:[%s1569_s1 + $0xb0] sm:$0xff]  ;;  %s1046_s29 = sshll.u32 %s1576_s16, 3 }
   0xf   : > { %604 = vmatpush.msra.mxu1 %v333_v3  ;;  %1109 = vmatpush.msra.mxu3 %v333_v3  ;;  %v316_v12 = vld [vmem:[%s1569_s1 + $0x48] sm:$0xff]  ;;  %v315_v14 = vld [vmem:[%s1569_s1 + $0x40] sm:$0xff]  ;;  %v314_v16 = vld [vmem:[%s1569_s1 + $0x38] sm:$0xff]  ;;  %s220_s12 = scalar_lea.vmem %s1571_s3, %s1046_s29  ;;  %s224_s17 = scalar_lea.vmem %s1572_s4, %s1046_s29 }
  0x10   : > { %461 = vmatpush.msra.mxu0 %v320_v4  ;;  %1094 = vmatpush.msra.mxu2 %v320_v4  ;;  %v328_v13 = vld [vmem:[%s1569_s1 + $0xa8] sm:$0xff]  ;;  %v327_v15 = vld [vmem:[%s1569_s1 + $0xa0] sm:$0xff]  ;;  %v326_v17 = vld [vmem:[%s1569_s1 + $0x98] sm:$0xff] }
  0x11   : > { %605 = vmatpush.msra.mxu1 %v332_v5  ;;  %1110 = vmatpush.msra.mxu3 %v332_v5  ;;  %v313_v18 = vld [vmem:[%s1569_s1 + $0x30] sm:$0xff]  ;;  %v312_v20 = vld [vmem:[%s1569_s1 + $0x28] sm:$0xff]  ;;  %v311_v22 = vld [vmem:[%s1569_s1 + $0x20] sm:$0xff] }
  0x12   : > { %462 = vmatpush.msra.mxu0 %v319_v6  ;;  %1095 = vmatpush.msra.mxu2 %v319_v6  ;;  %v325_v19 = vld [vmem:[%s1569_s1 + $0x90] sm:$0xff]  ;;  %v324_v21 = vld [vmem:[%s1569_s1 + $0x88] sm:$0xff]  ;;  %v323_v23 = vld [vmem:[%s1569_s1 + $0x80] sm:$0xff] }
  0x13   : > { %606 = vmatpush.msra.mxu1 %v331_v7  ;;  %1111 = vmatpush.msra.mxu3 %v331_v7  ;;  %v226_v24 = vld [vmem:[%s1244_s18 + $0x8] sm:$0xff]  ;;  %v310_v25 = vld [vmem:[%s1569_s1 + $0x18] sm:$0xff]  ;;  %v309_v26 = vld [vmem:[%s1569_s1 + $0x10] sm:$0xff] }
  0x14   : > { %463 = vmatpush.msra.mxu0 %v318_v8  ;;  %1096 = vmatpush.msra.mxu2 %v318_v8  ;;  %v308_v27 = vld [vmem:[%s1569_s1 + $0x8] sm:$0xff]  ;;  %v307_v28 = vld [vmem:[%s1569_s1] sm:$0xff]  ;;  %v228_v30 = vld [vmem:[%s1244_s18 + $0x18] sm:$0xff] }
  0x15   : > { %607 = vmatpush.msra.mxu1 %v330_v9  ;;  %1112 = vmatpush.msra.mxu3 %v330_v9  ;;  %v225_v29 = vld [vmem:[%s1244_s18] sm:$0xff]  ;;  %v268_v32 = vld [vmem:[%s1244_s18 + $0x158] sm:$0xff]  ;;  %v227_v33 = vld [vmem:[%s1244_s18 + $0x10] sm:$0xff] }
  0x16   : > { %464 = vmatpush.msra.mxu0 %v317_v10  ;;  %1097 = vmatpush.msra.mxu2 %v317_v10  ;;  %v265_v31 = vld [vmem:[%s1244_s18 + $0x140] sm:$0xff]  ;;  %v230_v34 = vld [vmem:[%s1244_s18 + $0x28] sm:$0xff]  ;;  %v267_v35 = vld [vmem:[%s1244_s18 + $0x150] sm:$0xff] }
  0x17   : > { %608 = vmatpush.msra.mxu1 %v329_v11  ;;  %1113 = vmatpush.msra.mxu3 %v329_v11  ;;  %v270_v36 = vld [vmem:[%s1244_s18 + $0x168] sm:$0xff]  ;;  %v229_v37 = vld [vmem:[%s1244_s18 + $0x20] sm:$0xff]  ;;  %v232_v38 = vld [vmem:[%s1244_s18 + $0x38] sm:$0xff] }
  0x18   : > { %465 = vmatpush.msra.mxu0 %v316_v12  ;;  %1098 = vmatpush.msra.mxu2 %v316_v12  ;;  %v269_v39 = vld [vmem:[%s1244_s18 + $0x160] sm:$0xff]  ;;  %v272_v40 = vld [vmem:[%s1244_s18 + $0x178] sm:$0xff]  ;;  %v231_v41 = vld [vmem:[%s1244_s18 + $0x30] sm:$0xff] }
  0x19   : > { %609 = vmatpush.msra.mxu1 %v328_v13  ;;  %1114 = vmatpush.msra.mxu3 %v328_v13  ;;  %v234_v42 = vld [vmem:[%s1244_s18 + $0x48] sm:$0xff]  ;;  %v271_v43 = vld [vmem:[%s1244_s18 + $0x170] sm:$0xff]  ;;  %v233_v45 = vld [vmem:[%s1244_s18 + $0x40] sm:$0xff] }
  0x1a   : > { %466 = vmatpush.msra.mxu0 %v315_v14  ;;  %1099 = vmatpush.msra.mxu2 %v315_v14  ;;  %v274_v44 = vld [vmem:[%s1244_s18 + $0x188] sm:$0xff]  ;;  %v236_v46 = vld [vmem:[%s1244_s18 + $0x58] sm:$0xff]  ;;  %v273_v47 = vld [vmem:[%s1244_s18 + $0x180] sm:$0xff] }
  0x1b   : > { %610 = vmatpush.msra.mxu1 %v327_v15  ;;  %1115 = vmatpush.msra.mxu3 %v327_v15  ;;  %v276_v48 = vld [vmem:[%s1244_s18 + $0x198] sm:$0xff]  ;;  %v235_v49 = vld [vmem:[%s1244_s18 + $0x50] sm:$0xff]  ;;  %v238_v50 = vld [vmem:[%s1244_s18 + $0x68] sm:$0xff] }
  0x1c   : > { %467 = vmatpush.msra.mxu0 %v314_v16  ;;  %1100 = vmatpush.msra.mxu2 %v314_v16  ;;  %v275_v51 = vld [vmem:[%s1244_s18 + $0x190] sm:$0xff]  ;;  %v278_v52 = vld [vmem:[%s1244_s18 + $0x1a8] sm:$0xff]  ;;  %v237_v53 = vld [vmem:[%s1244_s18 + $0x60] sm:$0xff] }
  0x1d   : > { %611 = vmatpush.msra.mxu1 %v326_v17  ;;  %1116 = vmatpush.msra.mxu3 %v326_v17  ;;  %v240_v54 = vld [vmem:[%s1244_s18 + $0x78] sm:$0xff]  ;;  %v277_v55 = vld [vmem:[%s1244_s18 + $0x1a0] sm:$0xff]  ;;  %v239_v57 = vld [vmem:[%s1244_s18 + $0x70] sm:$0xff] }
  0x1e   : > { %468 = vmatpush.msra.mxu0 %v313_v18  ;;  %1101 = vmatpush.msra.mxu2 %v313_v18  ;;  %v280_v56 = vld [vmem:[%s1244_s18 + $0x1b8] sm:$0xff]  ;;  %v242_v58 = vld [vmem:[%s1244_s18 + $0x88] sm:$0xff]  ;;  %v279_v59 = vld [vmem:[%s1244_s18 + $0x1b0] sm:$0xff] }
  0x1f   : > { %612 = vmatpush.msra.mxu1 %v325_v19  ;;  %1117 = vmatpush.msra.mxu3 %v325_v19  ;;  %v282_v60 = vld [vmem:[%s1244_s18 + $0x1c8] sm:$0xff]  ;;  %v241_v61 = vld [vmem:[%s1244_s18 + $0x80] sm:$0xff]  ;;  %v244_v62 = vld [vmem:[%s1244_s18 + $0x98] sm:$0xff] }
  0x20   : > { %469 = vmatpush.msra.mxu0 %v312_v20  ;;  %1102 = vmatpush.msra.mxu2 %v312_v20  ;;  %v281_v63 = vld [vmem:[%s1244_s18 + $0x1c0] sm:$0xff]  ;;  %v284_v0 = vld [vmem:[%s1244_s18 + $0x1d8] sm:$0xff]  ;;  %v243_v1 = vld [vmem:[%s1244_s18 + $0x90] sm:$0xff] }
  0x21   : > { %613 = vmatpush.msra.mxu1 %v324_v21  ;;  %1118 = vmatpush.msra.mxu3 %v324_v21  ;;  %v246_v2 = vld [vmem:[%s1244_s18 + $0xa8] sm:$0xff]  ;;  %v283_v3 = vld [vmem:[%s1244_s18 + $0x1d0] sm:$0xff]  ;;  %v245_v5 = vld [vmem:[%s1244_s18 + $0xa0] sm:$0xff] }
  0x22   : > { %470 = vmatpush.msra.mxu0 %v311_v22  ;;  %1103 = vmatpush.msra.mxu2 %v311_v22  ;;  %v286_v4 = vld [vmem:[%s1244_s18 + $0x1e8] sm:$0xff]  ;;  %v248_v6 = vld [vmem:[%s1244_s18 + $0xb8] sm:$0xff]  ;;  %v285_v7 = vld [vmem:[%s1244_s18 + $0x1e0] sm:$0xff] }
  0x23   : > { %614 = vmatpush.msra.mxu1 %v323_v23  ;;  %1119 = vmatpush.msra.mxu3 %v323_v23  ;;  %v288_v8 = vld [vmem:[%s1244_s18 + $0x1f8] sm:$0xff]  ;;  %v247_v9 = vld [vmem:[%s1244_s18 + $0xb0] sm:$0xff]  ;;  %v250_v10 = vld [vmem:[%s1244_s18 + $0xc8] sm:$0xff] }
  0x24   : > { %1048 = vmatmul.msk.f32.vlgmr.msra.gmra.mxu1 %vm335_vm0, %v226_v24  ;;  %471 = vmatpush.msra.mxu0 %v310_v25  ;;  %v287_v11 = vld [vmem:[%s1244_s18 + $0x1f0] sm:$0xff]  ;;  %v290_v12 = vld [vmem:[%s1244_s18 + $0x208] sm:$0xff]  ;;  %v249_v13 = vld [vmem:[%s1244_s18 + $0xc0] sm:$0xff] }
  0x25   : > { %1104 = vmatpush.msra.mxu2 %v310_v25  ;;  %1069 = vmatmul.msk.f32.vlgmr.msra.gmra.mxu3 %vm335_vm0, %v268_v32  ;;  %v252_v14 = vld [vmem:[%s1244_s18 + $0xd8] sm:$0xff]  ;;  %v289_v15 = vld [vmem:[%s1244_s18 + $0x200] sm:$0xff]  ;;  %v251_v17 = vld [vmem:[%s1244_s18 + $0xd0] sm:$0xff] }
  0x26   : > { %472 = vmatpush.msra.mxu0 %v309_v26  ;;  %v292_v16 = vld [vmem:[%s1244_s18 + $0x218] sm:$0xff]  ;;  %v254_v18 = vld [vmem:[%s1244_s18 + $0xe8] sm:$0xff]  ;;  %v291_v19 = vld [vmem:[%s1244_s18 + $0x210] sm:$0xff] }
  0x27   : > { %1105 = vmatpush.msra.mxu2 %v309_v26  ;;  %v294_v20 = vld [vmem:[%s1244_s18 + $0x228] sm:$0xff]  ;;  %v253_v21 = vld [vmem:[%s1244_s18 + $0xe0] sm:$0xff]  ;;  %v256_v22 = vld [vmem:[%s1244_s18 + $0xf8] sm:$0xff] }
  0x28   : > { %473 = vmatpush.msra.mxu0 %v308_v27  ;;  %v293_v23 = vld [vmem:[%s1244_s18 + $0x220] sm:$0xff]  ;;  %v296_v24 = vld [vmem:[%s1244_s18 + $0x238] sm:$0xff]  ;;  %v255_v26 = vld [vmem:[%s1244_s18 + $0xf0] sm:$0xff] }
  0x29   : > { %1106 = vmatpush.msra.mxu2 %v308_v27  ;;  %v258_v27 = vld [vmem:[%s1244_s18 + $0x108] sm:$0xff]  ;;  %v257_v32 = vld [vmem:[%s1244_s18 + $0x100] sm:$0xff] }
  0x2a   : > { %474 = vmatpush.msra.mxu0 %v307_v28 }
  0x2b   : > { %475 = vmatmul.f32.vlgmr.msra.gmra.mxu0 %v225_v29  ;;  %1107 = vmatpush.msra.mxu2 %v307_v28  ;;  %v295_v28 = vld [vmem:[%s1244_s18 + $0x230] sm:$0xff]  ;;  %v298_v29 = vld [vmem:[%s1244_s18 + $0x248] sm:$0xff] }
  0x2c   : > { %1049 = vmatmul.msk.f32.gmra.mxu1 %vm335_vm0, %v228_v30  ;;  %535 = vmatmul.f32.vlgmr.msra.gmra.mxu2 %v265_v31 }
  0x2d   : > { %1070 = vmatmul.msk.f32.gmra.mxu3 %vm335_vm0, %v270_v36  ;;  %v300_v36 = vld [vmem:[%s1244_s18 + $0x258] sm:$0xff] }
  0x33   : > { %478 = vmatmul.f32.gmra.mxu0 %v227_v33  ;;  %v260_v33 = vld [vmem:[%s1244_s18 + $0x118] sm:$0xff] }
  0x34   : > { %1050 = vmatmul.msk.f32.gmra.mxu1 %vm335_vm0, %v230_v34  ;;  %538 = vmatmul.f32.gmra.mxu2 %v267_v35  ;;  %v297_v35 = vld [vmem:[%s1244_s18 + $0x240] sm:$0xff] }
  0x35   : > { %1071 = vmatmul.msk.f32.gmra.mxu3 %vm335_vm0, %v272_v40  ;;  %v262_v40 = vld [vmem:[%s1244_s18 + $0x128] sm:$0xff] }
  0x3b   : > { %481 = vmatmul.f32.gmra.mxu0 %v229_v37 }
  0x3c   : > { %1051 = vmatmul.msk.f32.gmra.mxu1 %vm335_vm0, %v232_v38  ;;  %541 = vmatmul.f32.gmra.mxu2 %v269_v39  ;;  %v259_v39 = vld [vmem:[%s1244_s18 + $0x110] sm:$0xff] }
  0x3d   : > { %1072 = vmatmul.msk.f32.gmra.mxu3 %vm335_vm0, %v274_v44 }
  0x43   : > { %484 = vmatmul.f32.gmra.mxu0 %v231_v41 }
  0x44   : > { %1052 = vmatmul.msk.f32.gmra.mxu1 %vm335_vm0, %v234_v42  ;;  %544 = vmatmul.f32.gmra.mxu2 %v271_v43  ;;  %v299_v43 = vld [vmem:[%s1244_s18 + $0x250] sm:$0xff] }
  0x45   : > { %1073 = vmatmul.msk.f32.gmra.mxu3 %vm335_vm0, %v276_v48 }
  0x4b   : > { %487 = vmatmul.f32.gmra.mxu0 %v233_v45 }
  0x4c   : > { %1053 = vmatmul.msk.f32.gmra.mxu1 %vm335_vm0, %v236_v46  ;;  %547 = vmatmul.f32.gmra.mxu2 %v273_v47 }
  0x4d   : > { %1074 = vmatmul.msk.f32.gmra.mxu3 %vm335_vm0, %v278_v52  ;;  %v261_v52 = vld [vmem:[%s1244_s18 + $0x120] sm:$0xff] }
  0x53   : > { %490 = vmatmul.f32.gmra.mxu0 %v235_v49  ;;  %v302_v49 = vld [vmem:[%s1244_s18 + $0x268] sm:$0xff] }
  0x54   : > { %1054 = vmatmul.msk.f32.gmra.mxu1 %vm335_vm0, %v238_v50  ;;  %550 = vmatmul.f32.gmra.mxu2 %v275_v51 }
  0x55   : > { %1075 = vmatmul.msk.f32.gmra.mxu3 %vm335_vm0, %v280_v56 }
  0x5b   : > { %493 = vmatmul.f32.gmra.mxu0 %v237_v53  ;;  %v264_v53 = vld [vmem:[%s1244_s18 + $0x138] sm:$0xff] }
  0x5c   : > { %1055 = vmatmul.msk.f32.gmra.mxu1 %vm335_vm0, %v240_v54  ;;  %553 = vmatmul.f32.gmra.mxu2 %v277_v55 }
  0x5d   : > { %1076 = vmatmul.msk.f32.gmra.mxu3 %vm335_vm0, %v282_v60 }
  0x63   : > { %496 = vmatmul.f32.gmra.mxu0 %v239_v57  ;;  %v301_v57 = vld [vmem:[%s1244_s18 + $0x260] sm:$0xff] }
  0x64   : > { %1056 = vmatmul.msk.f32.gmra.mxu1 %vm335_vm0, %v242_v58  ;;  %556 = vmatmul.f32.gmra.mxu2 %v279_v59 }
  0x65   : > { %1077 = vmatmul.msk.f32.gmra.mxu3 %vm335_vm0, %v284_v0 }
  0x6b   : > { %499 = vmatmul.f32.gmra.mxu0 %v241_v61 }
  0x6c   : > { %1057 = vmatmul.msk.f32.gmra.mxu1 %vm335_vm0, %v244_v62  ;;  %559 = vmatmul.f32.gmra.mxu2 %v281_v63  ;;  %v304_v62 = vld [vmem:[%s1244_s18 + $0x278] sm:$0xff] }
  0x6d   : > { %1078 = vmatmul.msk.f32.gmra.mxu3 %vm335_vm0, %v286_v4 }
  0x73   : > { %502 = vmatmul.f32.gmra.mxu0 %v243_v1  ;;  %v263_v1 = vld [vmem:[%s1244_s18 + $0x130] sm:$0xff] }
  0x74   : > { %1058 = vmatmul.msk.f32.gmra.mxu1 %vm335_vm0, %v246_v2  ;;  %562 = vmatmul.f32.gmra.mxu2 %v283_v3  ;;  %v266_v2 = vld [vmem:[%s1244_s18 + $0x148] sm:$0xff] }
  0x75   : > { %1079 = vmatmul.msk.f32.gmra.mxu3 %vm335_vm0, %v288_v8 }
  0x7b   : > { %505 = vmatmul.f32.gmra.mxu0 %v245_v5 }
  0x7c   : > { %1059 = vmatmul.msk.f32.gmra.mxu1 %vm335_vm0, %v248_v6  ;;  %565 = vmatmul.f32.gmra.mxu2 %v285_v7  ;;  %v303_v6 = vld [vmem:[%s1244_s18 + $0x270] sm:$0xff] }
  0x7d   : > { %1080 = vmatmul.msk.f32.gmra.mxu3 %vm335_vm0, %v290_v12 }
  0x83   : > { %508 = vmatmul.f32.gmra.mxu0 %v247_v9 }
  0x84   : > { %1060 = vmatmul.msk.f32.gmra.mxu1 %vm335_vm0, %v250_v10  ;;  %568 = vmatmul.f32.gmra.mxu2 %v287_v11  ;;  %v306_v11 = vld [vmem:[%s1244_s18 + $0x288] sm:$0xff] }
  0x85   : > { %1081 = vmatmul.msk.f32.gmra.mxu3 %vm335_vm0, %v292_v16 }
  0x8b   : > { %511 = vmatmul.f32.gmra.mxu0 %v249_v13 }
  0x8c   : > { %1061 = vmatmul.msk.f32.gmra.mxu1 %vm335_vm0, %v252_v14  ;;  %571 = vmatmul.f32.gmra.mxu2 %v289_v15 }
  0x8d   : > { %1082 = vmatmul.msk.f32.gmra.mxu3 %vm335_vm0, %v294_v20 }
  0x93   : > { %514 = vmatmul.f32.gmra.mxu0 %v251_v17  ;;  %v305_v17 = vld [vmem:[%s1244_s18 + $0x280] sm:$0xff] }
  0x94   : > { %1062 = vmatmul.msk.f32.gmra.mxu1 %vm335_vm0, %v254_v18  ;;  %574 = vmatmul.f32.gmra.mxu2 %v291_v19 }
  0x95   : > { %1083 = vmatmul.msk.f32.gmra.mxu3 %vm335_vm0, %v296_v24 }
  0x9b   : > { %517 = vmatmul.f32.gmra.mxu0 %v253_v21 }
  0x9c   : > { %1063 = vmatmul.msk.f32.gmra.mxu1 %vm335_vm0, %v256_v22  ;;  %577 = vmatmul.f32.gmra.mxu2 %v293_v23 }
  0x9d   : > { %1084 = vmatmul.msk.f32.gmra.mxu3 %vm335_vm0, %v298_v29 }
  0xa1   : > { %v616_v25 = vpop.f32.mrf.mxu1 }
  0xa3   : > { %520 = vmatmul.f32.gmra.mxu0 %v255_v26 }
  0xa4   : > { %1064 = vmatmul.msk.f32.gmra.mxu1 %vm335_vm0, %v258_v27  ;;  %580 = vmatmul.f32.gmra.mxu2 %v295_v28 }
  0xa5   : > { %1085 = vmatmul.msk.f32.gmra.mxu3 %vm335_vm0, %v300_v36 }
  0xa8   : > { %v476_v30 = vpop.f32.mrf.mxu0  ;;  %v679_v44 = vpop.f32.mrf.mxu3 }
  0xa9   : > { %v619_v31 = vpop.f32.mrf.mxu1  ;;  %v617_v34 = vadd.f32 %v616_v25, %v476_v30 }
  0xab   : > { %739 = vst [vmem:[%s1366_s9] sm:$0xff] %v617_v34  ;;  %523 = vmatmul.f32.gmra.mxu0 %v257_v32  ;;  %v826_v45 = vmul.f32 %v617_v34, %v617_v34 }
  0xac   : > { %1065 = vmatmul.msk.f32.gmra.mxu1 %vm335_vm0, %v260_v33  ;;  %583 = vmatmul.f32.gmra.mxu2 %v297_v35 }
  0xad   : > { %1086 = vmatmul.msk.f32.gmra.mxu3 %vm335_vm0, %v302_v49 }
  0xaf   : > { %v1377_v42 = vpop.f32.mrf.mxu2 }
  0xb0   : > { %v479_v37 = vpop.f32.mrf.mxu0  ;;  %v682_v58 = vpop.f32.mrf.mxu3 }
  0xb1   : > { %v622_v38 = vpop.f32.mrf.mxu1  ;;  %v620_v41 = vadd.f32 %v619_v31, %v479_v37 }
  0xb3   : > { %740 = vst [vmem:[%s1366_s9 + $0x8] sm:$0xff] %v620_v41  ;;  %v780_v46 = vadd.f32 %v620_v41, %v617_v34  ;;  %v827_v47 = vmul.f32 %v620_v41, %v620_v41  ;;  %526 = vmatmul.f32.gmra.mxu0 %v259_v39 }
  0xb4   : > { %1066 = vmatmul.msk.f32.gmra.mxu1 %vm335_vm0, %v262_v40  ;;  %586 = vmatmul.f32.gmra.mxu2 %v299_v43 }
  0xb5   : > { %v867_v48 = vadd.f32 %v827_v47, %v826_v45  ;;  %1087 = vmatmul.msk.f32.gmra.mxu3 %vm335_vm0, %v304_v62 }
  0xb7   : > { %v539_v55 = vpop.f32.mrf.mxu2 }
  0xb8   : > { %v482_v50 = vpop.f32.mrf.mxu0  ;;  %v1386_v56 = vadd.f32 %v679_v44, %v539_v55  ;;  %v685_v7 = vpop.f32.mrf.mxu3 }
  0xb9   : > { %v625_v51 = vpop.f32.mrf.mxu1  ;;  %v623_v54 = vadd.f32 %v622_v38, %v482_v50 }
  0xba   : > { %760 = vst [vmem:[%s1366_s9 + $0xa8] sm:$0xff] %v1386_v56 }
  0xbb   : > { %741 = vst [vmem:[%s1366_s9 + $0x10] sm:$0xff] %v623_v54  ;;  %v781_v59 = vadd.f32 %v780_v46, %v623_v54  ;;  %v828_v60 = vmul.f32 %v623_v54, %v623_v54  ;;  %529 = vmatmul.f32.gmra.mxu0 %v261_v52 }
  0xbc   : > { %1067 = vmatmul.msk.f32.gmra.mxu1 %vm335_vm0, %v264_v53  ;;  %589 = vmatmul.f32.gmra.mxu2 %v301_v57 }
  0xbd   : > { %v868_v61 = vadd.f32 %v867_v48, %v828_v60  ;;  %1088 = vmatmul.msk.f32.gmra.mxu3 %vm335_vm0, %v306_v11 }
  0xbf   : > { %v542_v4 = vpop.f32.mrf.mxu2 }
  0xc0   : > { %v485_v63 = vpop.f32.mrf.mxu0  ;;  %v1397_v5 = vadd.f32 %v682_v58, %v542_v4  ;;  %v688_v18 = vpop.f32.mrf.mxu3 }
  0xc1   : > { %v628_v0 = vpop.f32.mrf.mxu1  ;;  %v626_v3 = vadd.f32 %v625_v51, %v485_v63 }
  0xc2   : > { %761 = vst [vmem:[%s1366_s9 + $0xb0] sm:$0xff] %v1397_v5 }
  0xc3   : > { %742 = vst [vmem:[%s1366_s9 + $0x18] sm:$0xff] %v626_v3  ;;  %v782_v8 = vadd.f32 %v781_v59, %v626_v3  ;;  %v829_v9 = vmul.f32 %v626_v3, %v626_v3  ;;  %532 = vmatmul.f32.gmra.mxu0 %v263_v1 }
  0xc4   : > { %1068 = vmatmul.msk.f32.gmra.mxu1 %vm335_vm0, %v266_v2  ;;  %592 = vmatmul.f32.gmra.mxu2 %v303_v6 }
  0xc5   : > { %v869_v10 = vadd.f32 %v868_v61, %v829_v9 }
  0xc7   : > { %v545_v15 = vpop.f32.mrf.mxu2 }
  0xc8   : > { %v488_v12 = vpop.f32.mrf.mxu0  ;;  %v1406_v16 = vadd.f32 %v685_v7, %v545_v15  ;;  %v691_v27 = vpop.f32.mrf.mxu3 }
  0xc9   : > { %v631_v13 = vpop.f32.mrf.mxu1  ;;  %v629_v14 = vadd.f32 %v628_v0, %v488_v12 }
  0xca   : > { %762 = vst [vmem:[%s1366_s9 + $0xb8] sm:$0xff] %v1406_v16 }
  0xcb   : > { %743 = vst [vmem:[%s1366_s9 + $0x20] sm:$0xff] %v629_v14  ;;  %v783_v19 = vadd.f32 %v782_v8, %v629_v14  ;;  %v830_v20 = vmul.f32 %v629_v14, %v629_v14 }
  0xcc   : > { %595 = vmatmul.f32.gmra.mxu2 %v305_v17 }
  0xcd   : > { %v870_v21 = vadd.f32 %v869_v10, %v830_v20 }
  0xcf   : > { %v548_v25 = vpop.f32.mrf.mxu2 }
  0xd0   : > { %v491_v22 = vpop.f32.mrf.mxu0  ;;  %v1412_v26 = vadd.f32 %v688_v18, %v548_v25  ;;  %v694_v36 = vpop.f32.mrf.mxu3 }
  0xd1   : > { %v634_v23 = vpop.f32.mrf.mxu1  ;;  %v632_v24 = vadd.f32 %v631_v13, %v491_v22 }
  0xd2   : > { %763 = vst [vmem:[%s1366_s9 + $0xc0] sm:$0xff] %v1412_v26 }
  0xd3   : > { %744 = vst [vmem:[%s1366_s9 + $0x28] sm:$0xff] %v632_v24  ;;  %v784_v28 = vadd.f32 %v783_v19, %v632_v24  ;;  %v831_v29 = vmul.f32 %v632_v24, %v632_v24 }
  0xd5   : > { %v871_v30 = vadd.f32 %v870_v21, %v831_v29 }
  0xd7   : > { %v551_v34 = vpop.f32.mrf.mxu2 }
  0xd8   : > { %v494_v31 = vpop.f32.mrf.mxu0  ;;  %v1417_v35 = vadd.f32 %v691_v27, %v551_v34  ;;  %v697_v46 = vpop.f32.mrf.mxu3 }
  0xd9   : > { %v637_v32 = vpop.f32.mrf.mxu1  ;;  %v635_v33 = vadd.f32 %v634_v23, %v494_v31 }
  0xda   : > { %764 = vst [vmem:[%s1366_s9 + $0xc8] sm:$0xff] %v1417_v35 }
  0xdb   : > { %745 = vst [vmem:[%s1366_s9 + $0x30] sm:$0xff] %v635_v33  ;;  %v785_v37 = vadd.f32 %v784_v28, %v635_v33  ;;  %v832_v38 = vmul.f32 %v635_v33, %v635_v33 }
  0xdd   : > { %v872_v39 = vadd.f32 %v871_v30, %v832_v38 }
  0xdf   : > { %v554_v44 = vpop.f32.mrf.mxu2 }
  0xe0   : > { %v497_v40 = vpop.f32.mrf.mxu0  ;;  %v1422_v45 = vadd.f32 %v694_v36, %v554_v44  ;;  %v700_v55 = vpop.f32.mrf.mxu3 }
  0xe1   : > { %v640_v41 = vpop.f32.mrf.mxu1  ;;  %v638_v43 = vadd.f32 %v637_v32, %v497_v40 }
  0xe2   : > { %765 = vst [vmem:[%s1366_s9 + $0xd0] sm:$0xff] %v1422_v45 }
  0xe3   : > { %746 = vst [vmem:[%s1366_s9 + $0x38] sm:$0xff] %v638_v43  ;;  %v786_v47 = vadd.f32 %v785_v37, %v638_v43  ;;  %v833_v48 = vmul.f32 %v638_v43, %v638_v43 }
  0xe5   : > { %v873_v49 = vadd.f32 %v872_v39, %v833_v48 }
  0xe7   : > { %v557_v53 = vpop.f32.mrf.mxu2 }
  0xe8   : > { %v500_v50 = vpop.f32.mrf.mxu0  ;;  %v1427_v54 = vadd.f32 %v697_v46, %v557_v53  ;;  %v703_v1 = vpop.f32.mrf.mxu3 }
  0xe9   : > { %v643_v51 = vpop.f32.mrf.mxu1  ;;  %v641_v52 = vadd.f32 %v640_v41, %v500_v50 }
  0xea   : > { %766 = vst [vmem:[%s1366_s9 + $0xd8] sm:$0xff] %v1427_v54 }
  0xeb   : > { %747 = vst [vmem:[%s1366_s9 + $0x40] sm:$0xff] %v641_v52  ;;  %v1430_v57 = vadd.f32 %v786_v47, %v641_v52  ;;  %v834_v58 = vmul.f32 %v641_v52, %v641_v52 }
  0xed   : > { %v1434_v59 = vadd.f32 %v873_v49, %v834_v58 }
  0xef   : > { %v560_v63 = vpop.f32.mrf.mxu2 }
  0xf0   : > { %v503_v60 = vpop.f32.mrf.mxu0  ;;  %v1438_v0 = vadd.f32 %v700_v55, %v560_v63  ;;  %v706_v8 = vpop.f32.mrf.mxu3 }
  0xf1   : > { %v646_v61 = vpop.f32.mrf.mxu1  ;;  %v1436_v62 = vadd.f32 %v643_v51, %v503_v60 }
  0xf2   : > { %767 = vst [vmem:[%s1366_s9 + $0xe0] sm:$0xff] %v1438_v0 }
  0xf3   : > { %748 = vst [vmem:[%s1366_s9 + $0x48] sm:$0xff] %v1436_v62  ;;  %v835_v50 = vmul.f32 %v1436_v62, %v1436_v62  ;;  %v788_v51 = vadd.f32 %v1430_v57, %v1436_v62 }
  0xf5   : > { %v875_v58 = vadd.f32 %v1434_v59, %v835_v50 }
  0xf7   : > { %v563_v6 = vpop.f32.mrf.mxu2 }
  0xf8   : > { %v506_v2 = vpop.f32.mrf.mxu0  ;;  %v1444_v7 = vadd.f32 %v703_v1, %v563_v6  ;;  %v709_v14 = vpop.f32.mrf.mxu3 }
  0xf9   : > { %v649_v3 = vpop.f32.mrf.mxu1  ;;  %v647_v4 = vadd.f32 %v646_v61, %v506_v2 }
  0xfa   : > { %768 = vst [vmem:[%s1366_s9 + $0xe8] sm:$0xff] %v1444_v7 }
  0xfb   : > { %749 = vst [vmem:[%s1366_s9 + $0x50] sm:$0xff] %v647_v4  ;;  %v836_v52 = vmul.f32 %v647_v4, %v647_v4  ;;  %v789_v60 = vadd.f32 %v788_v51, %v647_v4 }
  0xff   : > { %v566_v12 = vpop.f32.mrf.mxu2 }
 0x100   : > { %v509_v9 = vpop.f32.mrf.mxu0  ;;  %v1449_v13 = vadd.f32 %v706_v8, %v566_v12  ;;  %v712_v21 = vpop.f32.mrf.mxu3 }
 0x101   : > { %v652_v10 = vpop.f32.mrf.mxu1  ;;  %v650_v11 = vadd.f32 %v649_v3, %v509_v9  ;;  %v876_v3 = vadd.f32 %v875_v58, %v836_v52 }
 0x102   : > { %769 = vst [vmem:[%s1366_s9 + $0xf0] sm:$0xff] %v1449_v13 }
 0x103   : > { %750 = vst [vmem:[%s1366_s9 + $0x58] sm:$0xff] %v650_v11  ;;  %v837_v61 = vmul.f32 %v650_v11, %v650_v11  ;;  %v790_v6 = vadd.f32 %v789_v60, %v650_v11  ;;  %v847_v60 = vmul.f32 %v1386_v56, %v1386_v56 }
 0x107   : > { %v569_v19 = vpop.f32.mrf.mxu2 }
 0x108   : > { %v512_v15 = vpop.f32.mrf.mxu0  ;;  %v1454_v20 = vadd.f32 %v709_v14, %v569_v19  ;;  %v715_v28 = vpop.f32.mrf.mxu3 }
 0x109   : > { %v655_v17 = vpop.f32.mrf.mxu1  ;;  %v653_v18 = vadd.f32 %v652_v10, %v512_v15  ;;  %v877_v10 = vadd.f32 %v876_v3, %v837_v61 }
 0x10a   : > { %770 = vst [vmem:[%s1366_s9 + $0xf8] sm:$0xff] %v1454_v20 }
 0x10b   : > { %751 = vst [vmem:[%s1366_s9 + $0x60] sm:$0xff] %v653_v18  ;;  %v838_v8 = vmul.f32 %v653_v18, %v653_v18  ;;  %v791_v57 = vadd.f32 %v790_v6, %v653_v18 }
 0x10d   : > { %v878_v12 = vadd.f32 %v877_v10, %v838_v8 }
 0x10f   : > { %v572_v25 = vpop.f32.mrf.mxu2 }
 0x110   : > { %v515_v22 = vpop.f32.mrf.mxu0  ;;  %v1459_v27 = vadd.f32 %v712_v21, %v572_v25  ;;  %v718_v34 = vpop.f32.mrf.mxu3 }
 0x111   : > { %v658_v23 = vpop.f32.mrf.mxu1  ;;  %v656_v24 = vadd.f32 %v655_v17, %v515_v22 }
 0x112   : > { %771 = vst [vmem:[%s1366_s9 + $0x100] sm:$0xff] %v1459_v27 }
 0x113   : > { %752 = vst [vmem:[%s1366_s9 + $0x68] sm:$0xff] %v656_v24  ;;  %v839_v62 = vmul.f32 %v656_v24, %v656_v24  ;;  %v792_v59 = vadd.f32 %v791_v57, %v656_v24 }
 0x115   : > { %v879_v17 = vadd.f32 %v878_v12, %v839_v62 }
 0x117   : > { %v575_v32 = vpop.f32.mrf.mxu2 }
 0x118   : > { %v518_v29 = vpop.f32.mrf.mxu0  ;;  %v1464_v33 = vadd.f32 %v715_v28, %v575_v32  ;;  %v721_v41 = vpop.f32.mrf.mxu3 }
 0x119   : > { %v661_v30 = vpop.f32.mrf.mxu1  ;;  %v659_v31 = vadd.f32 %v658_v23, %v518_v29 }
 0x11a   : > { %772 = vst [vmem:[%s1366_s9 + $0x108] sm:$0xff] %v1464_v33 }
 0x11b   : > { %753 = vst [vmem:[%s1366_s9 + $0x70] sm:$0xff] %v659_v31  ;;  %v840_v4 = vmul.f32 %v659_v31, %v659_v31  ;;  %v793_v19 = vadd.f32 %v792_v59, %v659_v31 }
 0x11d   : > { %v880_v25 = vadd.f32 %v879_v17, %v840_v4 }
 0x11f   : > { %v578_v39 = vpop.f32.mrf.mxu2 }
 0x120   : > { %v521_v36 = vpop.f32.mrf.mxu0  ;;  %v1469_v40 = vadd.f32 %v718_v34, %v578_v39  ;;  %v724_v49 = vpop.f32.mrf.mxu3 }
 0x121   : > { %v664_v37 = vpop.f32.mrf.mxu1  ;;  %v662_v38 = vadd.f32 %v661_v30, %v521_v36 }
 0x122   : > { %773 = vst [vmem:[%s1366_s9 + $0x110] sm:$0xff] %v1469_v40 }
 0x123   : > { %754 = vst [vmem:[%s1366_s9 + $0x78] sm:$0xff] %v662_v38  ;;  %v841_v21 = vmul.f32 %v662_v38, %v662_v38  ;;  %v794_v28 = vadd.f32 %v793_v19, %v662_v38 }
 0x125   : > { %v881_v30 = vadd.f32 %v880_v25, %v841_v21 }
 0x127   : > { %v581_v47 = vpop.f32.mrf.mxu2 }
 0x128   : > { %v524_v43 = vpop.f32.mrf.mxu0  ;;  %v1474_v48 = vadd.f32 %v721_v41, %v581_v47  ;;  %v727_v9 = vpop.f32.mrf.mxu3 }
 0x129   : > { %v667_v44 = vpop.f32.mrf.mxu1  ;;  %v665_v46 = vadd.f32 %v664_v37, %v524_v43 }
 0x12a   : > { %774 = vst [vmem:[%s1366_s9 + $0x118] sm:$0xff] %v1474_v48 }
 0x12b   : > { %755 = vst [vmem:[%s1366_s9 + $0x80] sm:$0xff] %v665_v46  ;;  %v842_v29 = vmul.f32 %v665_v46, %v665_v46  ;;  %v795_v24 = vadd.f32 %v794_v28, %v665_v46 }
 0x12d   : > { %v882_v34 = vadd.f32 %v881_v30, %v842_v29  ;;  %v855_v29 = vmul.f32 %v1444_v7, %v1444_v7  ;;  %v856_v30 = vmul.f32 %v1449_v13, %v1449_v13 }
 0x12f   : > { %v584_v1 = vpop.f32.mrf.mxu2 }
 0x130   : > { %v527_v53 = vpop.f32.mrf.mxu0  ;;  %v1484_v2 = vadd.f32 %v724_v49, %v584_v1  ;;  %v730_v18 = vpop.f32.mrf.mxu3 }
 0x131   : > { %v670_v55 = vpop.f32.mrf.mxu1  ;;  %v668_v63 = vadd.f32 %v667_v44, %v527_v53 }
 0x132   : > { %775 = vst [vmem:[%s1366_s9 + $0x120] sm:$0xff] %v1484_v2 }
 0x133   : > { %756 = vst [vmem:[%s1366_s9 + $0x88] sm:$0xff] %v668_v63  ;;  %v843_v32 = vmul.f32 %v668_v63, %v668_v63  ;;  %v796_v36 = vadd.f32 %v795_v24, %v668_v63  ;;  %v848_v63 = vmul.f32 %v1397_v5, %v1397_v5 }
 0x135   : > { %v883_v41 = vadd.f32 %v882_v34, %v843_v32  ;;  %v857_v32 = vmul.f32 %v1454_v20, %v1454_v20 }
 0x137   : > { %v587_v11 = vpop.f32.mrf.mxu2 }
 0x138   : > { %v530_v14 = vpop.f32.mrf.mxu0  ;;  %v1489_v23 = vadd.f32 %v727_v9, %v587_v11  ;;  %v733_v58 = vpop.f32.mrf.mxu3  ;;  %v849_v9 = vmul.f32 %v1406_v16, %v1406_v16 }
 0x139   : > { %v673_v15 = vpop.f32.mrf.mxu1  ;;  %v671_v22 = vadd.f32 %v670_v55, %v530_v14 }
 0x13a   : > { %776 = vst [vmem:[%s1366_s9 + $0x128] sm:$0xff] %v1489_v23 }
 0x13b   : > { %757 = vst [vmem:[%s1366_s9 + $0x90] sm:$0xff] %v671_v22  ;;  %v844_v31 = vmul.f32 %v671_v22, %v671_v22  ;;  %v797_v43 = vadd.f32 %v796_v36, %v671_v22  ;;  %v853_v22 = vmul.f32 %v1427_v54, %v1427_v54 }
 0x13d   : > { %v884_v50 = vadd.f32 %v883_v41, %v844_v31 }
 0x13f   : > { %v590_v47 = vpop.f32.mrf.mxu2 }
 0x140   : > { %v533_v37 = vpop.f32.mrf.mxu0  ;;  %v1495_v49 = vadd.f32 %v730_v18, %v590_v47  ;;  %v736_v14 = vpop.f32.mrf.mxu3 }
 0x141   : > { %v676_v39 = vpop.f32.mrf.mxu1  ;;  %v674_v44 = vadd.f32 %v673_v15, %v533_v37  ;;  %v852_v15 = vmul.f32 %v1422_v45, %v1422_v45 }
 0x142   : > { %v677_v38 = vadd.f32 %v676_v39, %v1377_v42  ;;  %777 = vst [vmem:[%s1366_s9 + $0x130] sm:$0xff] %v1495_v49 }
 0x143   : > { %758 = vst [vmem:[%s1366_s9 + $0x98] sm:$0xff] %v674_v44  ;;  %v798_v51 = vadd.f32 %v797_v43, %v674_v44  ;;  %v845_v46 = vmul.f32 %v674_v44, %v674_v44 }
 0x144   : > { %759 = vst [vmem:[%s1366_s9 + $0xa0] sm:$0xff] %v677_v38  ;;  %v846_v55 = vmul.f32 %v677_v38, %v677_v38 }
 0x145   : > { %v885_v52 = vadd.f32 %v884_v50, %v845_v46  ;;  %v799_v53 = vadd.f32 %v798_v51, %v677_v38  ;;  %v861_v38 = vmul.f32 %v1474_v48, %v1474_v48 }
 0x147   : > { %v800_v42 = vadd.f32 %v799_v53, %v1386_v56  ;;  %v886_v61 = vadd.f32 %v885_v52, %v846_v55  ;;  %v593_v6 = vpop.f32.mrf.mxu2  ;;  %v850_v56 = vmul.f32 %v1412_v26, %v1412_v26 }
 0x148   : > { %v734_v8 = vadd.f32 %v733_v58, %v593_v6 }
 0x149   : > { %v801_v1 = vadd.f32 %v800_v42, %v1397_v5  ;;  %v887_v3 = vadd.f32 %v886_v61, %v847_v60  ;;  %v851_v5 = vmul.f32 %v1417_v35, %v1417_v35 }
 0x14a   : > { %778 = vst [vmem:[%s1366_s9 + $0x138] sm:$0xff] %v734_v8  ;;  %v865_v60 = vmul.f32 %v734_v8, %v734_v8 }
 0x14b   : > { %v802_v10 = vadd.f32 %v801_v1, %v1406_v16  ;;  %v888_v57 = vadd.f32 %v887_v3, %v848_v63  ;;  %v913_v3 = vlaneseq }
 0x14d   : > { %v803_v62 = vadd.f32 %v802_v10, %v1412_v26  ;;  %v889_v12 = vadd.f32 %v888_v57, %v849_v9  ;;  %v914_v57 = vshrl.u32 %v913_v3, 7 }
 0x14f   : > { %v804_v59 = vadd.f32 %v803_v62, %v1417_v35  ;;  %v890_v4 = vadd.f32 %v889_v12, %v850_v56  ;;  %v596_v19 = vpop.f32.mrf.mxu2  ;;  %v854_v35 = vmul.f32 %v1438_v0, %v1438_v0  ;;  %vm915_vm1 = vcmp.eq.s32.totalorder %v914_v57, 0 }
 0x150   : > { %v737_v21 = vadd.f32 %v736_v14, %v596_v19 }
 0x151   : > { %v805_v16 = vadd.f32 %v804_v59, %v1422_v45  ;;  %v891_v17 = vadd.f32 %v890_v4, %v851_v5 }
 0x152   : > { %779 = vst [vmem:[%s1366_s9 + $0x140] sm:$0xff] %v737_v21  ;;  %v866_v42 = vmul.f32 %v737_v21, %v737_v21 }
 0x153   : > { %v806_v26 = vadd.f32 %v805_v16, %v1427_v54  ;;  %v892_v11 = vadd.f32 %v891_v17, %v852_v15 }
 0x155   : > { %v893_v25 = vadd.f32 %v892_v11, %v853_v22  ;;  %v807_v28 = vadd.f32 %v806_v26, %v1438_v0  ;;  %v858_v0 = vmul.f32 %v1459_v27, %v1459_v27 }
 0x157   : > { %v808_v45 = vadd.f32 %v807_v28, %v1444_v7  ;;  %v894_v18 = vadd.f32 %v893_v25, %v854_v35  ;;  %v859_v7 = vmul.f32 %v1464_v33, %v1464_v33 }
 0x159   : > { %v809_v24 = vadd.f32 %v808_v45, %v1449_v13  ;;  %v895_v54 = vadd.f32 %v894_v18, %v855_v29  ;;  %v860_v13 = vmul.f32 %v1469_v40, %v1469_v40 }
 0x15b   : > { %v810_v34 = vadd.f32 %v809_v24, %v1454_v20  ;;  %v896_v36 = vadd.f32 %v895_v54, %v856_v30 }
 0x15d   : > { %v811_v31 = vadd.f32 %v810_v34, %v1459_v27  ;;  %v897_v37 = vadd.f32 %v896_v36, %v857_v32 }
 0x15f   : > { %v812_v39 = vadd.f32 %v811_v31, %v1464_v33  ;;  %v898_v41 = vadd.f32 %v897_v37, %v858_v0  ;;  %v862_v33 = vmul.f32 %v1484_v2, %v1484_v2 }
 0x161   : > { %v813_v43 = vadd.f32 %v812_v39, %v1469_v40  ;;  %v899_v44 = vadd.f32 %v898_v41, %v859_v7  ;;  %v863_v40 = vmul.f32 %v1489_v23, %v1489_v23 }
 0x163   : > { %v814_v20 = vadd.f32 %v813_v43, %v1474_v48  ;;  %v900_v47 = vadd.f32 %v899_v44, %v860_v13  ;;  %v864_v48 = vmul.f32 %v1495_v49, %v1495_v49 }
 0x165   : > { %v901_v27 = vadd.f32 %v900_v47, %v861_v38  ;;  %v815_v50 = vadd.f32 %v814_v20, %v1484_v2 }
 0x167   : > { %v902_v51 = vadd.f32 %v901_v27, %v862_v33  ;;  %v816_v46 = vadd.f32 %v815_v50, %v1489_v23 }
 0x169   : > { %v903_v52 = vadd.f32 %v902_v51, %v863_v40  ;;  %v817_v53 = vadd.f32 %v816_v46, %v1495_v49 }
 0x16b   : > { %v904_v55 = vadd.f32 %v903_v52, %v864_v48  ;;  %v818_v58 = vadd.f32 %v817_v53, %v734_v8 }
 0x16d   : > { %v905_v61 = vadd.f32 %v904_v55, %v865_v60  ;;  %v819_v63 = vadd.f32 %v818_v58, %v737_v21 }
 0x16f   : > { %v820_v2 = vrot.slane %v819_v63, 4  ;;  %v906_v1 = vadd.f32 %v905_v61, %v866_v42 }
 0x171   : > { %v821_v6 = vadd.f32 %v820_v2, %v819_v63  ;;  %v907_v9 = vrot.slane %v906_v1, 4 }
 0x173   : > { %v822_v23 = vrot.slane %v821_v6, 2  ;;  %v908_v10 = vadd.f32 %v907_v9, %v906_v1 }
 0x175   : > { %v823_v56 = vadd.f32 %v822_v23, %v821_v6  ;;  %v909_v62 = vrot.slane %v908_v10, 2 }
 0x177   : > { %v824_v49 = vrot.slane %v823_v56, 1  ;;  %v910_v12 = vadd.f32 %v909_v62, %v908_v10 }
 0x179   : > { %v825_v8 = vadd.f32 %v824_v49, %v823_v56  ;;  %v911_v5 = vrot.slane %v910_v12, 1 }
 0x17b   : > { %v912_v59 = vadd.f32 %v911_v5, %v910_v12  ;;  %v916_v4 = vsel %vm915_vm1, %v825_v8, 0.0 }
 0x17c   : > { %917 = vst [vmem:[%s220_s12] sm:$0xff] %v916_v4 }
 0x17d   : > { %v918_v14 = vsel %vm915_vm1, %v912_v59, 0.0 }
 0x17e   : > { %919 = vst [vmem:[%s224_s17] sm:$0xff] %v918_v14 }
 0x17f PF: > { %s15_s15 = sadd.s32 1, %s1134_s15  }
 0x180   : > { %p12_p5 = scmp.ge.s32.totalorder %s15_s15, 4  }
 0x182   :  { %14 = sbr.rel (!%p12_p5) target bundleno = 1 (0x1), region = 82 }

</bundles_post_ra>
